<compile_context>
chip_gen: v7x
topology: tpu7x:2x2x1
jax: 0.10.0
libtpu: 0.0.40
codegen_flags: <defaults>
</compile_context>

<pallas_src>
import functools

import jax
import jax.numpy as jnp
from jax.experimental import pallas as pl
from jax.experimental.pallas import tpu as pltpu


def _round_up(x, m):
    return (x + m - 1) // m * m


def _pick_band_rows(H, Wp_pad, target_pixels=512):
    """Largest divisor of H whose band (rows * padded row stride) fits the target."""
    best = 1
    for d in range(1, H + 1):
        if H % d == 0 and d * Wp_pad <= target_pixels:
            best = d
    if best == H and H > 1 and H % 2 == 0:
        best = H // 2          # keep >= 2 grid steps for pipeline depth / megacore
    return best


# ------------------------------ fused kernel ------------------------------- #

def _bottleneck_kernel(x_ref, w1_ref, b1_ref, w2_ref, b2_ref, w3_ref, b3_ref,
                       o_ref, *, H, W, Hb, Wp_pad):
    """One (batch image, row band) per grid step.

    x_ref  : (Pq, Cin_p)      bf16  whole padded image, flattened pixels
    w1_ref : (Cin_p, Cw_p)    bf16  (BN1 scale folded in)
    w2_ref : (9*Cw_p, Cw_p)   bf16  (BN2 scale folded in), tap-major K blocks
    w3_ref : (Cw_p, Cout_p)   bf16  (BN3 scale folded in)
    b*_ref : (1, C)           f32   folded BN biases
    o_ref  : (Hb, W, Cout_p)  bf16  only the real columns of this row band
    """
    shift = Wp_pad.bit_length() - 1          # log2(Wp_pad); Wp_pad is a power of two
    M = Hb * Wp_pad                          # band output pixels (incl. padded cols)
    L = (Hb + 2) * Wp_pad + 16               # band input slab: rows + 1-row halo + tail
    row_off = pl.multiple_of(pl.program_id(1) * M, M)

    xs = x_ref[pl.ds(row_off, L), :]         # (L, Cin_p) bf16

    # ---- conv1 (1x1) + bn1 + relu on the band slab; zero spatial-padding pixels.
    h1 = jnp.dot(xs, w1_ref[...], preferred_element_type=jnp.float32) + b1_ref[...]
    # interior-pixel mask generated in-kernel (no extra HBM stream):
    p = jax.lax.broadcasted_iota(jnp.int32, (L, 1), 0) + (row_off - 1)
    col = jnp.bitwise_and(p, Wp_pad - 1)
    row = jnp.right_shift(p, shift)
    real = (col >= 1) & (col <= W) & (row >= 1) & (row <= H)
    h1 = jnp.where(real, jnp.maximum(h1, 0.0), 0.0).astype(jnp.bfloat16)   # (L, Cw_p)

    # ---- conv2 (3x3, pad=1, stride=1) + bn2 + relu: im2col slab along lanes,
    # one K = 9*Cw_p MXU dot (accumulation in the MXU, no 8 f32 VPU adds).
    wins = [h1[kh * Wp_pad + kw: kh * Wp_pad + kw + M, :]
            for kh in range(3) for kw in range(3)]
    slab = jnp.concatenate(wins, axis=1)                       # (M, 9*Cw_p) bf16
    h2 = jnp.dot(slab, w2_ref[...], preferred_element_type=jnp.float32) + b2_ref[...]
    h2 = jnp.maximum(h2, 0.0).astype(jnp.bfloat16)              # (M, Cw_p)

    # ---- conv3 (1x1) + bn3 + identity + relu
    h3 = jnp.dot(h2, w3_ref[...], preferred_element_type=jnp.float32) + b3_ref[...]
    res = xs[Wp_pad + 1: Wp_pad + 1 + M, :].astype(jnp.float32)  # aligned identity
    out = jnp.maximum(h3 + res, 0.0)                             # (M, Cout_p) f32

    # ---- store only the real W columns, bf16 (halves / trims the writeback stream)
    out = out.reshape(Hb, Wp_pad, out.shape[-1])[:, 1:W + 1, :]
    o_ref[...] = out.astype(o_ref.dtype)


# ------------------------------- JAX wrapper -------------------------------- #

def bottleneck_forward(x_nchw, params, eps=1e-5, out_layout="NCHW",
                       out_dtype=jnp.float32):
    """Dense Bottleneck forward (eval-mode BN). Input NCHW f32."""
    N, Cin, H, W = x_nchw.shape
    w1, w2, w3 = params["conv1"], params["conv2"], params["conv3"]
    width = w1.shape[0]
    Cout = w3.shape[0]
    assert Cin == Cout, "downsample=None path requires inplanes == planes*expansion"

    LANE = 128
    Cin_p = _round_up(Cin, LANE)
    Cw_p = _round_up(width, LANE)
    Cout_p = _round_up(Cout, LANE)
    assert Cin_p == Cout_p
    # NOTE: for genuinely narrow layers (e.g. width=4 in the test below) most of the
    # MXU work is zero padding; this kernel is sized for real ResNet widths (>=64).

    # padded row stride = power of two >= W+2: kh window offsets sublane-aligned,
    # and the in-kernel pixel mask needs only shift/and.
    Wp_pad = 8
    while Wp_pad < W + 2:
        Wp_pad *= 2
    Hp = H + 2
    Hb = _pick_band_rows(H, Wp_pad)
    n_bands = H // Hb
    Pq = Hp * Wp_pad + 16        # 1 leading zero pixel + padded image + 15 trailing

    # ---- fold BN (running stats) scale into conv weights, keep f32 per-channel bias
    def fold(gamma, beta, mean, var):
        s = gamma / jnp.sqrt(var + eps)
        return s, beta - mean * s

    s1, b1 = fold(*params["bn1"])
    s2, b2 = fold(*params["bn2"])
    s3, b3 = fold(*params["bn3"])
    # NOTE: folded weights are cast to bf16; extremely small running_var would lose
    # precision there (fine for typical checkpoints).

    def pad2(m, r, c):
        return jnp.pad(m, ((0, r - m.shape[0]), (0, c - m.shape[1])))

    w1m = pad2(w1.reshape(width, Cin).T * s1[None, :], Cin_p, Cw_p).astype(jnp.bfloat16)
    w2t = jnp.transpose(w2, (2, 3, 1, 0)).reshape(9, width, width) * s2[None, None, :]
    w2t = jnp.pad(w2t, ((0, 0), (0, Cw_p - width), (0, Cw_p - width)))
    w2m = w2t.reshape(9 * Cw_p, Cw_p).astype(jnp.bfloat16)       # tap-major K blocks
    w3m = pad2(w3.reshape(Cout, width).T * s3[None, :], Cw_p, Cout_p).astype(jnp.bfloat16)

    b1m = jnp.pad(b1, (0, Cw_p - width)).reshape(1, Cw_p).astype(jnp.float32)
    b2m = jnp.pad(b2, (0, Cw_p - width)).reshape(1, Cw_p).astype(jnp.float32)
    b3m = jnp.pad(b3, (0, Cout_p - Cout)).reshape(1, Cout_p).astype(jnp.float32)

    # ---- activations: NHWC, 1px top/left halo, right pad to Wp_pad, channel pad,
    # flatten pixels, 1 extra zero pixel in front / 15 behind; bf16.
    x_nhwc = jnp.transpose(x_nchw, (0, 2, 3, 1)).astype(jnp.bfloat16)
    xp = jnp.pad(x_nhwc, ((0, 0), (1, 1), (1, Wp_pad - 1 - W), (0, Cin_p - Cin)))
    xp = xp.reshape(N, Hp * Wp_pad, Cin_p)
    xp = jnp.pad(xp, ((0, 0), (1, 15), (0, 0)))                  # (N, Pq, Cin_p)

    kernel = functools.partial(_bottleneck_kernel, H=H, W=W, Hb=Hb, Wp_pad=Wp_pad)

    M = Hb * Wp_pad
    L = (Hb + 2) * Wp_pad + 16
    flops = 2 * N * n_bands * (L * Cin_p * Cw_p
                               + M * 9 * Cw_p * Cw_p
                               + M * Cw_p * Cout_p)
    bytes_accessed = (N * Pq * Cin_p * 2 + N * H * W * Cout_p * 2
                      + (w1m.size + w2m.size + w3m.size) * 2
                      + (b1m.size + b2m.size + b3m.size) * 4)

    out = pl.pallas_call(
        kernel,
        out_shape=jax.ShapeDtypeStruct((N, H, W, Cout_p), jnp.bfloat16),
        grid_spec=pltpu.PrefetchScalarGridSpec(
            num_scalar_prefetch=0,
            grid=(N, n_bands),
            in_specs=[
                pl.BlockSpec((None, Pq, Cin_p), lambda n, b: (n, 0, 0)),  # x (whole image)
                pl.BlockSpec((Cin_p, Cw_p), lambda n, b: (0, 0)),         # w1 (bn1 folded)
                pl.BlockSpec((1, Cw_p), lambda n, b: (0, 0)),             # b1
                pl.BlockSpec((9 * Cw_p, Cw_p), lambda n, b: (0, 0)),      # w2 im2col slab
                pl.BlockSpec((1, Cw_p), lambda n, b: (0, 0)),             # b2
                pl.BlockSpec((Cw_p, Cout_p), lambda n, b: (0, 0)),        # w3
                pl.BlockSpec((1, Cout_p), lambda n, b: (0, 0)),           # b3
            ],
            out_specs=pl.BlockSpec((None, Hb, W, Cout_p), lambda n, b: (n, b, 0, 0)),
        ),
        compiler_params=pltpu.CompilerParams(
            dimension_semantics=("parallel", "parallel"),
            vmem_limit_bytes=32 * 1024 * 1024),
        cost_estimate=pl.CostEstimate(flops=int(flops), transcendentals=0,
                                      bytes_accessed=int(bytes_accessed)),
    )(xp, w1m, b1m, w2m, b2m, w3m, b3m)

    out = out[..., :Cout]                       # no-op when Cout is a lane multiple
    if out_layout == "NHWC":                    # preferred: avoids a layout round trip
        return out.astype(out_dtype)
    return jnp.transpose(out, (0, 3, 1, 2)).astype(out_dtype)   # model boundary only


# ------------------------- pure-JAX reference (f32) ------------------------- #

def _ref_forward(x, params, eps=1e-5):
    def bn(y, gamma, beta, mean, var):
        inv = gamma / jnp.sqrt(var + eps)
        return (y - mean[None, :, None, None]) * inv[None, :, None, None] \
            + beta[None, :, None, None]

    dn = ('NCHW', 'OIHW', 'NCHW')
    out = jax.lax.conv_general_dilated(x, params["conv1"], (1, 1),
                                       ((0, 0), (0, 0)), dimension_numbers=dn)
    out = jax.nn.relu(bn(out, *params["bn1"]))
    out = jax.lax.conv_general_dilated(out, params["conv2"], (1, 1),
                                       ((1, 1), (1, 1)), dimension_numbers=dn)
    out = jax.nn.relu(bn(out, *params["bn2"]))
    out = jax.lax.conv_general_dilated(out, params["conv3"], (1, 1),
                                       ((0, 0), (0, 0)), dimension_numbers=dn)
    out = bn(out, *params["bn3"])
    return jax.nn.relu(out + x)


# ----------------------------------- main ----------------------------------- #

if __name__ == "__main__":
    # inplanes must equal planes * expansion (=4) so downsample=None works.
    N, inplanes, H, W = 2, 16, 16, 16
    planes = 4
    width = planes              # base_width=64, groups=1 -> width = planes
    expansion = 4
    cout = planes * expansion   # == inplanes

    key = jax.random.PRNGKey(0)
    keys = jax.random.split(key, 8)

    def bn_params(k, c):
        k1, k2, k3, k4 = jax.random.split(k, 4)
        gamma = 1.0 + 0.1 * jax.random.normal(k1, (c,), jnp.float32)
        beta = 0.1 * jax.random.normal(k2, (c,), jnp.float32)
        mean = 0.1 * jax.random.normal(k3, (c,), jnp.float32)
        var = jnp.abs(jax.random.normal(k4, (c,), jnp.float32)) + 0.5
        return (gamma, beta, mean, var)

    params = {
        "conv1": 0.2 * jax.random.normal(keys[0], (width, inplanes, 1, 1), jnp.float32),
        "bn1": bn_params(keys[1], width),
        "conv2": 0.2 * jax.random.normal(keys[2], (width, width, 3, 3), jnp.float32),
        "bn2": bn_params(keys[3], width),
        "conv3": 0.2 * jax.random.normal(keys[4], (cout, width, 1, 1), jnp.float32),
        "bn3": bn_params(keys[5], cout),
    }

    x = jax.random.normal(keys[6], (N, inplanes, H, W), jnp.float32)

    out = jax.block_until_ready(bottleneck_forward(x, params))
    ref = jax.block_until_ready(_ref_forward(x, params))

    assert out.shape == (N, cout, H, W)
    err = float(jnp.max(jnp.abs(out - ref)))
    # bf16 matmul operands + bf16 output storage vs an all-f32 reference.
    assert jnp.allclose(out, ref, atol=5e-2, rtol=5e-2), f"max abs err {err}"

    print("KERNEL_OK")
</pallas_src>

<mosaic_0001>
module attributes {stable_mosaic.version = 11 : i64} {
  func.func @_bottleneck_kernel(%arg0: i32, %arg1: i32, %arg2: memref<1x592x128xbf16, #tpu.memory_space<vmem>>, %arg3: memref<128x128xbf16, #tpu.memory_space<vmem>>, %arg4: memref<1x128xf32, #tpu.memory_space<vmem>>, %arg5: memref<1152x128xbf16, #tpu.memory_space<vmem>>, %arg6: memref<1x128xf32, #tpu.memory_space<vmem>>, %arg7: memref<128x128xbf16, #tpu.memory_space<vmem>>, %arg8: memref<1x128xf32, #tpu.memory_space<vmem>>, %arg9: memref<1x8x16x128xbf16, #tpu.memory_space<vmem>>) attributes {dimension_semantics = [#tpu.dimension_semantics<parallel>, #tpu.dimension_semantics<parallel>], iteration_bounds = array<i64: 2, 2>, scalar_prefetch = 0 : i64, scratch_operands = 0 : i64, tpu.core_type = #tpu.core_type<tc>, window_params = [{transform_indices = @transform_0, window_bounds = array<i64: 1, 592, 128>}, {pipeline_mode = #tpu.pipeline_mode<synchronous>, transform_indices = @transform_1, window_bounds = array<i64: 128, 128>}, {pipeline_mode = #tpu.pipeline_mode<synchronous>, transform_indices = @transform_2, window_bounds = array<i64: 1, 128>}, {pipeline_mode = #tpu.pipeline_mode<synchronous>, transform_indices = @transform_3, window_bounds = array<i64: 1152, 128>}, {pipeline_mode = #tpu.pipeline_mode<synchronous>, transform_indices = @transform_4, window_bounds = array<i64: 1, 128>}, {pipeline_mode = #tpu.pipeline_mode<synchronous>, transform_indices = @transform_5, window_bounds = array<i64: 128, 128>}, {pipeline_mode = #tpu.pipeline_mode<synchronous>, transform_indices = @transform_6, window_bounds = array<i64: 1, 128>}, {transform_indices = @transform_7, window_bounds = array<i64: 1, 8, 16, 128>}]} {
    %c256_i32 = arith.constant 256 : i32
    %0 = arith.muli %arg1, %c256_i32 : i32
    %1 = tpu.assume_multiple %0, 256 : i32
    %c0 = arith.constant 0 : index
    %2 = arith.index_cast %1 : i32 to index
    %c0_0 = arith.constant 0 : index
    %3 = vector.load %arg2[%c0, %2, %c0_0] : memref<1x592x128xbf16, #tpu.memory_space<vmem>>, vector<1x336x128xbf16>
    %4 = vector.shape_cast %3 : vector<1x336x128xbf16> to vector<336x128xbf16>
    %c0_1 = arith.constant 0 : index
    %c0_2 = arith.constant 0 : index
    %5 = vector.load %arg3[%c0_1, %c0_2] : memref<128x128xbf16, #tpu.memory_space<vmem>>, vector<128x128xbf16>
    %cst = arith.constant dense<0.000000e+00> : vector<336x128xf32>
    %6 = tpu.matmul %4, %5, %cst {dimension_numbers = #tpu.dot_dimension_numbers<[1], [0], [0], [1], [0, 0, 1, 1], [], []>} : vector<336x128xbf16>, vector<128x128xbf16>, vector<336x128xf32> -> vector<336x128xf32>
    %c0_3 = arith.constant 0 : index
    %c0_4 = arith.constant 0 : index
    %7 = vector.load %arg4[%c0_3, %c0_4] : memref<1x128xf32, #tpu.memory_space<vmem>>, vector<1x128xf32>
    %8 = vector.broadcast %7 : vector<1x128xf32> to vector<336x128xf32>
    %9 = arith.addf %6, %8 : vector<336x128xf32>
    %10 = tpu.iota {dimensions = array<i32: 0>} : vector<336x1xi32>
    %c1_i32 = arith.constant 1 : i32
    %11 = arith.subi %1, %c1_i32 : i32
    %12 = vector.broadcast %11 : i32 to vector<336x1xi32>
    %13 = arith.addi %10, %12 : vector<336x1xi32>
    %c31_i32 = arith.constant 31 : i32
    %14 = vector.broadcast %c31_i32 : i32 to vector<336x1xi32>
    %15 = arith.andi %13, %14 : vector<336x1xi32>
    %c5_i32 = arith.constant 5 : i32
    %16 = vector.broadcast %c5_i32 : i32 to vector<336x1xi32>
    %17 = arith.shrsi %13, %16 : vector<336x1xi32>
    %c1_i32_5 = arith.constant 1 : i32
    %18 = vector.broadcast %c1_i32_5 : i32 to vector<336x1xi32>
    %19 = arith.cmpi sge, %15, %18 : vector<336x1xi32>
    %c16_i32 = arith.constant 16 : i32
    %20 = vector.broadcast %c16_i32 : i32 to vector<336x1xi32>
    %21 = arith.cmpi sle, %15, %20 : vector<336x1xi32>
    %22 = arith.andi %19, %21 : vector<336x1xi1>
    %c1_i32_6 = arith.constant 1 : i32
    %23 = vector.broadcast %c1_i32_6 : i32 to vector<336x1xi32>
    %24 = arith.cmpi sge, %17, %23 : vector<336x1xi32>
    %25 = arith.andi %22, %24 : vector<336x1xi1>
    %c16_i32_7 = arith.constant 16 : i32
    %26 = vector.broadcast %c16_i32_7 : i32 to vector<336x1xi32>
    %27 = arith.cmpi sle, %17, %26 : vector<336x1xi32>
    %28 = arith.andi %25, %27 : vector<336x1xi1>
    %cst_8 = arith.constant 0.000000e+00 : f32
    %29 = vector.broadcast %cst_8 : f32 to vector<336x128xf32>
    %30 = arith.maximumf %9, %29 : vector<336x128xf32>
    %cst_9 = arith.constant 0.000000e+00 : f32
    %31 = vector.shape_cast %28 : vector<336x1xi1> to vector<336x1xi1>
    %32 = vector.broadcast %31 : vector<336x1xi1> to vector<336x128xi1>
    %33 = vector.broadcast %cst_9 : f32 to vector<336x128xf32>
    %34 = arith.select %32, %30, %33 : vector<336x128xi1>, vector<336x128xf32>
    %35 = arith.truncf %34 : vector<336x128xf32> to vector<336x128xbf16>
    %36 = vector.extract_strided_slice %35 {offsets = [0, 0], sizes = [256, 128], strides = [1, 1]} : vector<336x128xbf16> to vector<256x128xbf16>
    %37 = vector.extract_strided_slice %35 {offsets = [1, 0], sizes = [256, 128], strides = [1, 1]} : vector<336x128xbf16> to vector<256x128xbf16>
    %38 = vector.extract_strided_slice %35 {offsets = [2, 0], sizes = [256, 128], strides = [1, 1]} : vector<336x128xbf16> to vector<256x128xbf16>
    %39 = vector.extract_strided_slice %35 {offsets = [32, 0], sizes = [256, 128], strides = [1, 1]} : vector<336x128xbf16> to vector<256x128xbf16>
    %40 = vector.extract_strided_slice %35 {offsets = [33, 0], sizes = [256, 128], strides = [1, 1]} : vector<336x128xbf16> to vector<256x128xbf16>
    %41 = vector.extract_strided_slice %35 {offsets = [34, 0], sizes = [256, 128], strides = [1, 1]} : vector<336x128xbf16> to vector<256x128xbf16>
    %42 = vector.extract_strided_slice %35 {offsets = [64, 0], sizes = [256, 128], strides = [1, 1]} : vector<336x128xbf16> to vector<256x128xbf16>
    %43 = vector.extract_strided_slice %35 {offsets = [65, 0], sizes = [256, 128], strides = [1, 1]} : vector<336x128xbf16> to vector<256x128xbf16>
    %44 = vector.extract_strided_slice %35 {offsets = [66, 0], sizes = [256, 128], strides = [1, 1]} : vector<336x128xbf16> to vector<256x128xbf16>
    %45 = tpu.concatenate %36, %37, %38, %39, %40, %41, %42, %43, %44 in 1 : vector<256x128xbf16>, vector<256x128xbf16>, vector<256x128xbf16>, vector<256x128xbf16>, vector<256x128xbf16>, vector<256x128xbf16>, vector<256x128xbf16>, vector<256x128xbf16>, vector<256x128xbf16> -> vector<256x1152xbf16>
    %c0_10 = arith.constant 0 : index
    %c0_11 = arith.constant 0 : index
    %46 = vector.load %arg5[%c0_10, %c0_11] : memref<1152x128xbf16, #tpu.memory_space<vmem>>, vector<1152x128xbf16>
    %cst_12 = arith.constant dense<0.000000e+00> : vector<256x128xf32>
    %47 = tpu.matmul %45, %46, %cst_12 {dimension_numbers = #tpu.dot_dimension_numbers<[1], [0], [0], [1], [0, 0, 1, 1], [], []>} : vector<256x1152xbf16>, vector<1152x128xbf16>, vector<256x128xf32> -> vector<256x128xf32>
    %c0_13 = arith.constant 0 : index
    %c0_14 = arith.constant 0 : index
    %48 = vector.load %arg6[%c0_13, %c0_14] : memref<1x128xf32, #tpu.memory_space<vmem>>, vector<1x128xf32>
    %49 = vector.broadcast %48 : vector<1x128xf32> to vector<256x128xf32>
    %50 = arith.addf %47, %49 : vector<256x128xf32>
    %cst_15 = arith.constant 0.000000e+00 : f32
    %51 = vector.broadcast %cst_15 : f32 to vector<256x128xf32>
    %52 = arith.maximumf %50, %51 : vector<256x128xf32>
    %53 = arith.truncf %52 : vector<256x128xf32> to vector<256x128xbf16>
    %c0_16 = arith.constant 0 : index
    %c0_17 = arith.constant 0 : index
    %54 = vector.load %arg7[%c0_16, %c0_17] : memref<128x128xbf16, #tpu.memory_space<vmem>>, vector<128x128xbf16>
    %cst_18 = arith.constant dense<0.000000e+00> : vector<256x128xf32>
    %55 = tpu.matmul %53, %54, %cst_18 {dimension_numbers = #tpu.dot_dimension_numbers<[1], [0], [0], [1], [0, 0, 1, 1], [], []>} : vector<256x128xbf16>, vector<128x128xbf16>, vector<256x128xf32> -> vector<256x128xf32>
    %c0_19 = arith.constant 0 : index
    %c0_20 = arith.constant 0 : index
    %56 = vector.load %arg8[%c0_19, %c0_20] : memref<1x128xf32, #tpu.memory_space<vmem>>, vector<1x128xf32>
    %57 = vector.broadcast %56 : vector<1x128xf32> to vector<256x128xf32>
    %58 = arith.addf %55, %57 : vector<256x128xf32>
    %59 = vector.extract_strided_slice %4 {offsets = [33, 0], sizes = [256, 128], strides = [1, 1]} : vector<336x128xbf16> to vector<256x128xbf16>
    %60 = arith.extf %59 : vector<256x128xbf16> to vector<256x128xf32>
    %61 = arith.addf %58, %60 : vector<256x128xf32>
    %cst_21 = arith.constant 0.000000e+00 : f32
    %62 = vector.broadcast %cst_21 : f32 to vector<256x128xf32>
    %63 = arith.maximumf %61, %62 : vector<256x128xf32>
    %64 = vector.shape_cast %63 : vector<256x128xf32> to vector<8x32x128xf32>
    %65 = vector.extract_strided_slice %64 {offsets = [0, 1, 0], sizes = [8, 16, 128], strides = [1, 1, 1]} : vector<8x32x128xf32> to vector<8x16x128xf32>
    %66 = arith.truncf %65 : vector<8x16x128xf32> to vector<8x16x128xbf16>
    %c0_22 = arith.constant 0 : index
    %c0_23 = arith.constant 0 : index
    %c0_24 = arith.constant 0 : index
    %c0_25 = arith.constant 0 : index
    %67 = vector.load %arg9[%c0_22, %c0_23, %c0_24, %c0_25] : memref<1x8x16x128xbf16, #tpu.memory_space<vmem>>, vector<1x8x16x128xbf16>
    %68 = vector.shape_cast %67 : vector<1x8x16x128xbf16> to vector<8x16x128xbf16>
    %69 = vector.shape_cast %66 : vector<8x16x128xbf16> to vector<1x8x16x128xbf16>
    tpu.vector_store %arg9[%c0_22, %c0_23, %c0_24, %c0_25], %69 {strides = array<i32>} : memref<1x8x16x128xbf16, #tpu.memory_space<vmem>>, vector<1x8x16x128xbf16>,
    return
  }
  func.func @transform_0(%arg0: i32, %arg1: i32) -> (i32, i32, i32) {
    %c0_i32 = arith.constant 0 : i32
    %c0_i32_0 = arith.constant 0 : i32
    %c0_i32_1 = arith.constant 0 : i32
    return %arg0, %c0_i32, %c0_i32_0 : i32, i32, i32
  }
  func.func @transform_1(%arg0: i32, %arg1: i32) -> (i32, i32) {
    %c0_i32 = arith.constant 0 : i32
    %c0_i32_0 = arith.constant 0 : i32
    %c0_i32_1 = arith.constant 0 : i32
    return %c0_i32, %c0_i32_0 : i32, i32
  }
  func.func @transform_2(%arg0: i32, %arg1: i32) -> (i32, i32) {
    %c0_i32 = arith.constant 0 : i32
    %c0_i32_0 = arith.constant 0 : i32
    %c0_i32_1 = arith.constant 0 : i32
    return %c0_i32, %c0_i32_0 : i32, i32
  }
  func.func @transform_3(%arg0: i32, %arg1: i32) -> (i32, i32) {
    %c0_i32 = arith.constant 0 : i32
    %c0_i32_0 = arith.constant 0 : i32
    %c0_i32_1 = arith.constant 0 : i32
    return %c0_i32, %c0_i32_0 : i32, i32
  }
  func.func @transform_4(%arg0: i32, %arg1: i32) -> (i32, i32) {
    %c0_i32 = arith.constant 0 : i32
    %c0_i32_0 = arith.constant 0 : i32
    %c0_i32_1 = arith.constant 0 : i32
    return %c0_i32, %c0_i32_0 : i32, i32
  }
  func.func @transform_5(%arg0: i32, %arg1: i32) -> (i32, i32) {
    %c0_i32 = arith.constant 0 : i32
    %c0_i32_0 = arith.constant 0 : i32
    %c0_i32_1 = arith.constant 0 : i32
    return %c0_i32, %c0_i32_0 : i32, i32
  }
  func.func @transform_6(%arg0: i32, %arg1: i32) -> (i32, i32) {
    %c0_i32 = arith.constant 0 : i32
    %c0_i32_0 = arith.constant 0 : i32
    %c0_i32_1 = arith.constant 0 : i32
    return %c0_i32, %c0_i32_0 : i32, i32
  }
  func.func @transform_7(%arg0: i32, %arg1: i32) -> (i32, i32, i32, i32) {
    %c0_i32 = arith.constant 0 : i32
    %c0_i32_0 = arith.constant 0 : i32
    %c0_i32_1 = arith.constant 0 : i32
    return %arg0, %arg1, %c0_i32, %c0_i32_0 : i32, i32, i32, i32
  }
}

</mosaic_0001>

<bundles_post_ra>
// kernel: tpu_custom_call.1
= control target key start
LH: loop header
LB: loop body
LE: loop exit
PB: predicated region body
PF: predicated region fallthrough
CT: control target
= control target key end

     0   :  { %s9378_s0 = inlined_call_operand.hbm [shape: bf16[2,592,128], index: 0, kind: input, shape index: {}]   ;;  %s9379_s1 = inlined_call_operand.hbm [shape: bf16[128,128], index: 1, kind: input, shape index: {}]   ;;  %s9380_s2 = inlined_call_operand.vmem [shape: f32[1,128], index: 2, kind: input, shape index: {}]   ;;  %s9381_s3 = inlined_call_operand.hbm [shape: bf16[1152,128], index: 3, kind: input, shape index: {}]   ;;  %s9382_s4 = inlined_call_operand.vmem [shape: f32[1,128], index: 4, kind: input, shape index: {}]   ;;  %s9383_s5 = inlined_call_operand.hbm [shape: bf16[128,128], index: 5, kind: input, shape index: {}]   ;;  %s9384_s6 = inlined_call_operand.vmem [shape: f32[1,128], index: 6, kind: input, shape index: {}]   ;;  %s9385_s7 = inlined_call_operand.hbm [shape: bf16[2,16,16,128], index: 7, kind: output, shape index: {}]  }
   0x1   :  { %9596 = sst [smem:[#allocation60_spill]] %s9379_s1 }
   0x2   :  { %9597 = sst [smem:[#allocation61_spill]] %s9381_s3 }
   0x3   :  { %9598 = sst [smem:[#allocation62_spill]] %s9382_s4 }
   0x4   :  { %9599 = sst [smem:[#allocation63_spill]] %s9384_s6 }
   0x5   :  { %9600 = sst [smem:[#allocation64_spill]] %s9385_s7 }
   0x6   :  { %12 = vsyncpa [#allocation3], 0 }
   0x7   :  { %14 = vsyncpa [#allocation3 + $0x1], 0 }
   0x8   :  { %15 = vsyncpa [#allocation6], 0 }
   0x9   :  { %16 = vsyncpa [#allocation9], 0 }
   0xa   :  { %17 = vsyncpa [#allocation4], 0 }
   0xb   :  { %19 = vsyncpa [#allocation4 + $0x1], 0  ;;  %s5673_s24 = smov 0   ;;  %s5675_s25 = smov 0  }
   0xc   :  { %s5677_s26 = smov 0   ;;  %s5679_s27 = smov 0  }
   0xd   :  { %s5681_s28 = smov 0   ;;  %s5683_s29 = smov 0  }
   0xe   :  { %s5685_s30 = smov 0   ;;  %s5687_s8 = smov 0  }
   0xf   :  { %s5689_s9 = smov 0   ;;  %s5691_s10 = smov 0  }
  0x10   :  { %s5693_s11 = smov 0  }
  0x11 LB: > { %9601 = sst [smem:[#allocation15_spill]] %s5580_s24  ;;  %s4019_s12 = sadd.s32 4294967295, %s5620_s11   ;;  %s5620_s11 = sphi %s5693_s11, %s25_s11   ;;  %s5616_s10 = sphi %s5691_s10, %s10521_s10   ;;  %s5612_s9 = sphi %s5689_s9, %s10520_s9   ;;  %s5608_s8 = sphi %s5687_s8, %s10519_s8   ;;  %s5604_s30 = sphi %s5685_s30, %s10518_s30   ;;  %s5600_s29 = sphi %s5683_s29, %s10517_s29   ;;  %s5596_s28 = sphi %s5681_s28, %s10516_s28   ;;  %s5592_s27 = sphi %s5679_s27, %s10515_s27   ;;  %s5588_s26 = sphi %s5677_s26, %s10514_s26   ;;  %s5584_s25 = sphi %s5675_s25, %s10513_s25   ;;  %s5580_s24 = sphi %s5673_s24, %s10512_s24  }
  0x12   : > { %9602 = sst [smem:[#allocation16_spill]] %s5584_s25  ;;  %s4020_s13 = sadd.s32 4294967294, %s5620_s11  }
  0x13   : > { %9603 = sst [smem:[#allocation17_spill]] %s5608_s8  ;;  %p57_p0 = scmp.ne.s32.totalorder %s5596_s28, %s5592_s27 }
  0x14   : > { %p5729_p1 = scmp.eq.s32.totalorder %s4019_s12, 0  ;;  %p208_p2 = scmp.ne.s32.totalorder %s5588_s26, %s5584_s25 }
  0x15   : > { %p209_p4 = scmp.eq.s32.totalorder %s4019_s12, 3  ;;  %p214_p5 = scmp.ne.s32.totalorder %s5584_s25, %s5580_s24 }
  0x16   : > { %s9604_s14 = scalar_select %p5729_p1, 1, 0 }
  0x17   : > { %p5738_p3 = por %p5729_p1, %p57_p0  ;;  %p215_p6 = scmp.eq.s32.totalorder %s4020_s13, 3 }
  0x18   : > { %p5744_p7 = por %p209_p4, %p208_p2  ;;  %p4021_p8 = scmp.ge.s32.totalorder %s5620_s11, 1 }
  0x19   : > { %s9605_s16 = scalar_select %p5738_p3, 1, 0 }
  0x1a   : > { %s9606_s17 = scalar_select %p5744_p7, 1, 0 }
  0x1b   : > { %p5749_p9 = por %p215_p6, %p214_p5  ;;  %p222_p10 = scmp.lt.s32.totalorder %s5620_s11, 5 }
  0x1c   : > { %9607 = sst [smem:[#allocation18_spill]] %s9606_s17  ;;  %s5622_s20 = smov [#allocation5]  }
  0x1d   : > { %s9608_s18 = scalar_select %p5749_p9, 1, 0 }
  0x1e   : > { %p5754_p11 = pnand %p4021_p8, %p222_p10  ;;  %s234_s21 = sshll.u32 %s5622_s20, 4  ;;  %s5758_s21 = int_to_ptr.vmem [resolvable:$true] %s234_s21 }
  0x1f   : > { %9609 = sst [smem:[#allocation19_spill]] %s9608_s18  ;;  %s5623_s23 = smov [#allocation7]  }
  0x20   : > { %s9610_s19 = scalar_select %p5754_p11, 1, 0 }
  0x21   : > { %p5103_p12 = pneg %p5754_p11  ;;  %s250_s27 = sshll.u32 %s5623_s23, 4  ;;  %s5768_s27 = int_to_ptr.vmem [resolvable:$true] %s250_s27 }
  0x22   : > { %s5624_s12 = smov [#allocation8]   ;;  %s9612_s1 = sld [smem:[#allocation60_spill]] }
  0x23   : > { %p5764_p13 = pnand %p5103_p12, %p5729_p1  ;;  %s5770_s13 = sshll.u32 %s5624_s12, 4  ;;  %s267_s13 = int_to_ptr.vmem [resolvable:$true] %s5770_s13 }
  0x25   : > { %p5780_p2 = pneg %p5764_p13 }
  0x28   : > { %s5376_s20 = scalar_lea.hbm %s9612_s1, 1024 }
  0x29   : > { %p5377_p0 = scmp.ne.s32.totalorder %s9612_s1, %s5376_s20  ;;  %p5383_p6 = scmp.lt.u32.totalorder %s5376_s20, %s9612_s1 }
  0x2b   : > { %p5379_p4 = pnand %p5780_p2, %p5377_p0 }
  0x2d   : > { %p5380_p5 = pneg %p5379_p4 }
  0x2f   : > { %p5385_p8 = pnand %p5383_p6, %p5380_p5 }
  0x31   : > { %5388 = shalt.err (!%p5385_p8)
}
  0x32   : > { %s5389_s7 = scalar_lea.vmem %s5758_s21, 1024  ;;  %p5397_p7 = scmp.lt.s32.totalorder %s5758_s21, %s5758_s21 }
  0x33   : > { %p5390_p10 = scmp.ne.s32.totalorder %s5758_s21, %s5389_s7  ;;  %p5398_p1 = scmp.lt.s32.totalorder %s5389_s7, %s5389_s7 }
  0x35   : > { %p5392_p12 = pnand %p5390_p10, %p5780_p2  ;;  %p5399_p0 = por %p5398_p1, %p5397_p7 }
  0x37   : > { %p5393_p9 = pneg %p5392_p12 }
  0x39   : > { %p5400_p4 = pnand %p5399_p0, %p5393_p9 }
  0x3b   : > { %5403 = shalt.err (!%p5400_p4)
}
  0x3c   : > { %s9398_s24 = smov 64   ;;  %s9399_s15 = smov 4  }
  0x3d   : > { %5106 = dma.hbm_to_vmem [thread:$0]  (!%p5764_p13), %s9612_s1, 1024, %s5758_s21, [#allocation6], %s9398_s24, %s9398_s24, %s9399_s15  }
  0x3e   : > { %s9614_s3 = sld [smem:[#allocation61_spill]] }
  0x44   : > { %s5404_s7 = scalar_lea.hbm %s9614_s3, 9216 }
  0x45   : > { %p5405_p1 = scmp.ne.s32.totalorder %s9614_s3, %s5404_s7  ;;  %p5411_p5 = scmp.lt.u32.totalorder %s5404_s7, %s9614_s3 }
  0x47   : > { %p5407_p7 = pnand %p5405_p1, %p5780_p2 }
  0x49   : > { %p5408_p9 = pneg %p5407_p7 }
  0x4b   : > { %p5413_p6 = pnand %p5411_p5, %p5408_p9 }
  0x4d   : > { %5416 = shalt.err (!%p5413_p6)
}
  0x4e   : > { %s5417_s21 = scalar_lea.vmem %s5768_s27, 9216  ;;  %p5425_p0 = scmp.lt.s32.totalorder %s5768_s27, %s5768_s27 }
  0x4f   : > { %p5418_p8 = scmp.ne.s32.totalorder %s5768_s27, %s5417_s21  ;;  %p5426_p4 = scmp.lt.s32.totalorder %s5417_s21, %s5417_s21 }
  0x51   : > { %p5420_p10 = pnand %p5418_p8, %p5780_p2  ;;  %p5427_p1 = por %p5426_p4, %p5425_p0 }
  0x53   : > { %p5421_p12 = pneg %p5420_p10 }
  0x55   : > { %p5428_p7 = pnand %p5427_p1, %p5421_p12 }
  0x57   : > { %5431 = shalt.err (!%p5428_p7)
}
  0x58   : > { %5109 = dma.hbm_to_vmem [thread:$0]  (!%p5764_p13), %s9614_s3, 9216, %s5768_s27, [#allocation6], %s9398_s24, %s9398_s24, %s9399_s15  }
  0x59   : > { %s5432_s18 = scalar_lea.hbm %s9383_s5, 1024 }
  0x5a   : > { %p5433_p9 = scmp.ne.s32.totalorder %s9383_s5, %s5432_s18  ;;  %p5439_p8 = scmp.lt.u32.totalorder %s5432_s18, %s9383_s5 }
  0x5c   : > { %p5435_p5 = pnand %p5433_p9, %p5780_p2 }
  0x5e   : > { %p5436_p6 = pneg %p5435_p5 }
  0x60   : > { %p5441_p10 = pnand %p5439_p8, %p5436_p6 }
  0x62   : > { %5444 = shalt.err (!%p5441_p10)
}
  0x63   : > { %s5445_s21 = scalar_lea.vmem %s267_s13, 1024  ;;  %p5453_p1 = scmp.lt.s32.totalorder %s267_s13, %s267_s13 }
  0x64   : > { %p5446_p12 = scmp.ne.s32.totalorder %s267_s13, %s5445_s21  ;;  %p5454_p7 = scmp.lt.s32.totalorder %s5445_s21, %s5445_s21 }
  0x66   : > { %p5448_p0 = pnand %p5446_p12, %p5780_p2  ;;  %p5455_p3 = por %p5454_p7, %p5453_p1 }
  0x68   : > { %p5449_p4 = pneg %p5448_p0 }
  0x6a   : > { %p5456_p11 = pnand %p5455_p3, %p5449_p4 }
  0x6c   : > { %5459 = shalt.err (!%p5456_p11)
}
  0x6d   : > { %5112 = dma.hbm_to_vmem [thread:$0]  (!%p5764_p13), %s9383_s5, 1024, %s267_s13, [#allocation9], %s9398_s24, %s9398_s24, %s9399_s15  }
  0x6e   : > { %s34_s17 = sadd.s32 1, %s5612_s9  ;;  %s37_s22 = sadd.s32 1, %s5616_s10 }
  0x6f   : > { %p35_p3 = scmp.ge.s32.totalorder %s34_s17, 2  ;;  %s44_s6 = sadd.s32 1, %s5600_s29 }
  0x70   : > { %p51_p11 = scmp.ne.s32.totalorder %s5600_s29, %s5596_s28  ;;  %p52_p2 = scmp.eq.s32.totalorder %s5620_s11, 0 }
  0x71   : > { %s10523_s17 = smov (%p35_p3, %s34_s17), 0  ;;  %s10525_s22 = smov (!%p35_p3, %s37_s22), %s5616_s10 }
  0x72   : > { %s194_s25 = ssub.s32 %s5612_s9, %s10523_s17  ;;  %p39_p9 = scmp.ge.s32.totalorder %s10525_s22, 2 }
  0x73   : > { %p5124_p5 = scmp.lt.s32.totalorder %s5620_s11, 4  ;;  %p5864_p13 = por %p52_p2, %p51_p11 }
  0x74   : > { %s283_s8 = sand.u32 1, %s5600_s29   ;;  %s10527_s22 = smov (%p39_p9, %s10525_s22), 0 }
  0x75   : > { %s5084_s18 = smul.u32 296, %s283_s8  ;;  %s41_s20 = ssub.s32 %s5616_s10, %s10527_s22 }
  0x76   : > { %s5085_s23 = smul.u32 4736, %s5616_s10  ;;  %p42_p6 = scmp.eq.s32.totalorder %s41_s20, 0 }
  0x77   : > { %s195_s12 = sor.u32 %s194_s25, %s41_s20  ;;  %s9616_s21 = sadd.s32 1, %s5588_s26 }
  0x78   : > { %p196_p8 = scmp.eq.s32.totalorder %s195_s12, 0  ;;  %s5885_s15 = scalar_lea.hbm %s9378_s0, %s5085_s23 }
  0x79   : > { %s5875_s7 = scalar_select %p42_p6, %s5600_s29, %s44_s6  }
  0x7a   : > { %s5880_s27 = scalar_select %p196_p8, %s5588_s26, %s9616_s21  }
  0x7b   : > { %s287_s1 = scalar_lea.vmem [#allocation2], %s5084_s18  ;;  %p5893_p10 = pnand %p5124_p5, %p5864_p13 }
  0x7c   : > { %s294_s3 = sshll.u32 %s287_s1, 4  ;;  %s5897_s25 = scalar_lea.sflag [#allocation3], %s283_s8  ;;  %s5887_s3 = int_to_ptr.vmem [resolvable:$true] %s294_s3 }
  0x7d   : > { %s5460_s24 = scalar_lea.hbm %s5885_s15, 4736  ;;  %p5462_p0 = pneg %p5893_p10 }
  0x7e   : > { %p5461_p12 = scmp.ne.s32.totalorder %s5885_s15, %s5460_s24  ;;  %s5465_s13 = scalar_lea.hbm %s9378_s0, 9472 }
  0x7f   : > { %p5466_p7 = scmp.lt.u32.totalorder %s5885_s15, %s9378_s0  ;;  %p5467_p3 = scmp.lt.u32.totalorder %s5465_s13, %s5460_s24 }
  0x80   : > { %p5463_p4 = pnand %p5462_p0, %p5461_p12  ;;  %p5469_p2 = scmp.lt.u32.totalorder %s5460_s24, %s5885_s15 }
  0x81   : > { %p5468_p11 = por %p5467_p3, %p5466_p7 }
  0x82   : > { %p5464_p1 = pneg %p5463_p4 }
  0x83   : > { %p5470_p9 = por %p5469_p2, %p5468_p11 }
  0x85   : > { %p5471_p5 = pnand %p5470_p9, %p5464_p1 }
  0x87   : > { %5474 = shalt.err (!%p5471_p5)
}
  0x88   : > { %s5475_s8 = scalar_lea.vmem %s5887_s3, 4736  ;;  %s5627_s12 = smov [#allocation2]  }
  0x89   : > { %p5476_p13 = scmp.ne.s32.totalorder %s5887_s3, %s5475_s8  ;;  %s5480_s21 = sshll.u32 %s5627_s12, 4  ;;  %s5481_s21 = int_to_ptr.vmem [resolvable:$false] %s5480_s21 }
  0x8a   : > { %s5482_s4 = scalar_lea.vmem %s5481_s21, 9472  ;;  %p5483_p12 = scmp.lt.s32.totalorder %s5887_s3, %s5481_s21 }
  0x8b   : > { %p5478_p6 = pnand %p5476_p13, %p5462_p0  ;;  %p5484_p4 = scmp.lt.s32.totalorder %s5482_s4, %s5475_s8 }
  0x8d   : > { %p5479_p8 = pneg %p5478_p6  ;;  %p5485_p7 = por %p5484_p4, %p5483_p12 }
  0x8f   : > { %p5486_p3 = pnand %p5485_p7, %p5479_p8 }
  0x91   : > { %5489 = shalt.err (!%p5486_p3)
}
  0x92   : > { %s9618_s24 = smov 4   ;;  %s9619_s1 = smov 64  }
  0x93   : > { %5116 = dma.hbm_to_vmem [thread:$0]  (!%p5893_p10), %s5885_s15, 4736, %s5887_s3, %s5897_s25, %s9619_s1, %s9619_s1, %s9618_s24  }
  0x94   : > { %p9620_p0 = scmp.ne.s32.totalorder %s9610_s19, 0 }
  0x96   : > { %306 = sbr.rel (%p9620_p0) target bundleno = 1356 (0x54c), region = 48 }
  0x9d   : > { %s308_s18 = sand.u32 1, %s5596_s28   ;;  %p9621_p1 = scmp.ne.s32.totalorder %s9605_s16, 0 }
  0x9e   : > { %s5086_s13 = smul.u32 296, %s308_s18  ;;  %s309_s20 = scalar_lea.sflag [#allocation3], %s308_s18 }
  0xa0   : > { %s312_s23 = scalar_lea.vmem [#allocation2], %s5086_s13 }
  0xa1   : > { %5563 = dma.done.wait (%p9621_p1), %s309_s20, 4736  }
  0xa2   : > { %5565 = vsyncadd (%p9621_p1), %s309_s20, 4294962560  ;;  %p9622_p11 = scmp.ne.s32.totalorder %s9604_s14, 0 }
  0xa4   : > { %5567 = dma.done.wait (%p9622_p11), [#allocation6], 10240  }
  0xa5   : > { %5569 = vsyncadd (%p9622_p11), [#allocation6], 4294957056 }
  0xa6   : > { %5571 = dma.done.wait (%p9622_p11), [#allocation9], 1024  }
  0xa7   : > { %5573 = vsyncadd (%p9622_p11), [#allocation9], 4294966272  ;;  %v5628_v0 = vmov 0.0   ;;  %vm5629_vm0 = vmmov 0   ;;  %s4032_s3 = sshll.u32 %s5604_s30, 8  ;;  %v5226_v1 = vld [vmem:[#allocation5] sm:$0xff]   ;;  %v802_v63 = vlaneseq }
  0xa8   : > { %4872 = vmatprep.subr.bf16.mxu0 %v5628_v0  ;;  %4888 = vmatprep.mubr.msk.bf16.mxu0 %vm5629_vm0, %v5628_v0  ;;  %s358_s16 = sshra.s32 %s4032_s3, 3  ;;  %v5227_v2 = vld [vmem:[#allocation5 + $0x8] sm:$0xff]   ;;  %v5228_v3 = vld [vmem:[#allocation5 + $0x10] sm:$0xff]   ;;  %v5229_v4 = vld [vmem:[#allocation5 + $0x18] sm:$0xff]   ;;  %s4064_s15 = sadd.s32 4294967295, %s4032_s3 }
  0xa9   : > { %4873 = vmatpush3.bf16.msra.mxu0 %v5226_v1  ;;  %s4033_s19 = sshll.u32 %s358_s16, 2  ;;  %v5230_v5 = vld [vmem:[#allocation5 + $0x20] sm:$0xff]   ;;  %v5231_v6 = vld [vmem:[#allocation5 + $0x28] sm:$0xff]   ;;  %v5232_v7 = vld [vmem:[#allocation5 + $0x30] sm:$0xff]   ;;  %v6019_v1 = vshrl.u32 %v802_v63, 7  ;;  %s10397_s24 = sld [smem:[#allocation62_spill]] }
  0xaa   : > { %4874 = vmatprep.subr.bf16.mxu0 %v5628_v0  ;;  %s5951_s14 = scalar_lea.vmem %s312_s23, %s4033_s19 [#allocation2]  ;;  %v5233_v8 = vld [vmem:[#allocation5 + $0x38] sm:$0xff]   ;;  %v5253_v12 = vld [vmem:[#allocation7 + $0x40] sm:$0xff]   ;;  %v5255_v14 = vld [vmem:[#allocation7 + $0x48] sm:$0xff]   ;;  %s10484_s13 = sld [smem:[#allocation63_spill]] }
  0xab   : > { %v5234_v9 = vld [vmem:[%s5951_s14] sm:$0xff]   ;;  %v5235_v10 = vld [vmem:[%s5951_s14 + $0x8] sm:$0xff]   ;;  %v366_v11 = vld [vmem:[%s5951_s14 + $0x10] sm:$0xff]   ;;  %4376 = vmatprep.subr.bf16.mxu1 %v5253_v12  ;;  %v9665_v12 = vmov 0  ;;  %s10488_s20 = sld [smem:[#allocation16_spill]]  ;;  %s10505_s19 = sld [smem:[#allocation17_spill]] }
  0xac   : > { %v5254_v13 = vld [vmem:[#allocation7] sm:$0xff]   ;;  %v368_v15 = vld [vmem:[%s5951_s14 + $0x18] sm:$0xff]   ;;  %v5257_v17 = vld [vmem:[#allocation7 + $0x50] sm:$0xff]   ;;  %s10507_s4 = sld [smem:[#allocation64_spill]] }
  0xad   : > { %4875 = vmatpush3.bf16.msra.mxu0 %v5227_v2  ;;  %v5256_v16 = vld [vmem:[#allocation7 + $0x8] sm:$0xff]   ;;  %4377 = vmatpush3.bf16.msra.mxu1 %v5254_v13  ;;  %v370_v18 = vld [vmem:[%s5951_s14 + $0x20] sm:$0xff]   ;;  %v372_v19 = vld [vmem:[%s5951_s14 + $0x28] sm:$0xff]   ;;  %v6023_v2 = vstv %s4064_s15 }
  0xae   : > { %4876 = vmatprep.subr.bf16.mxu0 %v5628_v0  ;;  %4378 = vmatprep.subr.bf16.mxu1 %v5255_v14  ;;  %v374_v20 = vld [vmem:[%s5951_s14 + $0x30] sm:$0xff]   ;;  %v376_v21 = vld [vmem:[%s5951_s14 + $0x38] sm:$0xff]   ;;  %v378_v22 = vld [vmem:[%s5951_s14 + $0x40] sm:$0xff]   ;;  %v807_v14 = vadd.s32 32, %v6019_v1 }
  0xaf   : > { %v380_v23 = vld [vmem:[%s5951_s14 + $0x48] sm:$0xff]   ;;  %v382_v24 = vld [vmem:[%s5951_s14 + $0x50] sm:$0xff]   ;;  %v384_v25 = vld [vmem:[%s5951_s14 + $0x58] sm:$0xff]  }
  0xb0   : > { %v5258_v26 = vld [vmem:[#allocation7 + $0x10] sm:$0xff]   ;;  %v5259_v27 = vld [vmem:[#allocation7 + $0x58] sm:$0xff]   ;;  %v5262_v29 = vld [vmem:[#allocation7 + $0x140] sm:$0xff]  }
  0xb1   : > { %4877 = vmatpush3.bf16.msra.mxu0 %v5228_v3  ;;  %4379 = vmatpush3.bf16.msra.mxu1 %v5256_v16  ;;  %v5260_v28 = vld [vmem:[#allocation7 + $0x18] sm:$0xff]   ;;  %v386_v30 = vld [vmem:[%s5951_s14 + $0x60] sm:$0xff]   ;;  %v5261_v31 = vld [vmem:[#allocation7 + $0x60] sm:$0xff]   ;;  %v804_v3 = vadd.s32 8, %v6019_v1  ;;  %v9667_v16 = vmov 0  ;;  %s352_s23 = sand.u32 1, %s10488_s20  }
  0xb2   : > { %4878 = vmatprep.subr.bf16.mxu0 %v5628_v0  ;;  %4380 = vmatprep.subr.bf16.mxu1 %v5257_v17  ;;  %v5264_v32 = vld [vmem:[#allocation7 + $0x100] sm:$0xff]   ;;  %v5266_v34 = vld [vmem:[#allocation7 + $0x148] sm:$0xff]   ;;  %v5270_v38 = vld [vmem:[#allocation7 + $0x150] sm:$0xff]   ;;  %s4031_s3 = sshll.u32 %s352_s23, 6  ;;  %s4318_s15 = sshll.u32 %s10505_s19, 5 }
  0xb3   : > { %v5263_v33 = vld [vmem:[#allocation7 + $0x20] sm:$0xff]   ;;  %v5265_v35 = vld [vmem:[#allocation7 + $0x68] sm:$0xff]   ;;  %v388_v39 = vld [vmem:[%s5951_s14 + $0x68] sm:$0xff]   ;;  %s9195_s16 = scalar_lea.vmem [#allocation10], %s4031_s3  ;;  %s9317_s1 = scalar_lea.sflag [#allocation4], %s352_s23 }
  0xb4   : > { %v5268_v36 = vld [vmem:[#allocation7 + $0x108] sm:$0xff]   ;;  %v5269_v40 = vld [vmem:[#allocation7 + $0x70] sm:$0xff]   ;;  %v5274_v43 = vld [vmem:[#allocation7 + $0x158] sm:$0xff]   ;;  %s3901_s8 = sshll.u32 %s9195_s16, 4  ;;  %s9309_s8 = int_to_ptr.vmem [resolvable:$true] %s3901_s8 }
  0xb5   : > { %4879 = vmatpush3.bf16.msra.mxu0 %v5229_v4  ;;  %4381 = vmatpush3.bf16.msra.mxu1 %v5258_v26  ;;  %v5267_v37 = vld [vmem:[#allocation7 + $0x28] sm:$0xff]   ;;  %v5272_v41 = vld [vmem:[#allocation7 + $0x110] sm:$0xff]   ;;  %v5273_v44 = vld [vmem:[#allocation7 + $0x78] sm:$0xff]   ;;  %v847_v4 = vadd.s32 %v6023_v2, %v6019_v1  ;;  %s5490_s18 = scalar_lea.vmem %s9309_s8, 1024 }
  0xb6   : > { %4880 = vmatprep.subr.bf16.mxu0 %v5628_v0  ;;  %4382 = vmatprep.subr.bf16.mxu1 %v5259_v27  ;;  %v5271_v42 = vld [vmem:[#allocation7 + $0x30] sm:$0xff]   ;;  %v5276_v45 = vld [vmem:[#allocation7 + $0x118] sm:$0xff]   ;;  %v5279_v47 = vld [vmem:[#allocation7 + $0x160] sm:$0xff]   ;;  %v9699_v27 = vmov 0  ;;  %p5491_p10 = scmp.ne.s32.totalorder %s9309_s8, %s5490_s18 }
  0xb7   : > { %v5275_v46 = vld [vmem:[#allocation7 + $0x38] sm:$0xff]   ;;  %v390_v48 = vld [vmem:[%s5951_s14 + $0x70] sm:$0xff]   ;;  %v5282_v51 = vld [vmem:[#allocation7 + $0x168] sm:$0xff]  }
  0xb8   : > { %v5281_v49 = vld [vmem:[#allocation7 + $0x120] sm:$0xff]   ;;  %v5283_v52 = vld [vmem:[#allocation7 + $0x128] sm:$0xff]   ;;  %v5285_v54 = vld [vmem:[#allocation7 + $0x170] sm:$0xff]  }
  0xb9   : > { %4881 = vmatpush3.bf16.msra.mxu0 %v5230_v5  ;;  %4383 = vmatpush3.bf16.msra.mxu1 %v5260_v28  ;;  %v5278_v50 = vld [vmem:[#allocation7 + $0xc0] sm:$0xff]   ;;  %v392_v53 = vld [vmem:[%s5951_s14 + $0x78] sm:$0xff]   ;;  %v5286_v55 = vld [vmem:[#allocation7 + $0x130] sm:$0xff]   ;;  %v848_v5 = vadd.s32 %v6023_v2, %v804_v3  ;;  %v9637_v28 = vmov 0 }
  0xba   : > { %4882 = vmatprep.subr.bf16.mxu0 %v5628_v0  ;;  %4384 = vmatprep.subr.bf16.mxu1 %v5261_v31  ;;  %v5287_v56 = vld [vmem:[#allocation7 + $0x178] sm:$0xff]   ;;  %v394_v58 = vld [vmem:[%s5951_s14 + $0x80] sm:$0xff]   ;;  %v5252_v60 = vld [vmem:[%s5951_s14 + $0x90] sm:$0xff]  }
  0xbb   : > { %v5288_v57 = vld [vmem:[#allocation7 + $0x138] sm:$0xff]   ;;  %v5277_v61 = vld [vmem:[%s5951_s14 + $0x98] sm:$0xff]   ;;  %v5284_v62 = vld [vmem:[%s5951_s14 + $0xa0] sm:$0xff]   ;;  %v932_v13 = vshra.s32 %v848_v5, 5 }
  0xbc   : > { %v396_v59 = vld [vmem:[%s5951_s14 + $0x88] sm:$0xff]  }
  0xbd   : > { %4883 = vmatpush3.bf16.msra.mxu0 %v5231_v6  ;;  %4385 = vmatpush3.bf16.msra.mxu1 %v5263_v33  ;;  %v805_v6 = vadd.s32 16, %v6019_v1  ;;  %vm1100_vm8 = vcmp.ge.s32.totalorder %v932_v13, 1  ;;  %vm6089_vm14 = vcmp.le.s32.totalorder %v932_v13, 16  ;;  %v9641_v33 = vmov 0 }
  0xbe   : > { %4884 = vmatprep.subr.bf16.mxu0 %v5628_v0  ;;  %4386 = vmatprep.subr.bf16.mxu1 %v5265_v35  ;;  %v9642_v33 = vsel %vm6089_vm14, 4294967295, %v9641_v33 }
  0xc1   : > { %4885 = vmatpush3.bf16.msra.mxu0 %v5232_v7  ;;  %4387 = vmatpush3.bf16.msra.mxu1 %v5267_v37  ;;  %v889_v7 = vand.u32 31, %v847_v4  ;;  %v809_v37 = vadd.s32 48, %v6019_v1 }
  0xc2   : > { %4886 = vmatprep.subr.bf16.mxu0 %v5628_v0  ;;  %4388 = vmatprep.subr.bf16.mxu1 %v5269_v40 }
  0xc3   : > { %vm6032_vm1 = vcmp.ge.s32.totalorder %v889_v7, 1  ;;  %vm6036_vm2 = vcmp.le.s32.totalorder %v889_v7, 16 }
  0xc4   : > { %vm1057_vm5 = vmand %vm6032_vm1, %vm6036_vm2 }
  0xc5   : > { %4887 = vmatpush3.bf16.msra.mxu0 %v5233_v8  ;;  %4389 = vmatpush3.bf16.msra.mxu1 %v5271_v42  ;;  %v849_v8 = vadd.s32 %v6023_v2, %v805_v6  ;;  %v811_v6 = vadd.s32 64, %v6019_v1 }
  0xc6   : > { %4600 = vmatprep.subr.bf16.mxu0 %v5262_v29  ;;  %4390 = vmatprep.subr.bf16.mxu1 %v5273_v44  ;;  %v810_v44 = vadd.s32 56, %v6019_v1 }
  0xc7   : > { %v891_v17 = vand.u32 31, %v849_v8 }
  0xc8   : > { %4889 = vmatmul.mubr.bf16.vlgmr.msra.gmra.mrb[0].mxu0 %v5234_v9  ;;  %v806_v9 = vadd.s32 24, %v6019_v1 }
  0xc9   : > { %4892 = vmatprep.mubr.msk.bf16.mxu0 %vm5629_vm0, %v5628_v0  ;;  %4601 = vmatpush3.bf16.msra.mxu0 %v5264_v32  ;;  %vm6067_vm9 = vcmp.ge.s32.totalorder %v891_v17, 1  ;;  %vm6071_vm10 = vcmp.le.s32.totalorder %v891_v17, 16  ;;  %v9639_v32 = vmov 0  ;;  %v9669_v17 = vmov 0 }
  0xca   : > { %4602 = vmatprep.subr.bf16.mxu0 %v5266_v34  ;;  %4391 = vmatpush3.bf16.msra.mxu1 %v5275_v46  ;;  %vm1059_vm15 = vmand %vm6067_vm9, %vm6071_vm10  ;;  %v9647_v46 = vmov 0 }
  0xcb   : > { %4488 = vmatprep.subr.bf16.mxu1 %v5278_v50 }
  0xcd   : > { %4603 = vmatpush3.bf16.msra.mxu0 %v5268_v36 }
  0xce   : > { %4604 = vmatprep.subr.bf16.mxu0 %v5270_v38 }
  0xd0   : > { %4893 = vmatmul.mubr.bf16.gmra.mrb[4].mxu0 %v5235_v10  ;;  %v931_v10 = vshra.s32 %v847_v4, 5  ;;  %v9661_v4 = vmov 0 }
  0xd1   : > { %4896 = vmatprep.mubr.msk.bf16.mxu0 %vm5629_vm0, %v5628_v0  ;;  %4605 = vmatpush3.bf16.msra.mxu0 %v5272_v41  ;;  %v9685_v41 = vmov 0 }
  0xd2   : > { %4606 = vmatprep.subr.bf16.mxu0 %v5274_v43  ;;  %vm1099_vm6 = vcmp.ge.s32.totalorder %v931_v10, 1  ;;  %vm6079_vm12 = vcmp.le.s32.totalorder %v931_v10, 16 }
  0xd3   : > { %vm6075_vm11 = vmand %vm1057_vm5, %vm1099_vm6  ;;  %v9638_v28 = vsel %vm6079_vm12, 4294967295, %v9637_v28 }
  0xd4   : > { %vm9400_vm1 = vmand %vm6075_vm11, %vm6079_vm12 }
  0xd5   : > { %4607 = vmatpush3.bf16.msra.mxu0 %v5276_v45 }
  0xd6   : > { %4608 = vmatprep.subr.bf16.mxu0 %v5279_v47  ;;  %v9649_v47 = vmov 0 }
  0xd8   : > { %4897 = vmatmul.mubr.bf16.gmra.mrb[8].mxu0 %v366_v11  ;;  %v812_v11 = vadd.s32 72, %v6019_v1 }
  0xd9   : > { %4900 = vmatprep.mubr.msk.bf16.mxu0 %vm5629_vm0, %v5628_v0  ;;  %4609 = vmatpush3.bf16.msra.mxu0 %v5281_v49  ;;  %v6129_v49 = vld [vmem:[#allocation7 + $0x200] sm:$0xff]  }
  0xda   : > { %4610 = vmatprep.subr.bf16.mxu0 %v5282_v51 }
  0xdd   : > { %4611 = vmatpush3.bf16.msra.mxu0 %v5283_v52 }
  0xde   : > { %4612 = vmatprep.subr.bf16.mxu0 %v5285_v54 }
  0xe0   : > { %4901 = vmatmul.mubr.bf16.gmra.mrb[12].mxu0 %v368_v15 }
  0xe1   : > { %4904 = vmatprep.mubr.msk.bf16.mxu0 %vm5629_vm0, %v5628_v0  ;;  %4613 = vmatpush3.bf16.msra.mxu0 %v5286_v55 }
  0xe2   : > { %4614 = vmatprep.subr.bf16.mxu0 %v5287_v56 }
  0xe5   : > { %4615 = vmatpush3.bf16.msra.mxu0 %v5288_v57 }
  0xe6   : > { %4972 = vmatprep.subr.bf16.mxu0 %v6129_v49 }
  0xe8   : > { %4905 = vmatmul.mubr.bf16.gmra.mrb[16].mxu0 %v370_v18  ;;  %v850_v18 = vadd.s32 %v6023_v2, %v806_v9 }
  0xe9   : > { %4908 = vmatprep.mubr.msk.bf16.mxu0 %vm5629_vm0, %v5628_v0 }
  0xea   : > { %v934_v34 = vshra.s32 %v850_v18, 5 }
  0xf0   : > { %4909 = vmatmul.mubr.bf16.gmra.mrb[20].mxu0 %v372_v19  ;;  %v808_v19 = vadd.s32 40, %v6019_v1 }
  0xf1   : > { %4912 = vmatprep.mubr.msk.bf16.mxu0 %vm5629_vm0, %v5628_v0 }
  0xf2   : > { %v852_v29 = vadd.s32 %v6023_v2, %v808_v19  ;;  %v6218_v19 = vadd.s32 %v6023_v2, %v811_v6 }
  0xf4   : > { %v894_v43 = vand.u32 31, %v852_v29  ;;  %v936_v57 = vshra.s32 %v852_v29, 5  ;;  %v897_v42 = vand.u32 31, %v6218_v19 }
  0xf8   : > { %4913 = vmatmul.mubr.bf16.gmra.mrb[24].mxu0 %v374_v20  ;;  %v6058_v20 = vld [vmem:[%s9380_s2] ss:$0 sm:$0xff] }
  0xf9   : > { %4916 = vmatprep.mubr.msk.bf16.mxu0 %vm5629_vm0, %v5628_v0 }
 0x100   : > { %4917 = vmatmul.mubr.bf16.gmra.mrb[28].mxu0 %v376_v21  ;;  %v933_v21 = vshra.s32 %v849_v8, 5 }
 0x101   : > { %4920 = vmatprep.mubr.msk.bf16.mxu0 %vm5629_vm0, %v5628_v0 }
 0x102   : > { %vm6121_vm6 = vcmp.le.s32.totalorder %v933_v21, 16 }
 0x103   : > { %v9650_v47 = vsel %vm6121_vm6, 4294967295, %v9649_v47 }
 0x108   : > { %4921 = vmatmul.mubr.bf16.gmra.mrb[32].mxu0 %v378_v22  ;;  %v6065_v22 = vadd.s32 %v6023_v2, %v807_v14 }
 0x109   : > { %4924 = vmatprep.mubr.msk.bf16.mxu0 %vm5629_vm0, %v5628_v0 }
 0x10a   : > { %v893_v36 = vand.u32 31, %v6065_v22  ;;  %v935_v50 = vshra.s32 %v6065_v22, 5 }
 0x10c   : > { %vm6136_vm9 = vcmp.ge.s32.totalorder %v893_v36, 1  ;;  %vm6140_vm10 = vcmp.le.s32.totalorder %v893_v36, 16 }
 0x110   : > { %4925 = vmatmul.mubr.bf16.gmra.mrb[36].mxu0 %v380_v23 }
 0x111   : > { %4928 = vmatprep.mubr.msk.bf16.mxu0 %vm5629_vm0, %v5628_v0 }
 0x118   : > { %4929 = vmatmul.mubr.bf16.gmra.mrb[40].mxu0 %v382_v24 }
 0x119   : > { %4932 = vmatprep.mubr.msk.bf16.mxu0 %vm5629_vm0, %v5628_v0 }
 0x120   : > { %4933 = vmatmul.mubr.bf16.gmra.mrb[44].mxu0 %v384_v25  ;;  %v892_v25 = vand.u32 31, %v850_v18 }
 0x121   : > { %4936 = vmatprep.mubr.msk.bf16.mxu0 %vm5629_vm0, %v5628_v0 }
 0x122   : > { %vm6104_vm2 = vcmp.ge.s32.totalorder %v892_v25, 1 }
 0x128   : > { %4937 = vmatmul.mubr.bf16.gmra.mrb[48].mxu0 %v386_v30 }
 0x129   : > { %4940 = vmatprep.mubr.msk.bf16.mxu0 %vm5629_vm0, %v5628_v0 }
 0x130   : > { %4941 = vmatmul.mubr.bf16.gmra.mrb[52].mxu0 %v388_v39 }
 0x131   : > { %4944 = vmatprep.mubr.msk.bf16.mxu0 %vm5629_vm0, %v5628_v0 }
 0x138   : > { %4945 = vmatmul.mubr.bf16.gmra.mrb[56].mxu0 %v390_v48 }
 0x139   : > { %4948 = vmatprep.mubr.msk.bf16.mxu0 %vm5629_vm0, %v5628_v0 }
 0x140   : > { %4949 = vmatmul.mubr.bf16.gmra.mrb[60].mxu0 %v392_v53  ;;  %v853_v53 = vadd.s32 %v6023_v2, %v809_v37 }
 0x141   : > { %4952 = vmatprep.mubr.msk.bf16.mxu0 %vm5629_vm0, %v5628_v0 }
 0x142   : > { %v937_v18 = vshra.s32 %v853_v53, 5 }
 0x148   : > { %4953 = vmatmul.mubr.bf16.gmra.mrb[64].mxu0 %v394_v58 }
 0x149   : > { %4956 = vmatprep.mubr.msk.bf16.mxu0 %vm5629_vm0, %v5628_v0 }
 0x150   : > { %4957 = vmatmul.mubr.bf16.gmra.mrb[68].mxu0 %v396_v59 }
 0x151   : > { %4960 = vmatprep.mubr.msk.bf16.mxu0 %vm5629_vm0, %v5628_v0 }
 0x158   : > { %4961 = vmatmul.mubr.bf16.gmra.mrb[72].mxu0 %v5252_v60 }
 0x159   : > { %4964 = vmatprep.mubr.msk.bf16.mxu0 %vm5629_vm0, %v5628_v0 }
 0x160   : > { %4965 = vmatmul.mubr.bf16.gmra.mrb[76].mxu0 %v5277_v61 }
 0x161   : > { %4968 = vmatprep.mubr.msk.bf16.mxu0 %vm5629_vm0, %v5628_v0  ;;  %v890_v0 = vand.u32 31, %v848_v5  ;;  %vm1101_vm0 = vcmp.ge.s32.totalorder %v933_v21, 1  ;;  %v9663_v5 = vmov 0  ;;  %v9671_v21 = vmov 0 }
 0x162   : > { %vm6117_vm5 = vmand %vm1059_vm15, %vm1101_vm0  ;;  %vm6164_vm0 = vcmp.ge.s32.totalorder %v894_v43, 1  ;;  %vm6185_vm15 = vcmp.le.s32.totalorder %v934_v34, 16 }
 0x163   : > { %vm6041_vm3 = vcmp.ge.s32.totalorder %v890_v0, 1  ;;  %vm6045_vm4 = vcmp.le.s32.totalorder %v890_v0, 16  ;;  %v9648_v46 = vsel %vm6117_vm5, 4294967295, %v9647_v46  ;;  %v9664_v5 = vsel %vm6185_vm15, 4294967295, %v9663_v5 }
 0x164   : > { %vm1058_vm7 = vmand %vm6041_vm3, %vm6045_vm4  ;;  %vm6108_vm3 = vcmp.le.s32.totalorder %v892_v25, 16  ;;  %v895_v0 = vand.u32 31, %v853_v53 }
 0x165   : > { %vm6085_vm13 = vmand %vm1058_vm7, %vm1100_vm8  ;;  %vm6125_vm7 = vcmp.ge.s32.totalorder %v934_v34, 1 }
 0x166   : > { %v9640_v32 = vsel %vm6085_vm13, 4294967295, %v9639_v32  ;;  %vm9401_vm4 = vmand %vm6085_vm13, %vm6089_vm14  ;;  %vm1103_vm13 = vcmp.ge.s32.totalorder %v935_v50, 1  ;;  %vm6224_vm12 = vcmp.ge.s32.totalorder %v895_v0, 1 }
 0x167   : > { %vm1060_vm8 = vmand %vm6104_vm2, %vm6108_vm3  ;;  %vm1104_vm3 = vcmp.ge.s32.totalorder %v936_v57, 1 }
 0x168   : > { %4969 = vmatmul.mubr.bf16.gmra.mrb[80].mxu0 %v5284_v62  ;;  %v854_v62 = vadd.s32 %v6023_v2, %v810_v44  ;;  %vm1061_vm14 = vmand %vm6136_vm9, %vm6140_vm10 }
 0x169   : > { %vm6209_vm9 = vmand %vm1061_vm14, %vm1103_vm13  ;;  %vm6228_vm13 = vcmp.le.s32.totalorder %v895_v0, 16  ;;  %v9707_v0 = vmov 0 }
 0x16a   : > { %v896_v14 = vand.u32 31, %v854_v62  ;;  %v9668_v16 = vsel %vm6209_vm9, 4294967295, %v9667_v16  ;;  %v938_v24 = vshra.s32 %v854_v62, 5  ;;  %vm9677_vm14 = vmand %vm6117_vm5, %vm6121_vm6  ;;  %v814_v62 = vadd.s32 88, %v6019_v1 }
 0x16c   : > { %vm6257_vm10 = vcmp.le.s32.totalorder %v896_v14, 16  ;;  %vm6291_vm6 = vcmp.le.s32.totalorder %v938_v24, 16  ;;  %v6379_v22 = vadd.s32 %v6023_v2, %v814_v62 }
 0x19b   : > { %v635_v26 = vpop.f32.mrb[0].mxu0 }
 0x19c   : > { %v636_v30 = vadd.f32 %v6058_v20, %v635_v26  ;;  %v4890_v31 = vpop.f32.mrb[1].mxu0 }
 0x19d   : > { %v638_v35 = vpop.f32.mrb[2].mxu0 }
 0x19e   : > { %v1267_v38 = vmax.f32 %v636_v30, 0.0  ;;  %v639_v39 = vadd.f32 %v6058_v20, %v638_v35  ;;  %v4891_v40 = vpop.f32.mrb[3].mxu0  ;;  %v6245_v30 = vadd.s32 %v6023_v2, %v812_v11 }
 0x19f   : > { %v5291_v40 = vld [vmem:[#allocation7 + $0xd0] sm:$0xff]  }
 0x1a0   : > { %v1268_v45 = vmax.f32 %v639_v39, 0.0  ;;  %v1393_v54 = vsel %vm9400_vm1, %v1267_v38, 0.0  ;;  %vm6168_vm1 = vcmp.le.s32.totalorder %v894_v43, 16 }
 0x1a1   : > { %vm1062_vm2 = vmand %vm6164_vm0, %vm6168_vm1  ;;  %vm6213_vm1 = vcmp.le.s32.totalorder %v936_v57, 16 }
 0x1a2   : > { %v1394_v55 = vsel %vm9401_vm4, %v1268_v45, 0.0  ;;  %v6155_v56 = vpack.c.bf16 %v1268_v45, %v1267_v38  ;;  %vm6181_vm4 = vmand %vm1060_vm8, %vm6125_vm7  ;;  %vm6204_vm8 = vcmp.le.s32.totalorder %v935_v50, 16  ;;  %v9670_v17 = vsel %vm6213_vm1, 4294967295, %v9669_v17 }
 0x1a3   : > { %v6158_v58 = vpack.c.bf16 %v1394_v55, %v1393_v54  ;;  %v643_v59 = vpop.f32.mrb[4].mxu0  ;;  %v9662_v4 = vsel %vm6181_vm4, 4294967295, %v9661_v4  ;;  %v9666_v12 = vsel %vm6204_vm8, 4294967295, %v9665_v12  ;;  %vm6220_vm0 = vmand %vm1062_vm2, %vm1104_vm3  ;;  %vm6266_vm7 = vcmp.ge.s32.totalorder %v937_v18, 1 }
 0x1a4   : > { %v644_v63 = vadd.f32 %v6058_v20, %v643_v59  ;;  %v4894_v3 = vpop.f32.mrb[5].mxu0  ;;  %v9672_v21 = vsel %vm6220_vm0, 4294967295, %v9671_v21  ;;  %vm9678_vm2 = vmand %vm6181_vm4, %vm6185_vm15  ;;  %vm6270_vm3 = vcmp.le.s32.totalorder %v937_v18, 16  ;;  %vm6281_vm15 = vcmp.ge.s32.totalorder %v938_v24, 1 }
 0x1a5   : > { %v646_v7 = vpop.f32.mrb[6].mxu0  ;;  %v1460_v13 = vshll.u32 %v6158_v58, 16  ;;  %v9686_v41 = vsel %vm6270_vm3, 4294967295, %v9685_v41  ;;  %v1458_v44 = vshrl.u32 %v6158_v58, 16  ;;  %v813_v50 = vadd.s32 80, %v6019_v1 }
 0x1a6   : > { %v1269_v8 = vmax.f32 %v644_v63, 0.0  ;;  %v647_v9 = vadd.f32 %v6058_v20, %v646_v7  ;;  %v4895_v10 = vpop.f32.mrb[7].mxu0  ;;  %v9689_v54 = vmov 0  ;;  %v898_v55 = vand.u32 31, %v6245_v30 }
 0x1a7   : > { %v1462_v35 = vrot.slane %v1460_v13, 1  ;;  %v9690_v54 = vsel %vm6291_vm6, 4294967295, %v9689_v54  ;;  %vm9693_vm3 = vnez %v9640_v32  ;;  %vm9694_vm1 = vnez %v9642_v33  ;;  %vm9698_vm6 = vmand %vm6224_vm12, %vm6228_vm13 }
 0x1a8   : > { %v1270_v15 = vmax.f32 %v647_v9, 0.0  ;;  %v1395_v25 = vsel %vm9677_vm14, %v1269_v8, 0.0  ;;  %vm6253_vm14 = vcmp.ge.s32.totalorder %v896_v14, 1  ;;  %vm9695_vm4 = vmand %vm9693_vm3, %vm9694_vm1  ;;  %v939_v32 = vshra.s32 %v6218_v19, 5  ;;  %v5289_v9 = vld [vmem:[#allocation7 + $0xc8] sm:$0xff]   ;;  %v5294_v19 = vld [vmem:[#allocation7 + $0x98] sm:$0xff]  }
 0x1a9   : > { %v1463_v59 = vor.u32 %v1462_v35, %v1458_v44  ;;  %v1623_v6 = vrot.slane %v6158_v58, 1  ;;  %vm9705_vm1 = vsmask.f32 7424  ;;  %vm9706_vm12 = vmand %vm6253_vm14, %vm6257_vm10  ;;  %v6347_v10 = vadd.s32 %v6023_v2, %v813_v50  ;;  %v5298_v14 = vld [vmem:[#allocation7 + $0xa8] sm:$0xff]  }
 0x1aa   : > { %v1396_v26 = vsel %vm9678_vm2, %v1270_v15, 0.0  ;;  %v6242_v29 = vpack.c.bf16 %v1270_v15, %v1269_v8  ;;  %vm9691_vm2 = vnez %v9638_v28  ;;  %v5280_v28 = vld [vmem:[#allocation7 + $0x80] sm:$0xff]   ;;  %v940_v8 = vshra.s32 %v6245_v30, 5  ;;  %v5290_v30 = vld [vmem:[#allocation7 + $0x88] sm:$0xff]  }
 0x1ab   : > { %v6247_v31 = vpack.c.bf16 %v1396_v26, %v1395_v25  ;;  %v651_v34 = vpop.f32.mrb[8].mxu0  ;;  %vm9692_vm5 = vmand %vm6075_vm11, %vm9691_vm2  ;;  %vm9710_vm13 = vnez %v9672_v21  ;;  %vm9711_vm10 = vnez %v9670_v17  ;;  %vm6361_vm3 = vcmp.ge.s32.totalorder %v898_v55, 1 }
 0x1ac   : > { %v652_v38 = vadd.f32 %v6058_v20, %v651_v34  ;;  %v4898_v39 = vpop.f32.mrb[9].mxu0  ;;  %vm6307_vm0 = vmpackc.low %vm9695_vm4, %vm9692_vm5  ;;  %vm6324_vm4 = vcmp.ge.s32.totalorder %v897_v42, 1  ;;  %vm6328_vm5 = vcmp.le.s32.totalorder %v897_v42, 16  ;;  %vm9715_vm14 = vnez %v9686_v41 }
 0x1ad   : > { %v654_v43 = vpop.f32.mrb[10].mxu0  ;;  %v1465_v45 = vshll.u32 %v6247_v31, 16  ;;  %v1624_v57 = vrot.slane %v6247_v31, 1  ;;  %vm6319_vm11 = vmand %vm9698_vm6, %vm6266_vm7  ;;  %vm6393_vm2 = vcmp.le.s32.totalorder %v939_v32, 16  ;;  %v9722_v26 = vmov 0 }
 0x1ae   : > { %v1271_v51 = vmax.f32 %v652_v38, 0.0  ;;  %v655_v52 = vadd.f32 %v6058_v20, %v654_v43  ;;  %v4899_v53 = vpop.f32.mrb[11].mxu0  ;;  %v9700_v27 = vsel %vm6319_vm11, 4294967295, %v9699_v27  ;;  %vm6341_vm6 = vmand %vm9706_vm12, %vm6281_vm15  ;;  %vm9718_vm12 = vcmask 1046528  }
 0x1af   : > { %v1467_v60 = vrot.slane %v1465_v45, 1  ;;  %v9708_v0 = vsel %vm6341_vm6, 4294967295, %v9707_v0  ;;  %vm9709_vm7 = vmand %vm6209_vm9, %vm6204_vm8  ;;  %v6382_v23 = vsel %vm9718_vm12, %v1623_v6, %v1624_v57  ;;  %v9723_v26 = vsel %vm6393_vm2, 4294967295, %v9722_v26 }
 0x1b0   : > { %v1272_v63 = vmax.f32 %v655_v52, 0.0  ;;  %v1397_v58 = vsel %vm9709_vm7, %v1271_v51, 0.0  ;;  %vm9712_vm15 = vmand %vm9710_vm13, %vm9711_vm10  ;;  %v815_v34 = vadd.s32 96, %v6019_v1  ;;  %v1469_v36 = vshrl.u32 %v6247_v31, 16 }
 0x1b1   : > { %v1468_v7 = vsel %vm9705_vm1, %v1463_v59, %v1467_v60  ;;  %vm6374_vm1 = vcmp.le.s32.totalorder %v898_v55, 16  ;;  %v899_v39 = vand.u32 31, %v6347_v10  ;;  %vm6411_vm10 = vcmp.ge.s32.totalorder %v940_v8, 1 }
 0x1b2   : > { %v1398_v11 = vsel %vm9712_vm15, %v1272_v63, 0.0  ;;  %v6359_v13 = vpack.c.bf16 %v1272_v63, %v1271_v51  ;;  %2339 = vmatprep.mubr.bf16.mxu1 %v1468_v7  ;;  %v816_v45 = vadd.s32 104, %v6019_v1  ;;  %v1471_v48 = vor.u32 %v1469_v36, %v1467_v60 }
 0x1b3   : > { %v6365_v15 = vpack.c.bf16 %v1398_v11, %v1397_v58  ;;  %v659_v18 = vpop.f32.mrb[12].mxu0  ;;  %4140 = vmatmul.mubr.msk.bf16.vlgmr.msra.gmra.mrb[0].mxu1 %vm6307_vm0, %v6155_v56  ;;  %vm6389_vm0 = vcmp.ge.s32.totalorder %v939_v32, 1  ;;  %vm9726_vm12 = vnez %v9648_v46  ;;  %vm9727_vm13 = vnez %v9650_v47 }
 0x1b4   : > { %v660_v24 = vadd.f32 %v6058_v20, %v659_v18  ;;  %4489 = vmatpush3.bf16.msra.mxu1 %v5280_v28  ;;  %v4902_v25 = vpop.f32.mrb[13].mxu0  ;;  %vm9728_vm8 = vmand %vm9726_vm12, %vm9727_vm13  ;;  %vm9729_vm9 = vnez %v9662_v4  ;;  %vm9730_vm2 = vnez %v9664_v5  ;;  %v900_v52 = vand.u32 31, %v6379_v22  ;;  %v5293_v28 = vld [vmem:[#allocation7 + $0xd8] sm:$0xff]  }
 0x1b5   : > { %v662_v35 = vpop.f32.mrb[14].mxu0  ;;  %v1473_v37 = vshll.u32 %v6365_v15, 16  ;;  %v1626_v38 = vrot.slane %v6365_v15, 1  ;;  %4490 = vmatprep.subr.bf16.mxu1 %v5289_v9  ;;  %vm9731_vm7 = vmand %vm9729_vm9, %vm9730_vm2  ;;  %vm9734_vm15 = vcmask 1046528   ;;  %v9736_v47 = vmov 0 }
 0x1b6   : > { %v1273_v42 = vmax.f32 %v660_v24, 0.0  ;;  %v663_v43 = vadd.f32 %v6058_v20, %v662_v35  ;;  %v4903_v44 = vpop.f32.mrb[15].mxu0  ;;  %vm6426_vm6 = vmpackc.low %vm9731_vm7, %vm9728_vm8  ;;  %vm6447_vm8 = vcmp.le.s32.totalorder %v940_v8, 16  ;;  %v9738_v4 = vmov 0 }
 0x1b7   : > { %v1475_v50 = vrot.slane %v1473_v37, 1  ;;  %v6434_v53 = vsel %vm9734_vm15, %v1624_v57, %v1626_v38  ;;  %vm9735_vm13 = vmand %vm6324_vm4, %vm6328_vm5  ;;  %v9739_v4 = vsel %vm6447_vm8, 4294967295, %v9738_v4  ;;  %v941_v5 = vshra.s32 %v6347_v10, 5  ;;  %v5292_v57 = vld [vmem:[#allocation7 + $0x90] sm:$0xff]  }
 0x1b8   : > { %v1274_v46 = vmax.f32 %v663_v43, 0.0  ;;  %vm6443_vm9 = vmand %vm9735_vm13, %vm6389_vm0  ;;  %4491 = vmatpush3.bf16.msra.mxu1 %v5290_v30  ;;  %v6453_v55 = vadd.s32 %v6023_v2, %v815_v34  ;;  %vm9740_vm2 = vsmask.f32 7424  ;;  %v9742_v60 = vmov 0  ;;  %v5295_v34 = vld [vmem:[#allocation7 + $0xe0] sm:$0xff]  }
 0x1b9   : > { %v9737_v47 = vsel %vm6443_vm9, 4294967295, %v9736_v47  ;;  %v1476_v59 = vsel %vm9740_vm2, %v1471_v48, %v1475_v50  ;;  %vm9741_vm4 = vmand %vm6361_vm3, %vm6374_vm1  ;;  %vm6467_vm7 = vcmp.ge.s32.totalorder %v899_v39, 1  ;;  %vm6471_vm15 = vcmp.le.s32.totalorder %v899_v39, 16  ;;  %4492 = vmatprep.subr.bf16.mxu1 %v5291_v40  ;;  %v5304_v48 = vld [vmem:[#allocation7 + $0x208] sm:$0xff]  }
 0x1ba   : > { %vm6463_vm5 = vmand %vm9741_vm4, %vm6411_vm10  ;;  %v942_v63 = vshra.s32 %v6379_v22, 5  ;;  %vm9749_vm3 = vnez %v9708_v0  ;;  %vm9750_vm1 = vnez %v9690_v54  ;;  %v6486_v3 = vpack.c.bf16 %v1274_v46, %v1273_v42  ;;  %2347 = vmatprep.mubr.bf16.mxu1 %v1476_v59 }
 0x1bb   : > { %v9743_v60 = vsel %vm6463_vm5, 4294967295, %v9742_v60  ;;  %vm9748_vm10 = vmand %vm6319_vm11, %vm9715_vm14  ;;  %v6489_v6 = vadd.s32 %v6023_v2, %v816_v45  ;;  %v667_v8 = vpop.f32.mrb[16].mxu0  ;;  %vm9752_vm12 = vnez %v9723_v26  ;;  %4143 = vmatmul.mubr.msk.bf16.gmra.mrb[4].mxu1 %vm6426_vm6, %v6242_v29  ;;  %vm6500_vm2 = vcmp.ge.s32.totalorder %v900_v52, 1  ;;  %v5296_v45 = vld [vmem:[#allocation7 + $0xa0] sm:$0xff]  }
 0x1bc   : > { %v1399_v32 = vsel %vm9748_vm10, %v1273_v42, 0.0  ;;  %vm9751_vm0 = vmand %vm9749_vm3, %vm9750_vm1  ;;  %vm6504_vm4 = vcmp.le.s32.totalorder %v900_v52, 16  ;;  %v668_v58 = vadd.f32 %v6058_v20, %v667_v8  ;;  %v4906_v11 = vpop.f32.mrb[17].mxu0  ;;  %v901_v29 = vand.u32 31, %v6453_v55  ;;  %4493 = vmatpush3.bf16.msra.mxu1 %v5292_v57  ;;  %v5301_v52 = vld [vmem:[#allocation7 + $0xf8] sm:$0xff]  }
 0x1bd   : > { %v1400_v33 = vsel %vm9751_vm0, %v1274_v46, 0.0  ;;  %vm6513_vm0 = vcmp.ge.s32.totalorder %v941_v5, 1  ;;  %v817_v18 = vadd.s32 112, %v6019_v1  ;;  %v670_v22 = vpop.f32.mrb[18].mxu0  ;;  %v1477_v25 = vshrl.u32 %v6365_v15, 16  ;;  %4494 = vmatprep.subr.bf16.mxu1 %v5293_v28 }
 0x1be   : > { %v6491_v7 = vpack.c.bf16 %v1400_v33, %v1399_v32  ;;  %v943_v30 = vshra.s32 %v6453_v55, 5  ;;  %v1275_v35 = vmax.f32 %v668_v58, 0.0  ;;  %v671_v36 = vadd.f32 %v6058_v20, %v670_v22  ;;  %v4907_v37 = vpop.f32.mrb[19].mxu0  ;;  %v5297_v55 = vld [vmem:[#allocation7 + $0xe8] sm:$0xff]   ;;  %v5299_v22 = vld [vmem:[#allocation7 + $0xf0] sm:$0xff]  }
 0x1bf   : > { %vm6532_vm13 = vcmp.ge.s32.totalorder %v942_v63, 1  ;;  %v902_v40 = vand.u32 31, %v6489_v6  ;;  %vm9761_vm6 = vcmask 1046528   ;;  %v1479_v43 = vor.u32 %v1477_v25, %v1475_v50  ;;  %v5305_v25 = vld [vmem:[#allocation7 + $0x210] sm:$0xff]  }
 0x1c0   : > { %v1628_v24 = vrot.slane %v6491_v7, 1  ;;  %v1481_v56 = vshll.u32 %v6491_v7, 16  ;;  %vm9762_vm1 = vnez %v9668_v16  ;;  %vm9763_vm3 = vnez %v9666_v12  ;;  %4495 = vmatpush3.bf16.msra.mxu1 %v5294_v19 }
 0x1c1   : > { %vm9764_vm10 = vmand %vm9762_vm1, %vm9763_vm3  ;;  %vm9765_vm14 = vnez %v9672_v21  ;;  %vm9766_vm11 = vnez %v9670_v17  ;;  %v9768_v31 = vmov 0  ;;  %v818_v15 = vadd.s32 120, %v6019_v1  ;;  %4496 = vmatprep.subr.bf16.mxu1 %v5295_v34 }
 0x1c2   : > { %v6542_v42 = vsel %vm9761_vm6, %v1626_v38, %v1628_v24  ;;  %v1483_v44 = vrot.slane %v1481_v56, 1  ;;  %vm9767_vm8 = vmand %vm9765_vm14, %vm9766_vm11  ;;  %v1276_v38 = vmax.f32 %v671_v36, 0.0  ;;  %v9771_v12 = vmov 0 }
 0x1c3   : > { %vm6554_vm5 = vmpackc.low %vm9767_vm8, %vm9764_vm10  ;;  %2661 = vmatprep.mubr.bf16.mxu0 %v6542_v42  ;;  %vm6571_vm11 = vcmp.le.s32.totalorder %v941_v5, 16  ;;  %v9773_v16 = vmov 0  ;;  %vm6575_vm14 = vcmp.le.s32.totalorder %v942_v63, 16  ;;  %v9775_v17 = vmov 0  ;;  %v675_v28 = vpop.f32.mrb[20].mxu0 }
 0x1c4   : > { %v9769_v31 = vsel %vm6554_vm5, 4294967295, %v9768_v31  ;;  %vm9770_vm3 = vmand %vm6467_vm7, %vm6471_vm15  ;;  %v9774_v16 = vsel %vm6571_vm11, 4294967295, %v9773_v16  ;;  %v9776_v17 = vsel %vm6575_vm14, 4294967295, %v9775_v17  ;;  %v6580_v21 = vadd.s32 %v6023_v2, %v817_v18  ;;  %v4910_v9 = vpop.f32.mrb[21].mxu0  ;;  %4497 = vmatpush3.bf16.msra.mxu1 %v5296_v45 }
 0x1c5   : > { %vm6567_vm1 = vmand %vm9770_vm3, %vm6513_vm0  ;;  %vm9777_vm8 = vsmask.f32 7424  ;;  %v9779_v51 = vmov 0  ;;  %vm6594_vm10 = vcmp.ge.s32.totalorder %v901_v29, 1  ;;  %vm6598_vm0 = vcmp.le.s32.totalorder %v901_v29, 16  ;;  %4498 = vmatprep.subr.bf16.mxu1 %v5297_v55 }
 0x1c6   : > { %v9772_v12 = vsel %vm6567_vm1, 4294967295, %v9771_v12  ;;  %v1484_v50 = vsel %vm9777_vm8, %v1479_v43, %v1483_v44  ;;  %vm9778_vm7 = vmand %vm6500_vm2, %vm6504_vm4  ;;  %vm6602_vm6 = vcmp.ge.s32.totalorder %v943_v30, 1  ;;  %vm9788_vm2 = vnez %v9743_v60 }
 0x1c7   : > { %vm6590_vm15 = vmand %vm9778_vm7, %vm6532_vm13  ;;  %vm9789_vm4 = vnez %v9739_v4  ;;  %v6616_v61 = vpack.c.bf16 %v1276_v38, %v1275_v35  ;;  %2355 = vmatprep.mubr.bf16.mxu1 %v1484_v50  ;;  %2662 = vmatmul.mubr.bf16.vlgmr.msra.gmra.mrb[84].mxu0 %v1484_v50  ;;  %v944_v62 = vshra.s32 %v6489_v6, 5  ;;  %vm6628_vm7 = vcmp.ge.s32.totalorder %v902_v40, 1 }
 0x1c8   : > { %v9780_v51 = vsel %vm6590_vm15, 4294967295, %v9779_v51  ;;  %vm9787_vm13 = vmand %vm6443_vm9, %vm9752_vm12  ;;  %4146 = vmatmul.mubr.msk.bf16.gmra.mrb[8].mxu1 %vm6554_vm5, %v6359_v13  ;;  %v6637_v6 = vadd.s32 %v6023_v2, %v818_v15  ;;  %4973 = vmatpush3.bf16.msra.mxu0 %v6129_v49  ;;  %v676_v8 = vadd.f32 %v6058_v20, %v675_v28  ;;  %vm6645_vm8 = vcmp.le.s32.totalorder %v943_v30, 16  ;;  %v678_v49 = vpop.f32.mrb[22].mxu0  ;;  %v5306_v15 = vld [vmem:[#allocation7 + $0x218] sm:$0xff]  }
 0x1c9   : > { %v1401_v57 = vsel %vm9787_vm13, %v1275_v35, 0.0  ;;  %vm9790_vm3 = vmand %vm9788_vm2, %vm9789_vm4  ;;  %vm6632_vm13 = vcmp.le.s32.totalorder %v902_v40, 16  ;;  %v9795_v10 = vmov 0  ;;  %v903_v58 = vand.u32 31, %v6580_v21  ;;  %4974 = vmatprep.subr.bf16.mxu0 %v5304_v48  ;;  %v4911_v34 = vpop.f32.mrb[23].mxu0  ;;  %4499 = vmatpush3.bf16.msra.mxu1 %v5298_v14 }
 0x1ca   : > { %v1402_v59 = vsel %vm9790_vm3, %v1276_v38, 0.0  ;;  %v9796_v10 = vsel %vm6645_vm8, 4294967295, %v9795_v10  ;;  %v819_v11 = vadd.s32 128, %v6019_v1  ;;  %v1485_v18 = vshrl.u32 %v6491_v7, 16  ;;  %4500 = vmatprep.subr.bf16.mxu1 %v5299_v22  ;;  %v5307_v22 = vld [vmem:[#allocation7 + $0x1c0] sm:$0xff]  }
 0x1cb   : > { %v6619_v63 = vpack.c.bf16 %v1402_v59, %v1401_v57  ;;  %v1277_v56 = vmax.f32 %v676_v8, 0.0  ;;  %v679_v30 = vadd.f32 %v6058_v20, %v678_v49  ;;  %vm6663_vm4 = vcmp.ge.s32.totalorder %v944_v62, 1 }
 0x1cc   : > { %v820_v36 = vadd.s32 136, %v6019_v1  ;;  %vm9799_vm3 = vcmask 1046528   ;;  %v1487_v39 = vor.u32 %v1485_v18, %v1483_v44  ;;  %vm9800_vm2 = vnez %v9700_v27  ;;  %4975 = vmatpush3.bf16.msra.mxu0 %v5304_v48  ;;  %v5300_v44 = vld [vmem:[#allocation7 + $0xb0] sm:$0xff]  }
 0x1cd   : > { %v1630_v29 = vrot.slane %v6619_v63, 1  ;;  %v1489_v19 = vshll.u32 %v6619_v63, 16  ;;  %vm9801_vm12 = vnez %v9686_v41  ;;  %vm9803_vm9 = vnez %v9708_v0  ;;  %4976 = vmatprep.subr.bf16.mxu0 %v5305_v25  ;;  %4501 = vmatpush3.bf16.msra.mxu1 %v5300_v44 }
 0x1ce   : > { %vm9802_vm5 = vmand %vm9800_vm2, %vm9801_vm12  ;;  %vm9804_vm8 = vnez %v9690_v54  ;;  %v9806_v43 = vmov 0  ;;  %v904_v7 = vand.u32 31, %v6637_v6  ;;  %v9809_v41 = vmov 0  ;;  %4502 = vmatprep.subr.bf16.mxu1 %v5301_v52 }
 0x1cf   : > { %v6673_v37 = vsel %vm9799_vm3, %v1628_v24, %v1630_v29  ;;  %v1491_v40 = vrot.slane %v1489_v19, 1  ;;  %vm9805_vm14 = vmand %vm9803_vm9, %vm9804_vm8  ;;  %v1278_v24 = vmax.f32 %v679_v30, 0.0  ;;  %vm6702_vm9 = vcmp.le.s32.totalorder %v944_v62, 16  ;;  %v683_v62 = vpop.f32.mrb[24].mxu0 }
 0x1d0   : > { %vm6685_vm15 = vmpackc.low %vm9805_vm14, %vm9802_vm5  ;;  %2669 = vmatprep.mubr.bf16.mxu0 %v6673_v37  ;;  %v9811_v54 = vmov 0  ;;  %v945_v27 = vshra.s32 %v6580_v21, 5  ;;  %v6708_v0 = vadd.s32 %v6023_v2, %v819_v11  ;;  %vm9813_vm5 = vsmask.f32 7424  ;;  %4977 = vmatpush3.bf16.msra.mxu0 %v5305_v25  ;;  %v5303_v11 = vld [vmem:[#allocation7 + $0xb8] sm:$0xff]   ;;  %v5308_v25 = vld [vmem:[#allocation7 + $0x220] sm:$0xff]  }
 0x1d1   : > { %v9807_v43 = vsel %vm6685_vm15, 4294967295, %v9806_v43  ;;  %vm9808_vm12 = vmand %vm6594_vm10, %vm6598_vm0  ;;  %v9812_v54 = vsel %vm6702_vm9, 4294967295, %v9811_v54  ;;  %v1492_v38 = vsel %vm9813_vm5, %v1487_v39, %v1491_v40  ;;  %v9815_v45 = vmov 0  ;;  %4978 = vmatprep.subr.bf16.mxu0 %v5306_v15  ;;  %4503 = vmatpush3.bf16.msra.mxu1 %v5303_v11  ;;  %v5311_v11 = vld [vmem:[#allocation7 + $0x230] sm:$0xff]  }
 0x1d2   : > { %vm6698_vm2 = vmand %vm9808_vm12, %vm6602_vm6  ;;  %vm6722_vm0 = vcmp.ge.s32.totalorder %v903_v58, 1  ;;  %vm6726_vm6 = vcmp.le.s32.totalorder %v903_v58, 16  ;;  %v946_v50 = vshra.s32 %v6637_v6, 5  ;;  %vm9822_vm8 = vnez %v9780_v51  ;;  %2363 = vmatprep.mubr.bf16.mxu1 %v1492_v38  ;;  %2670 = vmatmul.mubr.bf16.gmra.mrb[88].mxu0 %v1492_v38  ;;  %v4914_v6 = vpop.f32.mrb[25].mxu0 }
 0x1d3   : > { %v9810_v41 = vsel %vm6698_vm2, 4294967295, %v9809_v41  ;;  %vm9814_vm14 = vmand %vm6628_vm7, %vm6632_vm13  ;;  %vm9823_vm7 = vnez %v9776_v17  ;;  %v6741_v55 = vpack.c.bf16 %v1278_v24, %v1277_v56  ;;  %v6744_v57 = vadd.s32 %v6023_v2, %v820_v36  ;;  %4149 = vmatmul.mubr.msk.bf16.gmra.mrb[12].mxu1 %vm6685_vm15, %v6486_v3  ;;  %v686_v14 = vpop.f32.mrb[26].mxu0  ;;  %4712 = vmatprep.subr.bf16.mxu1 %v5307_v22 }
 0x1d4   : > { %vm6718_vm10 = vmand %vm9814_vm14, %vm6663_vm4  ;;  %vm9825_vm3 = vnez %v9796_v10  ;;  %vm6755_vm5 = vcmp.ge.s32.totalorder %v904_v7, 1  ;;  %vm6759_vm14 = vcmp.le.s32.totalorder %v904_v7, 16  ;;  %v684_v33 = vadd.f32 %v6058_v20, %v683_v62  ;;  %v4915_v34 = vpop.f32.mrb[27].mxu0  ;;  %4979 = vmatpush3.bf16.msra.mxu0 %v5306_v15 }
 0x1d5   : > { %v9816_v45 = vsel %vm6718_vm10, 4294967295, %v9815_v45  ;;  %vm9821_vm4 = vmand %vm6567_vm1, %vm6571_vm11  ;;  %v905_v9 = vand.u32 31, %v6708_v0  ;;  %v821_v58 = vadd.s32 144, %v6019_v1  ;;  %v1493_v18 = vshrl.u32 %v6619_v63, 16  ;;  %4980 = vmatprep.subr.bf16.mxu0 %v5308_v25  ;;  %v691_v62 = vpop.f32.mrb[28].mxu0 }
 0x1d6   : > { %v1403_v46 = vsel %vm9821_vm4, %v1277_v56, 0.0  ;;  %vm9824_vm13 = vmand %vm9822_vm8, %vm9823_vm7  ;;  %v1279_v56 = vmax.f32 %v684_v33, 0.0  ;;  %v687_v30 = vadd.f32 %v6058_v20, %v686_v14  ;;  %vm6786_vm15 = vcmp.ge.s32.totalorder %v946_v50, 1  ;;  %v4918_v6 = vpop.f32.mrb[29].mxu0 }
 0x1d7   : > { %v1404_v5 = vsel %vm9824_vm13, %v1278_v24, 0.0  ;;  %vm6768_vm13 = vcmp.ge.s32.totalorder %v945_v27, 1  ;;  %v906_v36 = vand.u32 31, %v6744_v57  ;;  %vm9834_vm4 = vcmask 1046528   ;;  %v694_v14 = vpop.f32.mrb[30].mxu0 }
 0x1d8   : > { %v6746_v59 = vpack.c.bf16 %v1404_v5, %v1403_v46  ;;  %v1495_v7 = vor.u32 %v1493_v18, %v1491_v40  ;;  %vm9835_vm7 = vnez %v9737_v47  ;;  %vm9836_vm8 = vnez %v9723_v26  ;;  %v5310_v40 = vld [vmem:[#allocation7 + $0x228] sm:$0xff]   ;;  %4981 = vmatpush3.bf16.msra.mxu0 %v5308_v25  ;;  %v4919_v34 = vpop.f32.mrb[31].mxu0 }
 0x1d9   : > { %vm9837_vm12 = vmand %vm9835_vm7, %vm9836_vm8  ;;  %vm9838_vm11 = vnez %v9743_v60  ;;  %vm9839_vm1 = vnez %v9739_v4  ;;  %v9841_v44 = vmov 0  ;;  %v822_v63 = vadd.s32 152, %v6019_v1  ;;  %4982 = vmatprep.subr.bf16.mxu0 %v5310_v40 }
 0x1da   : > { %v1632_v49 = vrot.slane %v6746_v59, 1  ;;  %v1497_v19 = vshll.u32 %v6746_v59, 16  ;;  %vm9840_vm9 = vmand %vm9838_vm11, %vm9839_vm1  ;;  %v9844_v26 = vmov 0  ;;  %vm6825_vm1 = vcmp.le.s32.totalorder %v945_v27, 16 }
 0x1db   : > { %vm6808_vm10 = vmpackc.low %vm9840_vm9, %vm9837_vm12  ;;  %v9846_v47 = vmov 0  ;;  %vm6829_vm11 = vcmp.le.s32.totalorder %v946_v50, 16  ;;  %v9848_v4 = vmov 0  ;;  %v947_v60 = vshra.s32 %v6708_v0, 5 }
 0x1dc   : > { %v6796_v39 = vsel %vm9834_vm4, %v1630_v29, %v1632_v49  ;;  %v1499_v24 = vrot.slane %v1497_v19, 1  ;;  %v9842_v44 = vsel %vm6808_vm10, 4294967295, %v9841_v44  ;;  %v1280_v29 = vmax.f32 %v687_v30, 0.0  ;;  %vm9843_vm8 = vmand %vm6722_vm0, %vm6726_vm6  ;;  %4983 = vmatpush3.bf16.msra.mxu0 %v5310_v40 }
 0x1dd   : > { %2677 = vmatprep.mubr.bf16.mxu0 %v6796_v39  ;;  %vm6821_vm7 = vmand %vm9843_vm8, %vm6768_vm13  ;;  %v9847_v47 = vsel %vm6825_vm1, 4294967295, %v9846_v47  ;;  %v9849_v4 = vsel %vm6829_vm11, 4294967295, %v9848_v4  ;;  %vm9850_vm9 = vsmask.f32 7424  ;;  %v9853_v27 = vmov 0  ;;  %4984 = vmatprep.subr.bf16.mxu0 %v5311_v11 }
 0x1de   : > { %v9845_v26 = vsel %vm6821_vm7, 4294967295, %v9844_v26  ;;  %v6835_v15 = vsel %vm9850_vm9, %v1495_v7, %v1499_v24  ;;  %vm9852_vm0 = vmand %vm6755_vm5, %vm6759_vm14  ;;  %vm6848_vm12 = vcmp.ge.s32.totalorder %v905_v9, 1  ;;  %vm6852_vm4 = vcmp.le.s32.totalorder %v905_v9, 16 }
 0x1df   : > { %9851 = vst [vmem:[#allocation20_spill] sm:$0xff] %v6835_v15  ;;  %vm6844_vm6 = vmand %vm9852_vm0, %vm6786_vm15  ;;  %v6857_v21 = vadd.s32 %v6023_v2, %v821_v58  ;;  %vm9860_vm5 = vnez %v9816_v45  ;;  %vm9861_vm14 = vnez %v9812_v54  ;;  %v6869_v52 = vpack.c.bf16 %v1280_v29, %v1279_v56  ;;  %2371 = vmatprep.mubr.bf16.mxu1 %v6835_v15  ;;  %2678 = vmatmul.mubr.bf16.gmra.mrb[92].mxu0 %v6835_v15 }
 0x1e0   : > { %v9854_v27 = vsel %vm6844_vm6, 4294967295, %v9853_v27  ;;  %vm9859_vm15 = vmand %vm6698_vm2, %vm9825_vm3  ;;  %v948_v46 = vshra.s32 %v6744_v57, 5  ;;  %4152 = vmatmul.mubr.msk.bf16.gmra.mrb[16].mxu1 %vm6808_vm10, %v6616_v61  ;;  %vm6883_vm9 = vcmp.ge.s32.totalorder %v906_v36, 1  ;;  %vm6887_vm0 = vcmp.le.s32.totalorder %v906_v36, 16  ;;  %4985 = vmatpush3.bf16.msra.mxu0 %v5311_v11 }
 0x1e1   : > { %v1405_v48 = vsel %vm9859_vm15, %v1279_v56, 0.0  ;;  %vm9862_vm13 = vmand %vm9860_vm5, %vm9861_vm14  ;;  %v6892_v57 = vadd.s32 %v6023_v2, %v822_v63  ;;  %v692_v33 = vadd.f32 %v6058_v20, %v691_v62  ;;  %vm6903_vm8 = vcmp.le.s32.totalorder %v947_v60, 16 }
 0x1e2   : > { %v1406_v50 = vsel %vm9862_vm13, %v1280_v29, 0.0  ;;  %vm6899_vm13 = vcmp.ge.s32.totalorder %v947_v60, 1  ;;  %v9869_v9 = vmov 0  ;;  %v823_v58 = vadd.s32 160, %v6019_v1 }
 0x1e3   : > { %v6874_v5 = vpack.c.bf16 %v1406_v50, %v1405_v48  ;;  %v9870_v9 = vsel %vm6903_vm8, 4294967295, %v9869_v9  ;;  %v1501_v19 = vshrl.u32 %v6746_v59, 16  ;;  %v907_v25 = vand.u32 31, %v6857_v21 }
 0x1e4   : > { %v1281_v56 = vmax.f32 %v692_v33, 0.0  ;;  %v695_v30 = vadd.f32 %v6058_v20, %v694_v14  ;;  %vm6921_vm14 = vcmp.ge.s32.totalorder %v948_v46, 1  ;;  %v824_v36 = vadd.s32 168, %v6019_v1 }
 0x1e5   : > { %v1634_v18 = vrot.slane %v6874_v5, 1  ;;  %v1505_v22 = vshll.u32 %v6874_v5, 16  ;;  %vm9873_vm15 = vcmask 1046528   ;;  %v1503_v63 = vor.u32 %v1501_v19, %v1499_v24  ;;  %v5312_v24 = vld [vmem:[#allocation7 + $0x238] sm:$0xff]  }
 0x1e6   : > { %vm9874_vm5 = vnez %v9772_v12  ;;  %vm9875_vm3 = vnez %v9774_v16  ;;  %vm9877_vm10 = vnez %v9780_v51  ;;  %vm9878_vm8 = vnez %v9776_v17  ;;  %4986 = vmatprep.subr.bf16.mxu0 %v5312_v24 }
 0x1e7   : > { %v6929_v7 = vsel %vm9873_vm15, %v1632_v49, %v1634_v18  ;;  %v1507_v29 = vrot.slane %v1505_v22, 1  ;;  %vm9876_vm2 = vmand %vm9874_vm5, %vm9875_vm3  ;;  %v9880_v60 = vmov 0  ;;  %v908_v59 = vand.u32 31, %v6892_v57  ;;  %4987 = vmatpush3.bf16.msra.mxu0 %v5312_v24 }
 0x1e8   : > { %vm9879_vm11 = vmand %vm9877_vm10, %vm9878_vm8  ;;  %v1282_v49 = vmax.f32 %v695_v30, 0.0  ;;  %2685 = vmatprep.mubr.bf16.mxu0 %v6929_v7  ;;  %v9883_v12 = vmov 0  ;;  %v9885_v16 = vmov 0  ;;  %v949_v17 = vshra.s32 %v6857_v21, 5 }
 0x1e9   : > { %vm6941_vm6 = vmpackc.low %vm9879_vm11, %vm9876_vm2  ;;  %vm6958_vm2 = vcmp.le.s32.totalorder %v948_v46, 16  ;;  %v6964_v51 = vadd.s32 %v6023_v2, %v823_v58  ;;  %vm9887_vm10 = vsmask.f32 7424  ;;  %v9890_v38 = vmov 0 }
 0x1ea   : > { %v9881_v60 = vsel %vm6941_vm6, 4294967295, %v9880_v60  ;;  %vm9882_vm3 = vmand %vm6848_vm12, %vm6852_vm4  ;;  %v9886_v16 = vsel %vm6958_vm2, 4294967295, %v9885_v16  ;;  %v6967_v40 = vsel %vm9887_vm10, %v1503_v63, %v1507_v29  ;;  %vm6980_vm4 = vcmp.ge.s32.totalorder %v907_v25, 1 }
 0x1eb   : > { %vm6954_vm5 = vmand %vm9882_vm3, %vm6899_vm13  ;;  %9888 = vst [vmem:[#allocation21_spill] sm:$0xff] %v6967_v40  ;;  %vm6984_vm8 = vcmp.le.s32.totalorder %v907_v25, 16  ;;  %v950_v48 = vshra.s32 %v6892_v57, 5  ;;  %v6999_v62 = vpack.c.bf16 %v1282_v49, %v1281_v56  ;;  %2379 = vmatprep.mubr.bf16.mxu1 %v6967_v40  ;;  %2686 = vmatmul.mubr.bf16.gmra.mrb[96].mxu0 %v6967_v40  ;;  %v7004_v28 = vadd.s32 %v6023_v2, %v824_v36  ;;  %v699_v57 = vpop.f32.mrb[32].mxu0 }
 0x1ec   : > { %v9884_v12 = vsel %vm6954_vm5, 4294967295, %v9883_v12  ;;  %vm9889_vm11 = vmand %vm6883_vm9, %vm6887_vm0  ;;  %vm9898_vm9 = vnez %v9849_v4  ;;  %vm9901_vm13 = vnez %v9870_v9  ;;  %4155 = vmatmul.mubr.msk.bf16.gmra.mrb[20].mxu1 %vm6941_vm6, %v6741_v55  ;;  %vm7015_vm10 = vcmp.ge.s32.totalorder %v908_v59, 1  ;;  %v4922_v58 = vpop.f32.mrb[33].mxu0 }
 0x1ed   : > { %vm6976_vm12 = vmand %vm9889_vm11, %vm6921_vm14  ;;  %vm9897_vm14 = vnez %v9854_v27  ;;  %9900 = vst [vmem:[#allocation22_spill] sm:$0xff] %v6999_v62  ;;  %vm7019_vm11 = vcmp.le.s32.totalorder %v908_v59, 16  ;;  %v700_v8 = vadd.f32 %v6058_v20, %v699_v57  ;;  %v909_v19 = vand.u32 31, %v6964_v51  ;;  %v702_v22 = vpop.f32.mrb[34].mxu0 }
 0x1ee   : > { %v9891_v38 = vsel %vm6976_vm12, 4294967295, %v9890_v38  ;;  %vm9896_vm15 = vmand %vm6821_vm7, %vm6825_vm1  ;;  %v1509_v11 = vshrl.u32 %v6874_v5, 16  ;;  %v825_v30 = vadd.s32 176, %v6019_v1  ;;  %v703_v35 = vadd.f32 %v6058_v20, %v702_v22  ;;  %v4923_v36 = vpop.f32.mrb[35].mxu0 }
 0x1ef   : > { %v1407_v50 = vsel %vm9896_vm15, %v1281_v56, 0.0  ;;  %vm9899_vm0 = vmand %vm9897_vm14, %vm9898_vm9  ;;  %v1283_v34 = vmax.f32 %v700_v8, 0.0  ;;  %vm7046_vm6 = vcmp.ge.s32.totalorder %v950_v48, 1  ;;  %v910_v63 = vand.u32 31, %v7004_v28  ;;  %v707_v58 = vpop.f32.mrb[36].mxu0 }
 0x1f0   : > { %v1408_v46 = vsel %vm9899_vm0, %v1282_v49, 0.0  ;;  %vm7028_vm0 = vcmp.ge.s32.totalorder %v949_v17, 1  ;;  %vm9910_vm9 = vcmask 1046528   ;;  %v1511_v49 = vor.u32 %v1509_v11, %v1507_v29  ;;  %v4926_v11 = vpop.f32.mrb[37].mxu0 }
 0x1f1   : > { %v7006_v32 = vpack.c.bf16 %v1408_v46, %v1407_v50  ;;  %vm9911_vm3 = vnez %v9810_v41  ;;  %vm9912_vm14 = vnez %v9796_v10  ;;  %vm9914_vm7 = vnez %v9816_v45 }
 0x1f2   : > { %vm9913_vm1 = vmand %vm9911_vm3, %vm9912_vm14  ;;  %vm9915_vm15 = vnez %v9812_v54  ;;  %v9917_v46 = vmov 0  ;;  %v826_v57 = vadd.s32 184, %v6019_v1  ;;  %v9920_v10 = vmov 0 }
 0x1f3   : > { %v1636_v25 = vrot.slane %v7006_v32, 1  ;;  %v1513_v56 = vshll.u32 %v7006_v32, 16  ;;  %vm9916_vm2 = vmand %vm9914_vm7, %vm9915_vm15  ;;  %vm7081_vm7 = vcmp.le.s32.totalorder %v949_v17, 16  ;;  %v9922_v41 = vmov 0 }
 0x1f4   : > { %vm7064_vm12 = vmpackc.low %vm9916_vm2, %vm9913_vm1  ;;  %v9923_v41 = vsel %vm7081_vm7, 4294967295, %v9922_v41  ;;  %vm7085_vm1 = vcmp.le.s32.totalorder %v950_v48, 16  ;;  %v9924_v54 = vmov 0  ;;  %v951_v45 = vshra.s32 %v6964_v51, 5 }
 0x1f5   : > { %v7052_v59 = vsel %vm9910_vm9, %v1634_v18, %v1636_v25  ;;  %v1515_v50 = vrot.slane %v1513_v56, 1  ;;  %v9918_v46 = vsel %vm7064_vm12, 4294967295, %v9917_v46  ;;  %v1284_v18 = vmax.f32 %v703_v35, 0.0  ;;  %vm9919_vm14 = vmand %vm6980_vm4, %vm6984_vm8  ;;  %v710_v35 = vpop.f32.mrb[38].mxu0 }
 0x1f6   : > { %2693 = vmatprep.mubr.bf16.mxu0 %v7052_v59  ;;  %vm7077_vm9 = vmand %vm9919_vm14, %vm7028_vm0  ;;  %v9925_v54 = vsel %vm7085_vm1, 4294967295, %v9924_v54  ;;  %vm9926_vm2 = vsmask.f32 7424  ;;  %v9929_v17 = vmov 0  ;;  %vm7104_vm3 = vcmp.ge.s32.totalorder %v909_v19, 1 }
 0x1f7   : > { %v9921_v10 = vsel %vm7077_vm9, 4294967295, %v9920_v10  ;;  %v7091_v29 = vsel %vm9926_vm2, %v1511_v49, %v1515_v50  ;;  %vm9928_vm4 = vmand %vm7015_vm10, %vm7019_vm11  ;;  %vm7108_vm15 = vcmp.le.s32.totalorder %v909_v19, 16  ;;  %v7113_v0 = vadd.s32 %v6023_v2, %v825_v30 }
 0x1f8   : > { %9927 = vst [vmem:[#allocation23_spill] sm:$0xff] %v7091_v29  ;;  %vm7100_vm8 = vmand %vm9928_vm4, %vm7046_vm6  ;;  %vm9936_vm6 = vnez %v9891_v38  ;;  %vm9937_vm11 = vnez %v9886_v16  ;;  %v7125_v33 = vpack.c.bf16 %v1284_v18, %v1283_v34  ;;  %2387 = vmatprep.mubr.bf16.mxu1 %v7091_v29  ;;  %2694 = vmatmul.mubr.bf16.gmra.mrb[100].mxu0 %v7091_v29  ;;  %v952_v6 = vshra.s32 %v7004_v28, 5 }
 0x1f9   : > { %v9930_v17 = vsel %vm7100_vm8, 4294967295, %v9929_v17  ;;  %vm9935_vm10 = vmand %vm6954_vm5, %vm9901_vm13  ;;  %4158 = vmatmul.mubr.msk.bf16.gmra.mrb[24].mxu1 %vm7064_vm12, %v6869_v52  ;;  %vm7139_vm2 = vcmp.ge.s32.totalorder %v910_v63, 1  ;;  %vm7143_vm4 = vcmp.le.s32.totalorder %v910_v63, 16  ;;  %v7148_v28 = vadd.s32 %v6023_v2, %v826_v57 }
 0x1fa   : > { %v1409_v21 = vsel %vm9935_vm10, %v1283_v34, 0.0  ;;  %vm9938_vm0 = vmand %vm9936_vm6, %vm9937_vm11  ;;  %9939 = vst [vmem:[#allocation24_spill] sm:$0xff] %v7125_v33  ;;  %v708_v22 = vadd.f32 %v6058_v20, %v707_v58  ;;  %vm7159_vm14 = vcmp.le.s32.totalorder %v951_v45, 16  ;;  %v9946_v30 = vmov 0 }
 0x1fb   : > { %v1410_v48 = vsel %vm9938_vm0, %v1284_v18, 0.0  ;;  %vm7155_vm0 = vcmp.ge.s32.totalorder %v951_v45, 1  ;;  %v9947_v30 = vsel %vm7159_vm14, 4294967295, %v9946_v30  ;;  %v827_v34 = vadd.s32 192, %v6019_v1  ;;  %v4927_v45 = vpop.f32.mrb[39].mxu0  ;;  %vm1078_vm12 = vmand %vm7139_vm2, %vm7143_vm4 }
 0x1fc   : > { %v7130_v8 = vpack.c.bf16 %v1410_v48, %v1409_v21  ;;  %v1517_v5 = vshrl.u32 %v7006_v32, 16  ;;  %v911_v49 = vand.u32 31, %v7113_v0  ;;  %v1285_v57 = vmax.f32 %v708_v22, 0.0 }
 0x1fd   : > { %v711_v18 = vadd.f32 %v6058_v20, %v710_v35  ;;  %vm1120_vm11 = vcmp.ge.s32.totalorder %v952_v6, 1  ;;  %v828_v32 = vadd.s32 200, %v6019_v1  ;;  %vm9948_vm6 = vcmask 1046528   ;;  %v715_v35 = vpop.f32.mrb[40].mxu0 }
 0x1fe   : > { %v1638_v36 = vrot.slane %v7130_v8, 1  ;;  %v1521_v63 = vshll.u32 %v7130_v8, 16  ;;  %v1519_v48 = vor.u32 %v1517_v5, %v1515_v50  ;;  %vm9949_vm10 = vnez %v9845_v26 }
 0x1ff   : > { %vm9950_vm13 = vnez %v9847_v47  ;;  %vm9952_vm14 = vnez %v9854_v27  ;;  %vm9953_vm1 = vnez %v9849_v4  ;;  %v9955_v22 = vmov 0 }
 0x200   : > { %v7179_v21 = vsel %vm9948_vm6, %v1636_v25, %v1638_v36  ;;  %v1523_v58 = vrot.slane %v1521_v63, 1  ;;  %vm9951_vm5 = vmand %vm9949_vm10, %vm9950_vm13  ;;  %v912_v11 = vand.u32 31, %v7148_v28  ;;  %v1286_v25 = vmax.f32 %v711_v18, 0.0 }
 0x201   : > { %vm9954_vm8 = vmand %vm9952_vm14, %vm9953_vm1  ;;  %2701 = vmatprep.mubr.bf16.mxu0 %v7179_v21  ;;  %v9959_v26 = vmov 0  ;;  %v9961_v47 = vmov 0  ;;  %v953_v4 = vshra.s32 %v7113_v0, 5  ;;  %v7214_v27 = vadd.s32 %v6023_v2, %v827_v34 }
 0x202   : > { %vm7191_vm7 = vmpackc.low %vm9954_vm8, %vm9951_vm5  ;;  %vm7208_vm5 = vcmp.le.s32.totalorder %v952_v6, 16  ;;  %vm9963_vm1 = vsmask.f32 7424  ;;  %v9965_v24 = vmov 0  ;;  %v954_v6 = vshra.s32 %v7148_v28, 5 }
 0x203   : > { %v9956_v22 = vsel %vm7191_vm7, 4294967295, %v9955_v22  ;;  %vm9958_vm13 = vmand %vm7104_vm3, %vm7108_vm15  ;;  %v9962_v47 = vsel %vm7208_vm5, 4294967295, %v9961_v47  ;;  %v7217_v50 = vsel %vm9963_vm1, %v1519_v48, %v1523_v58  ;;  %vm7228_vm3 = vcmp.ge.s32.totalorder %v911_v49, 1 }
 0x204   : > { %9957 = vst [vmem:[#allocation25_spill] sm:$0xff] %v9956_v22  ;;  %vm7204_vm6 = vmand %vm9958_vm13, %vm7155_vm0  ;;  %vm7232_vm15 = vcmp.le.s32.totalorder %v911_v49, 16  ;;  %vm9971_vm14 = vnez %v9923_v41  ;;  %v7247_v56 = vpack.c.bf16 %v1286_v25, %v1285_v57  ;;  %2395 = vmatprep.mubr.bf16.mxu1 %v7217_v50  ;;  %2702 = vmatmul.mubr.bf16.gmra.mrb[104].mxu0 %v7217_v50  ;;  %v7252_v28 = vadd.s32 %v6023_v2, %v828_v32 }
 0x205   : > { %v9960_v26 = vsel %vm7204_vm6, 4294967295, %v9959_v26  ;;  %9964 = vst [vmem:[#allocation26_spill] sm:$0xff] %v7217_v50  ;;  %vm7224_vm8 = vmand %vm1078_vm12, %vm1120_vm11  ;;  %vm9973_vm12 = vnez %v9930_v17  ;;  %vm9974_vm11 = vnez %v9925_v54  ;;  %4161 = vmatmul.mubr.msk.bf16.gmra.mrb[28].mxu1 %vm7191_vm7, %v6999_v62  ;;  %vm7263_vm13 = vcmp.ge.s32.totalorder %v912_v11, 1 }
 0x206   : > { %v9966_v24 = vsel %vm7224_vm8, 4294967295, %v9965_v24  ;;  %vm9972_vm10 = vmand %vm7077_vm9, %vm9971_vm14  ;;  %9976 = vst [vmem:[#allocation27_spill] sm:$0xff] %v7247_v56  ;;  %vm7267_vm1 = vcmp.le.s32.totalorder %v912_v11, 16  ;;  %v716_v49 = vadd.f32 %v6058_v20, %v715_v35  ;;  %v913_v45 = vand.u32 31, %v7214_v27 }
 0x207   : > { %v1411_v14 = vsel %vm9972_vm10, %v1285_v57, 0.0  ;;  %vm9975_vm2 = vmand %vm9973_vm12, %vm9974_vm11  ;;  %v4930_v57 = vpop.f32.mrb[41].mxu0  ;;  %v1525_v11 = vshrl.u32 %v7130_v8, 16  ;;  %v829_v20 = vadd.s32 208, %v6019_v1  ;;  %vm1122_vm7 = vcmp.ge.s32.totalorder %v954_v6, 1 }
 0x208   : > { %v1412_v19 = vsel %vm9975_vm2, %v1286_v25, 0.0  ;;  %vm7276_vm2 = vcmp.ge.s32.totalorder %v953_v4, 1  ;;  %v718_v32 = vpop.f32.mrb[42].mxu0  ;;  %vm1080_vm10 = vmand %vm7263_vm13, %vm7267_vm1  ;;  %v914_v8 = vand.u32 31, %v7252_v28  ;;  %vm9984_vm0 = vcmask 1046528  }
 0x209   : > { %v7254_v34 = vpack.c.bf16 %v1412_v19, %v1411_v14  ;;  %v1287_v14 = vmax.f32 %v716_v49, 0.0  ;;  %v7292_v19 = vld [vmem:[%s9380_s2] ss:$0 sm:$0xff]  ;;  %v4931_v57 = vpop.f32.mrb[43].mxu0  ;;  %v1527_v49 = vor.u32 %v1525_v11, %v1523_v58  ;;  %vm9985_vm11 = vnez %v9884_v12 }
 0x20a   : > { %v719_v35 = vadd.f32 %v7292_v19, %v718_v32  ;;  %vm9986_vm12 = vnez %v9870_v9  ;;  %vm9988_vm9 = vnez %v9891_v38  ;;  %vm9989_vm5 = vnez %v9886_v16  ;;  %v723_v11 = vpop.f32.mrb[44].mxu0 }
 0x20b   : > { %v1640_v48 = vrot.slane %v7254_v34, 1  ;;  %v1529_v25 = vshll.u32 %v7254_v34, 16  ;;  %vm9987_vm14 = vmand %vm9985_vm11, %vm9986_vm12  ;;  %v9991_v32 = vmov 0  ;;  %v830_v57 = vadd.s32 216, %v6019_v1 }
 0x20c   : > { %vm9990_vm8 = vmand %vm9988_vm9, %vm9989_vm5  ;;  %v9995_v9 = vmov 0  ;;  %vm7330_vm9 = vcmp.le.s32.totalorder %v953_v4, 16  ;;  %v9997_v12 = vmov 0  ;;  %vm7334_vm5 = vcmp.le.s32.totalorder %v954_v6, 16 }
 0x20d   : > { %v7301_v50 = vsel %vm9984_vm0, %v1638_v36, %v1640_v48  ;;  %v1531_v29 = vrot.slane %v1529_v25, 1  ;;  %vm7313_vm4 = vmpackc.low %vm9990_vm8, %vm9987_vm14  ;;  %v1288_v36 = vmax.f32 %v719_v35, 0.0  ;;  %v9998_v12 = vsel %vm7330_vm9, 4294967295, %v9997_v12  ;;  %v4934_v35 = vpop.f32.mrb[45].mxu0 }
 0x20e   : > { %v9992_v32 = vsel %vm7313_vm4, 4294967295, %v9991_v32  ;;  %2709 = vmatprep.mubr.bf16.mxu0 %v7301_v50  ;;  %vm9994_vm12 = vmand %vm7228_vm3, %vm7232_vm15  ;;  %v9999_v16 = vmov 0  ;;  %v955_v38 = vshra.s32 %v7214_v27, 5  ;;  %vm10001_vm8 = vsmask.f32 7424 }
 0x20f   : > { %9993 = vst [vmem:[#allocation28_spill] sm:$0xff] %v9992_v32  ;;  %vm7326_vm11 = vmand %vm9994_vm12, %vm7276_vm2  ;;  %v10000_v16 = vsel %vm7334_vm5, 4294967295, %v9999_v16  ;;  %v7340_v58 = vsel %vm10001_vm8, %v1527_v49, %v1531_v29  ;;  %v10003_v51 = vmov 0  ;;  %vm7351_vm15 = vcmp.ge.s32.totalorder %v913_v45, 1 }
 0x210   : > { %v9996_v9 = vsel %vm7326_vm11, 4294967295, %v9995_v9  ;;  %10002 = vst [vmem:[#allocation29_spill] sm:$0xff] %v7340_v58  ;;  %vm7347_vm3 = vmand %vm1080_vm10, %vm1122_vm7  ;;  %vm7355_vm14 = vcmp.le.s32.totalorder %v913_v45, 16  ;;  %v7360_v27 = vadd.s32 %v6023_v2, %v829_v20  ;;  %vm10009_vm0 = vnez %v9947_v30  ;;  %2403 = vmatprep.mubr.bf16.mxu1 %v7340_v58  ;;  %2710 = vmatmul.mubr.bf16.gmra.mrb[108].mxu0 %v7340_v58 }
 0x211   : > { %v10004_v51 = vsel %vm7347_vm3, 4294967295, %v10003_v51  ;;  %vm10010_vm13 = vmand %vm7204_vm6, %vm10009_vm0  ;;  %vm10011_vm7 = vnez %v9966_v24  ;;  %vm10012_vm1 = vnez %v9962_v47  ;;  %v7372_v63 = vpack.c.bf16 %v1288_v36, %v1287_v14  ;;  %4164 = vmatmul.mubr.msk.bf16.gmra.mrb[32].mxu1 %vm7313_vm4, %v7125_v33 }
 0x212   : > { %v1413_v6 = vsel %vm10010_vm13, %v1287_v14, 0.0  ;;  %vm10013_vm10 = vmand %vm10011_vm7, %vm10012_vm1  ;;  %v956_v18 = vshra.s32 %v7252_v28, 5  ;;  %vm7386_vm12 = vcmp.ge.s32.totalorder %v914_v8, 1  ;;  %vm7390_vm8 = vcmp.le.s32.totalorder %v914_v8, 16 }
 0x213   : > { %v1414_v5 = vsel %vm10013_vm10, %v1288_v36, 0.0  ;;  %10014 = vst [vmem:[#allocation30_spill] sm:$0xff] %v7372_v63  ;;  %v7395_v28 = vadd.s32 %v6023_v2, %v830_v57  ;;  %v724_v14 = vadd.f32 %v7292_v19, %v723_v11  ;;  %vm7402_vm10 = vcmp.ge.s32.totalorder %v955_v38, 1  ;;  %v726_v57 = vpop.f32.mrb[46].mxu0  ;;  %vm1082_vm4 = vmand %vm7386_vm12, %vm7390_vm8 }
 0x214   : > { %v7377_v45 = vpack.c.bf16 %v1414_v5, %v1413_v6  ;;  %vm7406_vm2 = vcmp.le.s32.totalorder %v955_v38, 16  ;;  %v10021_v8 = vmov 0  ;;  %v831_v36 = vadd.s32 224, %v6019_v1  ;;  %v4935_v40 = vpop.f32.mrb[47].mxu0 }
 0x215   : > { %v10022_v8 = vsel %vm7406_vm2, 4294967295, %v10021_v8  ;;  %v1533_v5 = vshrl.u32 %v7254_v34, 16  ;;  %v915_v35 = vand.u32 31, %v7360_v27  ;;  %v1289_v38 = vmax.f32 %v724_v14, 0.0  ;;  %v731_v49 = vpop.f32.mrb[48].mxu0 }
 0x216   : > { %v1642_v6 = vrot.slane %v7377_v45, 1  ;;  %v1537_v11 = vshll.u32 %v7377_v45, 16  ;;  %v727_v58 = vadd.f32 %v7292_v19, %v726_v57  ;;  %vm1124_vm1 = vcmp.ge.s32.totalorder %v956_v18, 1 }
 0x217   : > { %v832_v34 = vadd.s32 232, %v6019_v1  ;;  %vm10023_vm7 = vcmask 1046528   ;;  %v1535_v32 = vor.u32 %v1533_v5, %v1531_v29  ;;  %vm10024_vm13 = vnez %v9921_v10 }
 0x218   : > { %v7426_v15 = vsel %vm10023_vm7, %v1640_v48, %v1642_v6  ;;  %v1539_v33 = vrot.slane %v1537_v11, 1  ;;  %vm10025_vm0 = vnez %v9923_v41  ;;  %vm10027_vm2 = vnez %v9930_v17  ;;  %v4938_v11 = vpop.f32.mrb[49].mxu0 }
 0x219   : > { %vm10026_vm6 = vmand %vm10024_vm13, %vm10025_vm0  ;;  %vm10028_vm5 = vnez %v9925_v54  ;;  %v10030_v40 = vmov 0  ;;  %v916_v14 = vand.u32 31, %v7395_v28  ;;  %v1290_v48 = vmax.f32 %v727_v58, 0.0  ;;  %2717 = vmatprep.mubr.bf16.mxu0 %v7426_v15 }
 0x21a   : > { %vm10029_vm3 = vmand %vm10027_vm2, %vm10028_vm5  ;;  %v10034_v10 = vmov 0  ;;  %v10036_v41 = vmov 0  ;;  %v957_v54 = vshra.s32 %v7360_v27, 5  ;;  %v7461_v29 = vadd.s32 %v6023_v2, %v831_v36 }
 0x21b   : > { %vm7438_vm9 = vmpackc.low %vm10029_vm3, %vm10026_vm6  ;;  %vm7455_vm6 = vcmp.le.s32.totalorder %v956_v18, 16  ;;  %vm10038_vm5 = vsmask.f32 7424  ;;  %v10040_v58 = vmov 0  ;;  %vm10046_vm2 = vnez %v9998_v12 }
 0x21c   : > { %v10031_v40 = vsel %vm7438_vm9, 4294967295, %v10030_v40  ;;  %vm10033_vm0 = vmand %vm7351_vm15, %vm7355_vm14  ;;  %v10037_v41 = vsel %vm7455_vm6, 4294967295, %v10036_v41  ;;  %v7464_v17 = vsel %vm10038_vm5, %v1535_v32, %v1539_v33  ;;  %vm7475_vm15 = vcmp.ge.s32.totalorder %v915_v35, 1 }
 0x21d   : > { %10032 = vst [vmem:[#allocation31_spill] sm:$0xff] %v10031_v40  ;;  %vm7451_vm7 = vmand %vm10033_vm0, %vm7402_vm10  ;;  %vm7479_vm14 = vcmp.le.s32.totalorder %v915_v35, 16  ;;  %v958_v32 = vshra.s32 %v7395_v28, 5  ;;  %v7494_v25 = vpack.c.bf16 %v1290_v48, %v1289_v38  ;;  %2411 = vmatprep.mubr.bf16.mxu1 %v7464_v17  ;;  %2718 = vmatmul.mubr.bf16.gmra.mrb[112].mxu0 %v7464_v17  ;;  %v7499_v20 = vadd.s32 %v6023_v2, %v832_v34  ;;  %v734_v34 = vpop.f32.mrb[50].mxu0 }
 0x21e   : > { %v10035_v10 = vsel %vm7451_vm7, 4294967295, %v10034_v10  ;;  %10039 = vst [vmem:[#allocation32_spill] sm:$0xff] %v7464_v17  ;;  %vm7471_vm3 = vmand %vm1082_vm4, %vm1124_vm1  ;;  %vm10048_vm4 = vnez %v10004_v51  ;;  %vm10049_vm1 = vnez %v10000_v16  ;;  %4167 = vmatmul.mubr.msk.bf16.gmra.mrb[36].mxu1 %vm7438_vm9, %v7247_v56  ;;  %vm7510_vm0 = vcmp.ge.s32.totalorder %v916_v14, 1  ;;  %v4939_v17 = vpop.f32.mrb[51].mxu0 }
 0x21f   : > { %v10041_v58 = vsel %vm7471_vm3, 4294967295, %v10040_v58  ;;  %vm10047_vm13 = vmand %vm7326_vm11, %vm10046_vm2  ;;  %10051 = vst [vmem:[#allocation33_spill] sm:$0xff] %v7494_v25  ;;  %vm7514_vm5 = vcmp.le.s32.totalorder %v916_v14, 16  ;;  %v732_v5 = vadd.f32 %v7292_v19, %v731_v49  ;;  %v735_v11 = vadd.f32 %v7292_v19, %v734_v34 }
 0x220   : > { %v1415_v27 = vsel %vm10047_vm13, %v1289_v38, 0.0  ;;  %vm10050_vm12 = vmand %vm10048_vm4, %vm10049_vm1  ;;  %v917_v38 = vand.u32 31, %v7461_v29  ;;  %vm1126_vm9 = vcmp.ge.s32.totalorder %v958_v32, 1  ;;  %vm10059_vm1 = vcmask 1046528  }
 0x221   : > { %v1416_v18 = vsel %vm10050_vm12, %v1290_v48, 0.0  ;;  %vm7523_vm12 = vcmp.ge.s32.totalorder %v957_v54, 1  ;;  %v1541_v48 = vshrl.u32 %v7377_v45, 16  ;;  %v1291_v49 = vmax.f32 %v732_v5, 0.0  ;;  %vm1084_vm13 = vmand %vm7510_vm0, %vm7514_vm5 }
 0x222   : > { %v7501_v28 = vpack.c.bf16 %v1416_v18, %v1415_v27  ;;  %v833_v18 = vadd.s32 240, %v6019_v1  ;;  %v918_v45 = vand.u32 31, %v7499_v20  ;;  %vm10060_vm10 = vnez %v9960_v26 }
 0x223   : > { %v1543_v56 = vor.u32 %v1541_v48, %v1539_v33  ;;  %vm10061_vm4 = vnez %v9947_v30  ;;  %vm10063_vm11 = vnez %v9966_v24  ;;  %vm10064_vm6 = vnez %v9962_v47 }
 0x224   : > { %v1644_v14 = vrot.slane %v7501_v28, 1  ;;  %v1545_v27 = vshll.u32 %v7501_v28, 16  ;;  %vm10062_vm2 = vmand %vm10060_vm10, %vm10061_vm4  ;;  %v10066_v17 = vmov 0  ;;  %v834_v5 = vadd.s32 248, %v6019_v1 }
 0x225   : > { %vm10065_vm3 = vmand %vm10063_vm11, %vm10064_vm6  ;;  %v10070_v33 = vmov 0  ;;  %vm7572_vm11 = vcmp.le.s32.totalorder %v957_v54, 16  ;;  %v10072_v30 = vmov 0  ;;  %vm7576_vm6 = vcmp.le.s32.totalorder %v958_v32, 16 }
 0x226   : > { %v7543_v40 = vsel %vm10059_vm1, %v1642_v6, %v1644_v14  ;;  %v1547_v22 = vrot.slane %v1545_v27, 1  ;;  %vm7555_vm8 = vmpackc.low %vm10065_vm3, %vm10062_vm2  ;;  %v1292_v6 = vmax.f32 %v735_v11, 0.0  ;;  %v10073_v30 = vsel %vm7572_vm11, 4294967295, %v10072_v30 }
 0x227   : > { %v10067_v17 = vsel %vm7555_vm8, 4294967295, %v10066_v17  ;;  %2725 = vmatprep.mubr.bf16.mxu0 %v7543_v40  ;;  %vm10069_vm4 = vmand %vm7475_vm15, %vm7479_vm14  ;;  %v10074_v26 = vmov 0  ;;  %v959_v47 = vshra.s32 %v7461_v29, 5  ;;  %vm10076_vm3 = vsmask.f32 7424 }
 0x228   : > { %10068 = vst [vmem:[#allocation34_spill] sm:$0xff] %v10067_v17  ;;  %vm7568_vm1 = vmand %vm10069_vm4, %vm7523_vm12  ;;  %v10075_v26 = vsel %vm7576_vm6, 4294967295, %v10074_v26  ;;  %v7582_v24 = vsel %vm10076_vm3, %v1543_v56, %v1547_v22  ;;  %v10078_v4 = vmov 0  ;;  %vm7593_vm14 = vcmp.ge.s32.totalorder %v917_v38, 1 }
 0x229   : > { %v10071_v33 = vsel %vm7568_vm1, 4294967295, %v10070_v33  ;;  %10077 = vst [vmem:[#allocation35_spill] sm:$0xff] %v7582_v24  ;;  %vm7589_vm15 = vmand %vm1084_vm13, %vm1126_vm9  ;;  %vm7597_vm2 = vcmp.le.s32.totalorder %v917_v38, 16  ;;  %v7602_v56 = vadd.s32 %v6023_v2, %v833_v18  ;;  %vm10084_vm10 = vnez %v10022_v8  ;;  %2419 = vmatprep.mubr.bf16.mxu1 %v7582_v24  ;;  %2726 = vmatmul.mubr.bf16.gmra.mrb[116].mxu0 %v7582_v24  ;;  %v739_v38 = vpop.f32.mrb[52].mxu0 }
 0x22a   : > { %v10079_v4 = vsel %vm7589_vm15, 4294967295, %v10078_v4  ;;  %vm10085_vm0 = vmand %vm7451_vm7, %vm10084_vm10  ;;  %vm10086_vm9 = vnez %v10041_v58  ;;  %vm10087_vm5 = vnez %v10037_v41  ;;  %v7614_v36 = vpack.c.bf16 %v1292_v6, %v1291_v49  ;;  %4170 = vmatmul.mubr.msk.bf16.gmra.mrb[40].mxu1 %vm7555_vm8, %v7372_v63  ;;  %v4942_v18 = vpop.f32.mrb[53].mxu0 }
 0x22b   : > { %v1417_v29 = vsel %vm10085_vm0, %v1291_v49, 0.0  ;;  %vm10088_vm13 = vmand %vm10086_vm9, %vm10087_vm5  ;;  %v960_v57 = vshra.s32 %v7499_v20, 5  ;;  %vm7628_vm4 = vcmp.ge.s32.totalorder %v918_v45, 1  ;;  %vm7632_vm3 = vcmp.le.s32.totalorder %v918_v45, 16 }
 0x22c   : > { %v1418_v32 = vsel %vm10088_vm13, %v1292_v6, 0.0  ;;  %10089 = vst [vmem:[#allocation36_spill] sm:$0xff] %v7614_v36  ;;  %v7637_v20 = vadd.s32 %v6023_v2, %v834_v5  ;;  %v740_v27 = vadd.f32 %v7292_v19, %v739_v38  ;;  %vm7644_vm13 = vcmp.ge.s32.totalorder %v959_v47, 1  ;;  %v742_v5 = vpop.f32.mrb[54].mxu0  ;;  %vm1086_vm8 = vmand %vm7628_vm4, %vm7632_vm3 }
 0x22d   : > { %v7619_v35 = vpack.c.bf16 %v1418_v32, %v1417_v29  ;;  %vm7648_vm12 = vcmp.le.s32.totalorder %v959_v47, 16  ;;  %v10096_v11 = vmov 0  ;;  %v835_v45 = vadd.s32 256, %v6019_v1  ;;  %v4943_v24 = vpop.f32.mrb[55].mxu0 }
 0x22e   : > { %v10097_v11 = vsel %vm7648_vm12, 4294967295, %v10096_v11  ;;  %v1549_v29 = vshrl.u32 %v7501_v28, 16  ;;  %v919_v38 = vand.u32 31, %v7602_v56  ;;  %v1293_v47 = vmax.f32 %v740_v27, 0.0 }
 0x22f   : > { %v1646_v6 = vrot.slane %v7619_v35, 1  ;;  %v1553_v32 = vshll.u32 %v7619_v35, 16  ;;  %v743_v18 = vadd.f32 %v7292_v19, %v742_v5  ;;  %vm1128_vm5 = vcmp.ge.s32.totalorder %v960_v57, 1 }
 0x230   : > { %v836_v28 = vadd.s32 264, %v6019_v1  ;;  %vm10098_vm9 = vcmask 1046528   ;;  %v1551_v63 = vor.u32 %v1549_v29, %v1547_v22  ;;  %vm10100_vm0 = vnez %v9996_v9 }
 0x231   : > { %v7668_v17 = vsel %vm10098_vm9, %v1644_v14, %v1646_v6  ;;  %v1555_v62 = vrot.slane %v1553_v32, 1  ;;  %vm10101_vm10 = vnez %v9998_v12  ;;  %vm10103_vm12 = vnez %v10004_v51 }
 0x232   : > { %10099 = vst [vmem:[#allocation37_spill] sm:$0xff] %v7668_v17  ;;  %vm10102_vm7 = vmand %vm10100_vm0, %vm10101_vm10  ;;  %vm10104_vm6 = vnez %v10000_v16  ;;  %v10106_v24 = vmov 0  ;;  %v920_v27 = vand.u32 31, %v7637_v20  ;;  %v1294_v14 = vmax.f32 %v743_v18, 0.0  ;;  %2733 = vmatprep.mubr.bf16.mxu0 %v7668_v17 }
 0x233   : > { %vm10105_vm15 = vmand %vm10103_vm12, %vm10104_vm6  ;;  %v10110_v22 = vmov 0  ;;  %v10112_v9 = vmov 0  ;;  %v961_v12 = vshra.s32 %v7602_v56, 5  ;;  %v7703_v16 = vadd.s32 %v6023_v2, %v835_v45  ;;  %v747_v45 = vpop.f32.mrb[56].mxu0 }
 0x234   : > { %vm7680_vm11 = vmpackc.low %vm10105_vm15, %vm10102_vm7  ;;  %vm7697_vm7 = vcmp.le.s32.totalorder %v960_v57, 16  ;;  %vm10114_vm6 = vsmask.f32 7424  ;;  %v10116_v54 = vmov 0  ;;  %vm10122_vm12 = vnez %v10073_v30 }
 0x235   : > { %v10107_v24 = vsel %vm7680_vm11, 4294967295, %v10106_v24  ;;  %vm10109_vm10 = vmand %vm7593_vm14, %vm7597_vm2  ;;  %v10113_v9 = vsel %vm7697_vm7, 4294967295, %v10112_v9  ;;  %v7706_v51 = vsel %vm10114_vm6, %v1551_v63, %v1555_v62  ;;  %vm7717_vm14 = vcmp.ge.s32.totalorder %v919_v38, 1 }
 0x236   : > { %10108 = vst [vmem:[#allocation38_spill] sm:$0xff] %v10107_v24  ;;  %vm7693_vm9 = vmand %vm10109_vm10, %vm7644_vm13  ;;  %vm7721_vm2 = vcmp.le.s32.totalorder %v919_v38, 16  ;;  %v962_v63 = vshra.s32 %v7637_v20, 5  ;;  %v7736_v48 = vpack.c.bf16 %v1294_v14, %v1293_v47  ;;  %2427 = vmatprep.mubr.bf16.mxu1 %v7706_v51  ;;  %2734 = vmatmul.mubr.bf16.gmra.mrb[120].mxu0 %v7706_v51  ;;  %v7741_v20 = vadd.s32 %v6023_v2, %v836_v28  ;;  %v4946_v38 = vpop.f32.mrb[57].mxu0 }
 0x237   : > { %v10111_v22 = vsel %vm7693_vm9, 4294967295, %v10110_v22  ;;  %10115 = vst [vmem:[#allocation39_spill] sm:$0xff] %v7706_v51  ;;  %vm7713_vm15 = vmand %vm1086_vm8, %vm1128_vm5  ;;  %vm10124_vm8 = vnez %v10079_v4  ;;  %vm10125_vm5 = vnez %v10075_v26  ;;  %4173 = vmatmul.mubr.msk.bf16.gmra.mrb[44].mxu1 %vm7680_vm11, %v7494_v25  ;;  %vm7752_vm10 = vcmp.ge.s32.totalorder %v920_v27, 1  ;;  %v750_v28 = vpop.f32.mrb[58].mxu0 }
 0x238   : > { %v10117_v54 = vsel %vm7713_vm15, 4294967295, %v10116_v54  ;;  %vm10123_vm0 = vmand %vm7568_vm1, %vm10122_vm12  ;;  %vm7756_vm6 = vcmp.le.s32.totalorder %v920_v27, 16  ;;  %v748_v32 = vadd.f32 %v7292_v19, %v747_v45  ;;  %v921_v18 = vand.u32 31, %v7703_v16  ;;  %v4947_v51 = vpop.f32.mrb[59].mxu0 }
 0x239   : > { %v1419_v57 = vsel %vm10123_vm0, %v1293_v47, 0.0  ;;  %vm10126_vm4 = vmand %vm10124_vm8, %vm10125_vm5  ;;  %v751_v38 = vadd.f32 %v7292_v19, %v750_v28  ;;  %vm1130_vm11 = vcmp.ge.s32.totalorder %v962_v63, 1  ;;  %vm10134_vm5 = vcmask 1046528  }
 0x23a   : > { %v1420_v34 = vsel %vm10126_vm4, %v1294_v14, 0.0  ;;  %vm7765_vm4 = vcmp.ge.s32.totalorder %v961_v12, 1  ;;  %v1557_v14 = vshrl.u32 %v7619_v35, 16  ;;  %v1295_v45 = vmax.f32 %v748_v32, 0.0  ;;  %vm1088_vm0 = vmand %vm7752_vm10, %vm7756_vm6 }
 0x23b   : > { %v7743_v49 = vpack.c.bf16 %v1420_v34, %v1419_v57  ;;  %v837_v34 = vadd.s32 272, %v6019_v1  ;;  %v922_v35 = vand.u32 31, %v7741_v20  ;;  %vm10135_vm13 = vnez %v10035_v10 }
 0x23c   : > { %v1559_v25 = vor.u32 %v1557_v14, %v1555_v62  ;;  %vm10136_vm8 = vnez %v10022_v8  ;;  %vm10138_vm1 = vnez %v10041_v58  ;;  %vm10139_vm7 = vnez %v10037_v41 }
 0x23d   : > { %v1648_v27 = vrot.slane %v7743_v49, 1  ;;  %v1561_v57 = vshll.u32 %v7743_v49, 16  ;;  %vm10137_vm12 = vmand %vm10135_vm13, %vm10136_vm8  ;;  %v10141_v51 = vmov 0  ;;  %v838_v32 = vadd.s32 280, %v6019_v1 }
 0x23e   : > { %vm10140_vm15 = vmand %vm10138_vm1, %vm10139_vm7  ;;  %v10145_v62 = vmov 0  ;;  %vm7814_vm1 = vcmp.le.s32.totalorder %v961_v12, 16  ;;  %v10147_v8 = vmov 0  ;;  %vm7818_vm7 = vcmp.le.s32.totalorder %v962_v63, 16 }
 0x23f   : > { %v7785_v24 = vsel %vm10134_vm5, %v1646_v6, %v1648_v27  ;;  %v1563_v17 = vrot.slane %v1561_v57, 1  ;;  %vm7797_vm3 = vmpackc.low %vm10140_vm15, %vm10137_vm12  ;;  %v1296_v6 = vmax.f32 %v751_v38, 0.0  ;;  %v10148_v8 = vsel %vm7814_vm1, 4294967295, %v10147_v8 }
 0x240   : > { %v10142_v51 = vsel %vm7797_vm3, 4294967295, %v10141_v51  ;;  %2741 = vmatprep.mubr.bf16.mxu0 %v7785_v24  ;;  %vm10144_vm8 = vmand %vm7717_vm14, %vm7721_vm2  ;;  %v10149_v10 = vmov 0  ;;  %v963_v41 = vshra.s32 %v7703_v16, 5  ;;  %vm10151_vm15 = vsmask.f32 7424 }
 0x241   : > { %10143 = vst [vmem:[#allocation40_spill] sm:$0xff] %v10142_v51  ;;  %vm7810_vm5 = vmand %vm10144_vm8, %vm7765_vm4  ;;  %v10150_v10 = vsel %vm7818_vm7, 4294967295, %v10149_v10  ;;  %v7824_v58 = vsel %vm10151_vm15, %v1559_v25, %v1563_v17  ;;  %v10153_v0 = vmov 0  ;;  %vm7835_vm2 = vcmp.ge.s32.totalorder %v921_v18, 1 }
 0x242   : > { %v10146_v62 = vsel %vm7810_vm5, 4294967295, %v10145_v62  ;;  %10152 = vst [vmem:[#allocation41_spill] sm:$0xff] %v7824_v58  ;;  %vm7831_vm14 = vmand %vm1088_vm0, %vm1130_vm11  ;;  %vm7839_vm12 = vcmp.le.s32.totalorder %v921_v18, 16  ;;  %v7844_v25 = vadd.s32 %v6023_v2, %v837_v34  ;;  %vm10159_vm13 = vnez %v10097_v11  ;;  %2435 = vmatprep.mubr.bf16.mxu1 %v7824_v58  ;;  %2742 = vmatmul.mubr.bf16.gmra.mrb[124].mxu0 %v7824_v58  ;;  %v755_v18 = vpop.f32.mrb[60].mxu0 }
 0x243   : > { %v10154_v0 = vsel %vm7831_vm14, 4294967295, %v10153_v0  ;;  %vm10160_vm10 = vmand %vm7693_vm9, %vm10159_vm13  ;;  %vm10161_vm11 = vnez %v10117_v54  ;;  %vm10162_vm6 = vnez %v10113_v9  ;;  %v7856_v5 = vpack.c.bf16 %v1296_v6, %v1295_v45  ;;  %4176 = vmatmul.mubr.msk.bf16.gmra.mrb[48].mxu1 %vm7797_vm3, %v7614_v36  ;;  %v4950_v34 = vpop.f32.mrb[61].mxu0 }
 0x244   : > { %v1421_v16 = vsel %vm10160_vm10, %v1295_v45, 0.0  ;;  %vm10163_vm0 = vmand %vm10161_vm11, %vm10162_vm6  ;;  %v964_v29 = vshra.s32 %v7741_v20, 5  ;;  %vm7870_vm8 = vcmp.ge.s32.totalorder %v922_v35, 1  ;;  %vm7874_vm15 = vcmp.le.s32.totalorder %v922_v35, 16  ;;  %v758_v35 = vpop.f32.mrb[62].mxu0 }
 0x245   : > { %v1422_v63 = vsel %vm10163_vm0, %v1296_v6, 0.0  ;;  %v7879_v20 = vadd.s32 %v6023_v2, %v838_v32  ;;  %v756_v57 = vadd.f32 %v7292_v19, %v755_v18  ;;  %vm7886_vm0 = vcmp.ge.s32.totalorder %v963_v41, 1  ;;  %v4951_v34 = vpop.f32.mrb[63].mxu0  ;;  %vm1090_vm3 = vmand %vm7870_vm8, %vm7874_vm15 }
 0x246   : > { %v7861_v47 = vpack.c.bf16 %v1422_v63, %v1421_v16  ;;  %vm7890_vm4 = vcmp.le.s32.totalorder %v963_v41, 16  ;;  %v10170_v38 = vmov 0  ;;  %v1565_v6 = vshrl.u32 %v7743_v49, 16 }
 0x247   : > { %v10171_v38 = vsel %vm7890_vm4, 4294967295, %v10170_v38  ;;  %v923_v63 = vand.u32 31, %v7844_v25  ;;  %v1297_v18 = vmax.f32 %v756_v57, 0.0  ;;  %v759_v41 = vadd.f32 %v7292_v19, %v758_v35 }
 0x248   : > { %v1650_v32 = vrot.slane %v7861_v47, 1  ;;  %v1569_v16 = vshll.u32 %v7861_v47, 16  ;;  %vm1132_vm6 = vcmp.ge.s32.totalorder %v964_v29, 1  ;;  %v839_v49 = vadd.s32 288, %v6019_v1 }
 0x249   : > { %vm10172_vm11 = vcmask 1046528   ;;  %v1567_v51 = vor.u32 %v1565_v6, %v1563_v17  ;;  %vm10173_vm10 = vnez %v10071_v33  ;;  %vm10174_vm13 = vnez %v10073_v30  ;;  %v763_v6 = vpop.f32.mrb[64].mxu0 }
 0x24a   : > { %v7909_v58 = vsel %vm10172_vm11, %v1648_v27, %v1650_v32  ;;  %v1571_v36 = vrot.slane %v1569_v16, 1  ;;  %vm10175_vm9 = vmand %vm10173_vm10, %vm10174_vm13  ;;  %vm10176_vm4 = vnez %v10079_v4  ;;  %vm10177_vm7 = vnez %v10075_v26 }
 0x24b   : > { %vm10178_vm14 = vmand %vm10176_vm4, %vm10177_vm7  ;;  %v10179_v57 = vmov 0  ;;  %v924_v35 = vand.u32 31, %v7879_v20  ;;  %v1298_v27 = vmax.f32 %v759_v41, 0.0  ;;  %2749 = vmatprep.mubr.bf16.mxu0 %v7909_v58  ;;  %v10185_v33 = vmov 0  ;;  %v4954_v41 = vpop.f32.mrb[65].mxu0 }
 0x24c   : > { %vm7921_vm1 = vmpackc.low %vm10178_vm14, %vm10175_vm9  ;;  %vm7938_vm9 = vcmp.le.s32.totalorder %v964_v29, 16  ;;  %v965_v30 = vshra.s32 %v7844_v25, 5  ;;  %v840_v26 = vadd.s32 296, %v6019_v1  ;;  %vm10187_vm7 = vsmask.f32 7424 }
 0x24d   : > { %v10180_v57 = vsel %vm7921_vm1, 4294967295, %v10179_v57  ;;  %vm10182_vm13 = vmand %vm7835_vm2, %vm7839_vm12  ;;  %v10186_v33 = vsel %vm7938_vm9, 4294967295, %v10185_v33  ;;  %v7945_v4 = vsel %vm10187_vm7, %v1567_v51, %v1571_v36  ;;  %v10189_v12 = vmov 0 }
 0x24e   : > { %10181 = vst [vmem:[#allocation42_spill] sm:$0xff] %v10180_v57  ;;  %vm7934_vm11 = vmand %vm10182_vm13, %vm7886_vm0  ;;  %vm7956_vm2 = vcmp.ge.s32.totalorder %v923_v63, 1  ;;  %vm7960_vm12 = vcmp.le.s32.totalorder %v923_v63, 16  ;;  %v966_v51 = vshra.s32 %v7879_v20, 5  ;;  %vm10195_vm4 = vnez %v10148_v8  ;;  %2443 = vmatprep.mubr.bf16.mxu1 %v7945_v4  ;;  %2750 = vmatmul.mubr.bf16.gmra.mrb[128].mxu0 %v7945_v4 }
 0x24f   : > { %10188 = vst [vmem:[#allocation43_spill] sm:$0xff] %v7945_v4  ;;  %vm7952_vm14 = vmand %vm1090_vm3, %vm1132_vm6  ;;  %vm10197_vm3 = vnez %v10154_v0  ;;  %vm10198_vm6 = vnez %v10150_v10  ;;  %v7975_v14 = vpack.c.bf16 %v1298_v27, %v1297_v18  ;;  %v7980_v20 = vadd.s32 %v6023_v2, %v839_v49  ;;  %4179 = vmatmul.mubr.msk.bf16.gmra.mrb[52].mxu1 %vm7921_vm1, %v7736_v48  ;;  %v766_v49 = vpop.f32.mrb[66].mxu0 }
 0x250   : > { %v10190_v12 = vsel %vm7952_vm14, 4294967295, %v10189_v12  ;;  %vm10196_vm10 = vmand %vm7810_vm5, %vm10195_vm4  ;;  %vm7991_vm13 = vcmp.ge.s32.totalorder %v924_v35, 1  ;;  %vm7995_vm7 = vcmp.le.s32.totalorder %v924_v35, 16  ;;  %v8005_v34 = vadd.s32 %v6023_v2, %v840_v26  ;;  %v4955_v41 = vpop.f32.mrb[67].mxu0 }
 0x251   : > { %v1423_v29 = vsel %vm10196_vm10, %v1297_v18, 0.0  ;;  %vm10199_vm8 = vmand %vm10197_vm3, %vm10198_vm6  ;;  %v764_v18 = vadd.f32 %v7292_v19, %v763_v6  ;;  %vm1133_vm0 = vcmp.ge.s32.totalorder %v965_v30, 1  ;;  %v767_v6 = vadd.f32 %v7292_v19, %v766_v49 }
 0x252   : > { %v1424_v28 = vsel %vm10199_vm8, %v1298_v27, 0.0  ;;  %vm1092_vm10 = vmand %vm7991_vm13, %vm7995_vm7  ;;  %vm1134_vm1 = vcmp.ge.s32.totalorder %v966_v51, 1  ;;  %vm10205_vm6 = vcmask 1046528   ;;  %vm10206_vm8 = vnez %v10111_v22 }
 0x253   : > { %v7982_v45 = vpack.c.bf16 %v1424_v28, %v1423_v29  ;;  %v1573_v29 = vshrl.u32 %v7861_v47, 16  ;;  %v1299_v28 = vmax.f32 %v764_v18, 0.0  ;;  %v925_v47 = vand.u32 31, %v7980_v20 }
 0x254   : > { %vm10207_vm3 = vnez %v10097_v11  ;;  %vm10209_vm5 = vnez %v10117_v54  ;;  %vm10210_vm9 = vnez %v10113_v9  ;;  %v10212_v18 = vmov 0 }
 0x255   : > { %v1652_v27 = vrot.slane %v7982_v45, 1  ;;  %v1577_v35 = vshll.u32 %v7982_v45, 16  ;;  %v1575_v4 = vor.u32 %v1573_v29, %v1571_v36  ;;  %vm10208_vm4 = vmand %vm10206_vm8, %vm10207_vm3  ;;  %v841_v49 = vadd.s32 304, %v6019_v1 }
 0x256   : > { %vm10211_vm14 = vmand %vm10209_vm5, %vm10210_vm9  ;;  %v926_v11 = vand.u32 31, %v8005_v34  ;;  %v842_v22 = vadd.s32 312, %v6019_v1  ;;  %vm10217_vm5 = vsmask.f32 7424  ;;  %vm8053_vm9 = vcmp.le.s32.totalorder %v965_v30, 16 }
 0x257   : > { %v8021_v26 = vsel %vm10205_vm6, %v1650_v32, %v1652_v27  ;;  %v1579_v57 = vrot.slane %v1577_v35, 1  ;;  %vm8033_vm15 = vmpackc.low %vm10211_vm14, %vm10208_vm4  ;;  %v1300_v32 = vmax.f32 %v767_v6, 0.0  ;;  %v10221_v56 = vmov 0  ;;  %v771_v35 = vpop.f32.mrb[68].mxu0 }
 0x258   : > { %v10213_v18 = vsel %vm8033_vm15, 4294967295, %v10212_v18  ;;  %2757 = vmatprep.mubr.bf16.mxu0 %v8021_v26  ;;  %vm10214_vm6 = vmand %vm7956_vm2, %vm7960_vm12  ;;  %vm8066_vm2 = vcmp.le.s32.totalorder %v966_v51, 16  ;;  %v10223_v25 = vmov 0  ;;  %vm10225_vm12 = vnez %v10171_v38 }
 0x259   : > { %vm8044_vm3 = vmand %vm10214_vm6, %vm1133_vm0  ;;  %v8051_v9 = vsel %vm10217_vm5, %v1575_v4, %v1579_v57  ;;  %v10224_v25 = vsel %vm8066_vm2, 4294967295, %v10223_v25  ;;  %v967_v4 = vshra.s32 %v7980_v20, 5  ;;  %vm10227_vm0 = vnez %v10190_v12 }
 0x25a   : > { %10218 = vst [vmem:[#allocation44_spill] sm:$0xff] %v8051_v9  ;;  %vm8062_vm14 = vmand %vm1092_vm10, %vm1134_vm1  ;;  %vm10228_vm13 = vnez %v10186_v33  ;;  %v8081_v63 = vpack.c.bf16 %v1300_v32, %v1299_v28  ;;  %2451 = vmatprep.mubr.bf16.mxu1 %v8051_v9  ;;  %2758 = vmatmul.mubr.bf16.gmra.mrb[132].mxu0 %v8051_v9  ;;  %v968_v51 = vshra.s32 %v8005_v34, 5  ;;  %v10232_v20 = vmov 0  ;;  %v4958_v34 = vpop.f32.mrb[69].mxu0 }
 0x25b   : > { %v10222_v56 = vsel %vm8062_vm14, 4294967295, %v10221_v56  ;;  %vm10226_vm4 = vmand %vm7934_vm11, %vm10225_vm12  ;;  %4182 = vmatmul.mubr.msk.bf16.gmra.mrb[56].mxu1 %vm8033_vm15, %v7856_v5  ;;  %vm8105_vm6 = vcmp.ge.s32.totalorder %v925_v47, 1  ;;  %vm8109_vm11 = vcmp.le.s32.totalorder %v925_v47, 16  ;;  %v8114_v33 = vadd.s32 %v6023_v2, %v841_v49  ;;  %v774_v41 = vpop.f32.mrb[70].mxu0 }
 0x25c   : > { %v1425_v30 = vsel %vm10226_vm4, %v1299_v28, 0.0  ;;  %vm10229_vm1 = vmand %vm10227_vm0, %vm10228_vm13  ;;  %v772_v12 = vadd.f32 %v7292_v19, %v771_v35  ;;  %vm8121_vm12 = vcmp.ge.s32.totalorder %v926_v11, 1  ;;  %v8126_v6 = vadd.s32 %v6023_v2, %v842_v22  ;;  %v4959_v35 = vpop.f32.mrb[71].mxu0 }
 0x25d   : > { %v1426_v16 = vsel %vm10229_vm1, %v1300_v32, 0.0  ;;  %vm10230_vm7 = vmmov %vm10226_vm4  ;;  %v1581_v49 = vshrl.u32 %v7982_v45, 16  ;;  %vm8135_vm0 = vcmp.le.s32.totalorder %v926_v11, 16  ;;  %v775_v22 = vadd.f32 %v7292_v19, %v774_v41 }
 0x25e   : > { %vm10231_vm10 = vmmov %vm10229_vm1  ;;  %v8100_v29 = vpack.c.bf16 %v1426_v16, %v1425_v30  ;;  %v1301_v16 = vmax.f32 %v772_v12, 0.0  ;;  %vm1135_vm1 = vcmp.ge.s32.totalorder %v967_v4, 1  ;;  %vm10245_vm4 = vnez %v10146_v62 }
 0x25f   : > { %vm8096_vm8 = vmpackc.low %vm10231_vm10, %vm10230_vm7  ;;  %vm8144_vm7 = vcmp.ge.s32.totalorder %v968_v51, 1  ;;  %vm10244_vm10 = vcmask 1046528   ;;  %v1583_v11 = vor.u32 %v1581_v49, %v1579_v57  ;;  %vm10246_vm5 = vnez %v10148_v8 }
 0x260   : > { %v10233_v20 = vsel %vm8096_vm8, 4294967295, %v10232_v20  ;;  %v1654_v47 = vrot.slane %v8100_v29, 1  ;;  %v1585_v32 = vshll.u32 %v8100_v29, 16  ;;  %vm10247_vm8 = vmand %vm10245_vm4, %vm10246_vm5  ;;  %vm10248_vm15 = vnez %v10154_v0 }
 0x261   : > { %vm10249_vm2 = vnez %v10150_v10  ;;  %v927_v41 = vand.u32 31, %v8114_v33  ;;  %v1302_v57 = vmax.f32 %v775_v22, 0.0  ;;  %v928_v8 = vand.u32 31, %v8126_v6 }
 0x262   : > { %v8149_v45 = vsel %vm10244_vm10, %v1652_v27, %v1654_v47  ;;  %v1587_v9 = vrot.slane %v1585_v32, 1  ;;  %vm10250_vm13 = vmand %vm10248_vm15, %vm10249_vm2  ;;  %v843_v10 = vadd.s32 320, %v6019_v1  ;;  %vm10254_vm2 = vsmask.f32 7424 }
 0x263   : > { %vm8161_vm14 = vmpackc.low %vm10250_vm13, %vm10247_vm8  ;;  %2765 = vmatprep.mubr.bf16.mxu0 %v8149_v45  ;;  %v10256_v27 = vmov 0  ;;  %vm8190_vm4 = vcmp.le.s32.totalorder %v967_v4, 16  ;;  %v10259_v49 = vmov 0  ;;  %vm10262_vm13 = vnez %v10222_v56 }
 0x264   : > { %vm10253_vm10 = vmand %vm8044_vm3, %vm8053_vm9  ;;  %v8179_v0 = vsel %vm10254_vm2, %v1583_v11, %v1587_v9  ;;  %v10260_v49 = vsel %vm8190_vm4, 4294967295, %v10259_v49  ;;  %v8199_v22 = vpack.c.bf16 %v1302_v57, %v1301_v16  ;;  %v10265_v17 = vmov 0 }
 0x265   : > { %v1427_v62 = vsel %vm10253_vm10, %v1301_v16, 0.0  ;;  %vm10255_vm8 = vmand %vm8105_vm6, %vm8109_vm11  ;;  %10261 = vst [vmem:[#allocation46_spill] sm:$0xff] %v10260_v49  ;;  %vm10263_vm10 = vnez %v10224_v25  ;;  %2459 = vmatprep.mubr.bf16.mxu1 %v8179_v0  ;;  %2766 = vmatmul.mubr.bf16.gmra.mrb[136].mxu0 %v8179_v0  ;;  %vm8203_vm6 = vcmp.le.s32.totalorder %v968_v51, 16  ;;  %v844_v4 = vadd.s32 328, %v6019_v1  ;;  %v779_v16 = vpop.f32.mrb[72].mxu0 }
 0x266   : > { %vm8186_vm5 = vmand %vm10255_vm8, %vm1135_vm1  ;;  %v10266_v17 = vsel %vm8203_vm6, 4294967295, %v10265_v17  ;;  %4185 = vmatmul.mubr.msk.bf16.gmra.mrb[60].mxu1 %vm8161_vm14, %v7975_v14  ;;  %v10273_v1 = vmov 0  ;;  %v969_v36 = vshra.s32 %v8114_v33, 5  ;;  %vm8239_vm2 = vcmp.ge.s32.totalorder %v927_v41, 1  ;;  %v4962_v28 = vpop.f32.mrb[73].mxu0 }
 0x267   : > { %v10257_v27 = vsel %vm8186_vm5, 4294967295, %v10256_v27  ;;  %vm10264_vm15 = vmand %vm10262_vm13, %vm10263_vm10  ;;  %10267 = vst [vmem:[#allocation47_spill] sm:$0xff] %v10266_v17  ;;  %vm8243_vm8 = vcmp.le.s32.totalorder %v927_v41, 16  ;;  %v780_v25 = vadd.f32 %v7292_v19, %v779_v16  ;;  %v970_v30 = vshra.s32 %v8126_v6, 5  ;;  %v782_v34 = vpop.f32.mrb[74].mxu0  ;;  %v5313_v28 = vld [vmem:[#allocation7 + $0x1c8] sm:$0xff]  }
 0x268   : > { %10258 = vst [vmem:[#allocation45_spill] sm:$0xff] %v10257_v27  ;;  %v1428_v32 = vsel %vm10264_vm15, %v1302_v57, 0.0  ;;  %vm10268_vm11 = vmand %vm8044_vm3, %vm8053_vm9  ;;  %v8257_v33 = vadd.s32 %v6023_v2, %v843_v10  ;;  %vm8266_vm13 = vcmp.le.s32.totalorder %v928_v8, 16  ;;  %v4963_v57 = vpop.f32.mrb[75].mxu0  ;;  %v8276_v10 = vadd.s32 %v6023_v2, %v844_v4  ;;  %v5309_v2 = vld [vmem:[#allocation7 + $0x180] sm:$0xff]  }
 0x269   : > { %vm10269_vm1 = vmmov %vm10264_vm15  ;;  %v8222_v51 = vpack.c.bf16 %v1428_v32, %v1427_v62  ;;  %v1303_v41 = vmax.f32 %v780_v25, 0.0  ;;  %v783_v62 = vadd.f32 %v7292_v19, %v782_v34  ;;  %v10297_v54 = vmov 0 }
 0x26a   : > { %vm8218_vm15 = vmpackc.low %vm10269_vm1, %vm10268_vm11  ;;  %vm10285_vm11 = vcmask 1046528   ;;  %vm10287_vm1 = vsmask.f32 7424  ;;  %v971_v56 = vshra.s32 %v8257_v33, 5 }
 0x26b   : > { %vm10272_vm3 = vmand %vm8121_vm12, %vm8135_vm0  ;;  %vm10280_vm12 = vnez %v9769_v31  ;;  %vm8252_vm0 = vcmp.ge.s32.totalorder %v928_v8, 1  ;;  %v1692_v11 = vrot.slane %v8222_v51, 1  ;;  %v1672_v31 = vshrl.u32 %v8100_v29, 16 }
 0x26c   : > { %vm8234_vm9 = vmand %vm10272_vm3, %vm8144_vm7  ;;  %4188 = vmatprep.mubr.msk.bf16.mxu1 %vm10280_vm12, %v6359_v13  ;;  %v1676_v13 = vshll.u32 %v8222_v51, 16  ;;  %vm1137_vm3 = vcmp.ge.s32.totalorder %v969_v36, 1  ;;  %v1304_v25 = vmax.f32 %v783_v62, 0.0  ;;  %v1680_v4 = vshrl.u32 %v8222_v51, 16 }
 0x26d   : > { %v10274_v1 = vsel %vm8234_vm9, 4294967295, %v10273_v1  ;;  %vm9573_vm7 = vmand %vm8186_vm5, %vm8190_vm4  ;;  %v8279_v29 = vsel %vm10285_vm11, %v1654_v47, %v1692_v11  ;;  %v1674_v32 = vor.u32 %v1672_v31, %v1587_v9  ;;  %vm1138_vm11 = vcmp.ge.s32.totalorder %v970_v30, 1 }
 0x26e   : > { %10275 = vst [vmem:[#allocation48_spill] sm:$0xff] %v10274_v1  ;;  %vm9574_vm10 = vmand %vm8234_vm9, %vm8203_vm6  ;;  %v1678_v8 = vrot.slane %v1676_v13, 1  ;;  %v1429_v16 = vsel %vm9573_vm7, %v1303_v41, 0.0  ;;  %2773 = vmatprep.mubr.bf16.mxu0 %v8279_v29  ;;  %v929_v9 = vand.u32 31, %v8257_v33  ;;  %v8305_v31 = vpack.c.bf16 %v1304_v25, %v1303_v41  ;;  %2501 = vmatmul.mubr.bf16.vlgmr.msra.gmra.mrb[64].mxu1 %v6382_v23  ;;  %v787_v41 = vpop.f32.mrb[76].mxu0  ;;  %v5314_v23 = vld [vmem:[#allocation7 + $0x188] sm:$0xff]  }
 0x26f   : > { %10286 = vst [vmem:[#allocation49_spill] sm:$0xff] %v8279_v29  ;;  %v1430_v34 = vsel %vm9574_vm10, %v1304_v25, 0.0  ;;  %vm10289_vm7 = vmand %vm8239_vm2, %vm8243_vm8  ;;  %v10290_v13 = vmov 0  ;;  %vm8317_vm12 = vcmp.le.s32.totalorder %v969_v36, 16  ;;  %v10293_v51 = vmov 0  ;;  %4713 = vmatpush3.bf16.msra.mxu1 %v5309_v2  ;;  %v4966_v6 = vpop.f32.mrb[77].mxu0 }
 0x270   : > { %v8297_v47 = vsel %vm10287_vm1, %v1674_v32, %v1678_v8  ;;  %10288 = vst [vmem:[#allocation50_spill] sm:$0xff] %v8305_v31  ;;  %vm8313_vm1 = vmand %vm10289_vm7, %vm1137_vm3  ;;  %v10294_v51 = vsel %vm8317_vm12, 4294967295, %v10293_v51  ;;  %v930_v62 = vand.u32 31, %v8276_v10  ;;  %v8322_v57 = vpack.c.bf16 %v1430_v34, %v1429_v16  ;;  %4714 = vmatprep.subr.bf16.mxu1 %v5313_v28  ;;  %v5318_v32 = vld [vmem:[#allocation7 + $0x198] sm:$0xff]  }
 0x271   : > { %2774 = vmatmul.mubr.bf16.gmra.mrb[140].mxu0 %v8297_v47  ;;  %v10291_v13 = vsel %vm8313_vm1, 4294967295, %v10290_v13  ;;  %10295 = vst [vmem:[#allocation52_spill] sm:$0xff] %v10294_v51  ;;  %vm10296_vm2 = vmand %vm8252_vm0, %vm8266_vm13  ;;  %vm8334_vm7 = vcmp.le.s32.totalorder %v970_v30, 16  ;;  %v10300_v36 = vmov 0  ;;  %vm10303_vm3 = vnez %v9807_v43  ;;  %v5315_v43 = vld [vmem:[#allocation7 + $0x1d0] sm:$0xff]  }
 0x272   : > { %10292 = vst [vmem:[#allocation51_spill] sm:$0xff] %v10291_v13  ;;  %vm8330_vm8 = vmand %vm10296_vm2, %vm1138_vm11  ;;  %v10301_v36 = vsel %vm8334_vm7, 4294967295, %v10300_v36  ;;  %4191 = vmatprep.mubr.msk.bf16.mxu1 %vm10303_vm3, %v6486_v3  ;;  %v788_v35 = vadd.f32 %v7292_v19, %v787_v41  ;;  %vm8343_vm0 = vcmp.ge.s32.totalorder %v929_v9, 1  ;;  %vm8347_vm13 = vcmp.le.s32.totalorder %v929_v9, 16  ;;  %v790_v3 = vpop.f32.mrb[78].mxu0 }
 0x273   : > { %v10298_v54 = vsel %vm8330_vm8, 4294967295, %v10297_v54  ;;  %10302 = vst [vmem:[#allocation54_spill] sm:$0xff] %v10301_v36  ;;  %v9580_v16 = vrot.slane %v8322_v57, 1  ;;  %v1682_v33 = vor.u32 %v1680_v4, %v1678_v8  ;;  %v1684_v25 = vshll.u32 %v8322_v57, 16  ;;  %v4967_v8 = vpop.f32.mrb[79].mxu0  ;;  %4715 = vmatpush3.bf16.msra.mxu1 %v5314_v23  ;;  %vm10314_vm9 = vmand %vm8313_vm1, %vm8317_vm12 }
 0x274   : > { %10299 = vst [vmem:[#allocation53_spill] sm:$0xff] %v10298_v54  ;;  %v972_v2 = vshra.s32 %v8276_v10, 5  ;;  %v1305_v34 = vmax.f32 %v788_v35, 0.0  ;;  %v791_v9 = vadd.f32 %v7292_v19, %v790_v3  ;;  %vm8363_vm3 = vcmp.ge.s32.totalorder %v930_v62, 1  ;;  %4716 = vmatprep.subr.bf16.mxu1 %v5315_v43 }
 0x275   : > { %vm8367_vm10 = vcmp.le.s32.totalorder %v930_v62, 16  ;;  %vm10312_vm11 = vcmask 1046528   ;;  %v8376_v41 = vrot.slane %v1684_v25, 1  ;;  %vm1139_vm6 = vcmp.ge.s32.totalorder %v971_v56, 1  ;;  %v5316_v62 = vld [vmem:[#allocation7 + $0x190] sm:$0xff]   ;;  %v5317_v25 = vld [vmem:[#allocation7 + $0x1d8] sm:$0xff]  }
 0x276   : > { %v8374_v10 = vsel %vm10312_vm11, %v1692_v11, %v9580_v16  ;;  %v1431_v35 = vsel %vm10314_vm9, %v1305_v34, 0.0  ;;  %v1306_v11 = vmax.f32 %v791_v9, 0.0  ;;  %vm10315_vm11 = vsmask.f32 7424  ;;  %vm10318_vm9 = vmand %vm8330_vm8, %vm8334_vm7  ;;  %2509 = vmatmul.mubr.bf16.gmra.mrb[68].mxu1 %v6434_v53  ;;  %v5322_v9 = vld [vmem:[#allocation7 + $0x1a8] sm:$0xff]   ;;  %v8467_v53 = vld [vmem:[#allocation7 + $0x200] sm:$0xff]  }
 0x277   : > { %10313 = vst [vmem:[#allocation55_spill] sm:$0xff] %v8374_v10  ;;  %2781 = vmatprep.mubr.bf16.mxu0 %v8374_v10  ;;  %v8390_v6 = vsel %vm10315_vm11, %v1682_v33, %v8376_v41  ;;  %vm8396_vm4 = vcmp.ge.s32.totalorder %v972_v2, 1  ;;  %vm10320_vm11 = vmand %vm8343_vm0, %vm8347_vm13  ;;  %vm8417_vm12 = vcmp.le.s32.totalorder %v971_v56, 16  ;;  %4717 = vmatpush3.bf16.msra.mxu1 %v5316_v62  ;;  %vm8440_vm13 = vcmp.le.s32.totalorder %v972_v2, 16  ;;  %v5319_v62 = vld [vmem:[#allocation7 + $0x1e0] sm:$0xff]   ;;  %v10335_v56 = vld [vmem:[#allocation25_spill] sm:$0xff] }
 0x278   : > { %v1432_v33 = vsel %vm10318_vm9, %v1306_v11, 0.0  ;;  %v8406_v3 = vpack.c.bf16 %v1306_v11, %v1305_v34  ;;  %vm8413_vm2 = vmand %vm10320_vm11, %vm1139_vm6  ;;  %v795_v34 = vpop.f32.mrb[80].mxu0  ;;  %vm10326_vm9 = vnez %v9842_v44  ;;  %4718 = vmatprep.subr.bf16.mxu1 %v5317_v25  ;;  %v5320_v2 = vld [vmem:[#allocation7 + $0x1a0] sm:$0xff]   ;;  %vm10355_vm7 = vnez %v10213_v18 }
 0x279   : > { %2782 = vmatmul.mubr.bf16.gmra.mrb[144].mxu0 %v8390_v6  ;;  %v8423_v8 = vpack.c.bf16 %v1432_v33, %v1431_v35  ;;  %4194 = vmatprep.mubr.msk.bf16.mxu1 %vm10326_vm9, %v6616_v61  ;;  %v796_v30 = vadd.f32 %v7292_v19, %v795_v34  ;;  %v4970_v11 = vpop.f32.mrb[81].mxu0  ;;  %vm10327_vm6 = vmand %vm8363_vm3, %vm8367_vm10  ;;  %v5321_v34 = vld [vmem:[#allocation7 + $0x1e8] sm:$0xff]   ;;  %vm10332_vm10 = vnez %v9881_v60  ;;  %vm10356_vm8 = vnez %v10233_v20  ;;  %v5356_v60 = vld [vmem:[#allocation7 + $0x220] sm:$0xff]  }
 0x27a   : > { %10319 = vst [vmem:[#allocation56_spill] sm:$0xff] %v8406_v3  ;;  %4988 = vmatprep.mubr.bf16.mxu0 %v6796_v39  ;;  %vm8436_vm0 = vmand %vm10327_vm6, %vm8396_vm4  ;;  %v798_v35 = vpop.f32.mrb[82].mxu0  ;;  %v5325_v11 = vld [vmem:[#allocation7 + $0x1f8] sm:$0xff]   ;;  %vm10357_vm1 = vcmask 1046528   ;;  %vm10360_vm5 = vsmask.f32 7424 }
 0x27b   : > { %10325 = vst [vmem:[#allocation57_spill] sm:$0xff] %v8423_v8  ;;  %vm1265_vm11 = vmand %vm8413_vm2, %vm8417_vm12  ;;  %v1307_v4 = vmax.f32 %v796_v30, 0.0  ;;  %v799_v28 = vadd.f32 %v7292_v19, %v798_v35  ;;  %v4971_v23 = vpop.f32.mrb[83].mxu0  ;;  %4719 = vmatpush3.bf16.msra.mxu1 %v5318_v32  ;;  %v5323_v32 = vld [vmem:[#allocation7 + $0x1f0] sm:$0xff]   ;;  %vm10333_vm12 = vnez %v9918_v46  ;;  %vm10336_vm2 = vnez %v10335_v56  ;;  %v10338_v35 = vld [vmem:[#allocation24_spill] sm:$0xff] }
 0x27c   : > { %vm1266_vm4 = vmand %vm8436_vm0, %vm8440_vm13  ;;  %4720 = vmatprep.subr.bf16.mxu1 %v5319_v62  ;;  %v5324_v30 = vld [vmem:[#allocation7 + $0x1b0] sm:$0xff]   ;;  %v10337_v62 = vld [vmem:[#allocation37_spill] sm:$0xff]  ;;  %v9594_v51 = vrot.slane %v8423_v8, 1 }
 0x27d   : > { %v1433_v33 = vsel %vm1265_vm11, %v1307_v4, 0.0  ;;  %v1308_v25 = vmax.f32 %v799_v28, 0.0  ;;  %v10339_v4 = vld [vmem:[#allocation28_spill] sm:$0xff]  ;;  %v10342_v28 = vld [vmem:[#allocation31_spill] sm:$0xff]  ;;  %v10345_v23 = vld [vmem:[#allocation34_spill] sm:$0xff] }
 0x27e   : > { %2517 = vmatmul.mubr.bf16.gmra.mrb[72].mxu1 %v6542_v42  ;;  %v5326_v42 = vld [vmem:[#allocation7 + $0x1b8] sm:$0xff]   ;;  %vm10340_vm3 = vnez %v10339_v4  ;;  %vm10343_vm6 = vnez %v10342_v28  ;;  %vm10346_vm0 = vnez %v10345_v23  ;;  %v5358_v46 = vld [vmem:[#allocation7 + $0x230] sm:$0xff]  }
 0x27f   : > { %v1434_v43 = vsel %vm1266_vm4, %v1308_v25, 0.0  ;;  %4197 = vmatprep.mubr.msk.bf16.mxu1 %vm10332_vm10, %v6741_v55  ;;  %4721 = vmatpush3.bf16.msra.mxu1 %v5320_v2  ;;  %v10347_v2 = vld [vmem:[#allocation33_spill] sm:$0xff]  ;;  %v10351_v25 = vld [vmem:[#allocation40_spill] sm:$0xff]  ;;  %v5333_v20 = vld [vmem:[#allocation8 + $0x30] sm:$0xff]  }
 0x280   : > { %v8456_v19 = vpack.c.bf16 %v1434_v43, %v1433_v33  ;;  %4722 = vmatprep.subr.bf16.mxu1 %v5321_v34  ;;  %v10348_v33 = vld [vmem:[#allocation38_spill] sm:$0xff]  ;;  %vm10352_vm11 = vnez %v10351_v25  ;;  %v5327_v25 = vld [vmem:[#allocation8] sm:$0xff]  }
 0x281   : > { %4989 = vmatmul.mubr.bf16.vlgmr.msra.gmra.mrb[148].mxu0 %v6929_v7  ;;  %vm10349_vm13 = vnez %v10348_v33  ;;  %5020 = vmatprep.subr.bf16.mxu0 %v5327_v25 }
 0x282   : > { %4992 = vmatprep.mubr.bf16.mxu0 %v7052_v59  ;;  %5021 = vmatpush3.bf16.msra.mxu0 %v5327_v25  ;;  %v8707_v25 = vld [vmem:[%s10397_s24] ss:$0 sm:$0xff] }
 0x283   : > { %4723 = vmatpush3.bf16.msra.mxu1 %v5322_v9 }
 0x284   : > { %4724 = vmatprep.subr.bf16.mxu1 %v5323_v32 }
 0x286   : > { %2525 = vmatmul.mubr.bf16.gmra.mrb[76].mxu1 %v6673_v37  ;;  %v10334_v37 = vld [vmem:[#allocation22_spill] sm:$0xff]  ;;  %v4392_v34 = vpop.f32.mrb[0].mxu1 }
 0x287   : > { %4200 = vmatprep.mubr.msk.bf16.mxu1 %vm10333_vm12, %v6869_v52  ;;  %4725 = vmatpush3.bf16.msra.mxu1 %v5324_v30  ;;  %v4393_v43 = vpop.f32.mrb[1].mxu1 }
 0x288   : > { %4726 = vmatprep.subr.bf16.mxu1 %v5325_v11  ;;  %v8505_v9 = vadd.f32 %v4393_v43, %v4392_v34 }
 0x289   : > { %4993 = vmatmul.mubr.bf16.gmra.mrb[152].mxu0 %v7179_v21 }
 0x28a   : > { %4996 = vmatprep.mubr.bf16.mxu0 %v7301_v50 }
 0x28b   : > { %4727 = vmatpush3.bf16.msra.mxu1 %v5326_v42 }
 0x28c   : > { %5068 = vmatprep.subr.bf16.mxu1 %v8467_v53 }
 0x28e   : > { %2533 = vmatmul.mubr.bf16.gmra.mrb[80].mxu1 %v6796_v39  ;;  %v10341_v39 = vld [vmem:[#allocation27_spill] sm:$0xff] }
 0x28f   : > { %4203 = vmatprep.mubr.msk.bf16.mxu1 %vm10336_vm2, %v10334_v37 }
 0x291   : > { %4997 = vmatmul.mubr.bf16.gmra.mrb[156].mxu0 %v7426_v15 }
 0x292   : > { %5000 = vmatprep.mubr.bf16.mxu0 %v7543_v40 }
 0x296   : > { %2541 = vmatmul.mubr.bf16.gmra.mrb[84].mxu1 %v6929_v7  ;;  %v10344_v7 = vld [vmem:[#allocation30_spill] sm:$0xff] }
 0x297   : > { %4206 = vmatprep.mubr.msk.bf16.mxu1 %vm10340_vm3, %v10338_v35 }
 0x299   : > { %5001 = vmatmul.mubr.bf16.gmra.mrb[160].mxu0 %v10337_v62 }
 0x29a   : > { %5004 = vmatprep.mubr.bf16.mxu0 %v7785_v24  ;;  %v4616_v34 = vpop.f32.mrb[84].mxu0 }
 0x29b   : > { %v4617_v43 = vpop.f32.mrb[85].mxu0 }
 0x29c   : > { %v4619_v29 = vpop.f32.mrb[86].mxu0 }
 0x29e   : > { %2549 = vmatmul.mubr.bf16.gmra.mrb[88].mxu1 %v7052_v59  ;;  %v10350_v59 = vld [vmem:[#allocation36_spill] sm:$0xff] }
 0x29f   : > { %4209 = vmatprep.mubr.msk.bf16.mxu1 %vm10343_vm6, %v10341_v39 }
 0x2a1   : > { %5005 = vmatmul.mubr.bf16.gmra.mrb[164].mxu0 %v7909_v58 }
 0x2a2   : > { %5008 = vmatprep.mubr.bf16.mxu0 %v8021_v26 }
 0x2a6   : > { %2557 = vmatmul.mubr.bf16.gmra.mrb[92].mxu1 %v7179_v21  ;;  %v10353_v21 = vld [vmem:[#allocation42_spill] sm:$0xff] }
 0x2a7   : > { %4212 = vmatprep.mubr.msk.bf16.mxu1 %vm10346_vm0, %v10344_v7  ;;  %vm10354_vm4 = vnez %v10353_v21 }
 0x2a9   : > { %5009 = vmatmul.mubr.bf16.gmra.mrb[168].mxu0 %v8149_v45 }
 0x2ae   : > { %2565 = vmatmul.mubr.bf16.gmra.mrb[96].mxu1 %v7301_v50  ;;  %v4395_v50 = vpop.f32.mrb[2].mxu1 }
 0x2af   : > { %4215 = vmatprep.mubr.msk.bf16.mxu1 %vm10349_vm13, %v10347_v2  ;;  %v4396_v32 = vpop.f32.mrb[3].mxu1 }
 0x2b0   : > { %v8507_v30 = vadd.f32 %v4396_v32, %v4395_v50  ;;  %v8521_v50 = vadd.f32 %v4617_v43, %v4616_v34  ;;  %v1710_v34 = vshll.u32 %v8456_v19, 16 }
 0x2b2   : > { %v1712_v27 = vrot.slane %v1710_v34, 1 }
 0x2b6   : > { %2573 = vmatmul.mubr.bf16.gmra.mrb[100].mxu1 %v7426_v15  ;;  %v4398_v15 = vpop.f32.mrb[4].mxu1 }
 0x2b7   : > { %4218 = vmatprep.mubr.msk.bf16.mxu1 %vm10352_vm11, %v10350_v59 }
 0x2be   : > { %2581 = vmatmul.mubr.bf16.gmra.mrb[104].mxu1 %v7543_v40  ;;  %v4399_v40 = vpop.f32.mrb[5].mxu1 }
 0x2bf   : > { %4221 = vmatprep.mubr.msk.bf16.mxu1 %vm10354_vm4, %v7736_v48  ;;  %v8513_v11 = vadd.f32 %v4399_v40, %v4398_v15  ;;  %v4401_v42 = vpop.f32.mrb[6].mxu1  ;;  %v4620_v40 = vpop.f32.mrb[87].mxu0 }
 0x2c0   : > { %v4402_v16 = vpop.f32.mrb[7].mxu1  ;;  %v8525_v36 = vadd.f32 %v4620_v40, %v4619_v29  ;;  %v4622_v43 = vpop.f32.mrb[88].mxu0 }
 0x2c1   : > { %v8515_v10 = vadd.f32 %v4402_v16, %v4401_v42  ;;  %v4623_v54 = vpop.f32.mrb[89].mxu0 }
 0x2c2   : > { %v8536_v29 = vadd.f32 %v4623_v54, %v4622_v43 }
 0x2c6   : > { %2589 = vmatmul.mubr.bf16.gmra.mrb[108].mxu1 %v10337_v62  ;;  %v4404_v62 = vpop.f32.mrb[8].mxu1 }
 0x2c7   : > { %4224 = vmatprep.mubr.msk.bf16.mxu1 %vm10355_vm7, %v7856_v5  ;;  %v4405_v32 = vpop.f32.mrb[9].mxu1 }
 0x2c8   : > { %v8523_v3 = vadd.f32 %v4405_v32, %v4404_v62  ;;  %v4407_v15 = vpop.f32.mrb[10].mxu1  ;;  %v1720_v62 = vrot.slane %v8456_v19, 1 }
 0x2c9   : > { %v4408_v16 = vpop.f32.mrb[11].mxu1 }
 0x2ca   : > { %v8527_v42 = vadd.f32 %v4408_v16, %v4407_v15  ;;  %v4410_v32 = vpop.f32.mrb[12].mxu1  ;;  %v4625_v15 = vpop.f32.mrb[90].mxu0  ;;  %v8550_v54 = vsel %vm10357_vm1, %v9594_v51, %v1720_v62 }
 0x2cb   : > { %v4411_v40 = vpop.f32.mrb[13].mxu1  ;;  %v4626_v17 = vpop.f32.mrb[91].mxu0  ;;  %10358 = vst [vmem:[#allocation22_spill] sm:$0xff] %v8550_v54 }
 0x2cc   : > { %v8542_v13 = vadd.f32 %v4411_v40, %v4410_v32  ;;  %v4413_v31 = vpop.f32.mrb[14].mxu1  ;;  %v8544_v1 = vadd.f32 %v4626_v17, %v4625_v15  ;;  %v4628_v17 = vpop.f32.mrb[92].mxu0 }
 0x2cd   : > { %v4414_v19 = vpop.f32.mrb[15].mxu1  ;;  %v4629_v40 = vpop.f32.mrb[93].mxu0 }
 0x2ce   : > { %2597 = vmatmul.mubr.bf16.gmra.mrb[112].mxu1 %v7785_v24  ;;  %v1702_v24 = vshll.u32 %v8423_v8, 16  ;;  %v4416_v32 = vpop.f32.mrb[16].mxu1  ;;  %v8561_v34 = vadd.f32 %v4629_v40, %v4628_v17 }
 0x2cf   : > { %4227 = vmatprep.mubr.msk.bf16.mxu1 %vm8161_vm14, %v7975_v14  ;;  %v4417_v15 = vpop.f32.mrb[17].mxu1 }
 0x2d0   : > { %v8538_v16 = vrot.slane %v1702_v24, 1  ;;  %v8552_v24 = vadd.f32 %v4414_v19, %v4413_v31  ;;  %v8563_v62 = vadd.f32 %v4417_v15, %v4416_v32  ;;  %v4419_v31 = vpop.f32.mrb[18].mxu1 }
 0x2d2   : > { %10359 = vst [vmem:[#allocation25_spill] sm:$0xff] %v8552_v24  ;;  %10362 = vst [vmem:[#allocation24_spill] sm:$0xff] %v8563_v62 }
 0x2d6   : > { %2605 = vmatmul.mubr.bf16.gmra.mrb[116].mxu1 %v7909_v58  ;;  %v1706_v58 = vshrl.u32 %v8423_v8, 16 }
 0x2d7   : > { %4230 = vmatprep.mubr.msk.bf16.mxu1 %vm10356_vm8, %v8081_v63 }
 0x2d8   : > { %v1708_v49 = vor.u32 %v1706_v58, %v8538_v16  ;;  %v4631_v58 = vpop.f32.mrb[94].mxu0 }
 0x2d9   : > { %v4632_v19 = vpop.f32.mrb[95].mxu0 }
 0x2da   : > { %v8556_v43 = vsel %vm10360_vm5, %v1708_v49, %v1712_v27  ;;  %v8565_v51 = vadd.f32 %v4632_v19, %v4631_v58  ;;  %v10363_v49 = vld [vmem:[#allocation20_spill] sm:$0xff]  ;;  %v4634_v54 = vpop.f32.mrb[96].mxu0 }
 0x2db   : > { %10361 = vst [vmem:[#allocation37_spill] sm:$0xff] %v8556_v43  ;;  %v4635_v43 = vpop.f32.mrb[97].mxu0 }
 0x2dc   : > { %v8571_v17 = vadd.f32 %v4635_v43, %v4634_v54  ;;  %v4637_v24 = vpop.f32.mrb[98].mxu0  ;;  %v5353_v43 = vld [vmem:[#allocation7 + $0x208] sm:$0xff]  }
 0x2dd   : > { %v4638_v62 = vpop.f32.mrb[99].mxu0 }
 0x2de   : > { %2613 = vmatmul.mubr.bf16.gmra.mrb[120].mxu1 %v8021_v26  ;;  %v4420_v26 = vpop.f32.mrb[19].mxu1  ;;  %v8575_v58 = vadd.f32 %v4638_v62, %v4637_v24  ;;  %v4640_v54 = vpop.f32.mrb[100].mxu0 }
 0x2df   : > { %4233 = vmatprep.mubr.msk.bf16.mxu1 %vm8218_vm15, %v8199_v22  ;;  %v8567_v27 = vadd.f32 %v4420_v26, %v4419_v31  ;;  %v4422_v8 = vpop.f32.mrb[20].mxu1  ;;  %v4641_v26 = vpop.f32.mrb[101].mxu0 }
 0x2e0   : > { %v4423_v40 = vpop.f32.mrb[21].mxu1  ;;  %v4643_v62 = vpop.f32.mrb[102].mxu0 }
 0x2e1   : > { %v8573_v32 = vadd.f32 %v4423_v40, %v4422_v8  ;;  %v4425_v15 = vpop.f32.mrb[22].mxu1 }
 0x2e2   : > { %v4426_v19 = vpop.f32.mrb[23].mxu1 }
 0x2e3   : > { %v8577_v31 = vadd.f32 %v4426_v19, %v4425_v15  ;;  %v4428_v8 = vpop.f32.mrb[24].mxu1  ;;  %v4644_v19 = vpop.f32.mrb[103].mxu0 }
 0x2e4   : > { %v4429_v24 = vpop.f32.mrb[25].mxu1  ;;  %v8588_v44 = vadd.f32 %v4644_v19, %v4643_v62 }
 0x2e5   : > { %10364 = vst [vmem:[#allocation28_spill] sm:$0xff] %v8577_v31  ;;  %v8586_v40 = vadd.f32 %v4429_v24, %v4428_v8  ;;  %v4431_v15 = vpop.f32.mrb[26].mxu1  ;;  %v5355_v8 = vld [vmem:[#allocation7 + $0x218] sm:$0xff]  }
 0x2e6   : > { %2621 = vmatmul.mubr.bf16.gmra.mrb[124].mxu1 %v8149_v45  ;;  %v10365_v45 = vld [vmem:[#allocation21_spill] sm:$0xff] }
 0x2e7   : > { %2822 = vmatprep.mubr.bf16.mxu1 %v10363_v49  ;;  %v8584_v49 = vadd.f32 %v4641_v26, %v4640_v54  ;;  %10366 = vst [vmem:[#allocation27_spill] sm:$0xff] %v8586_v40  ;;  %v10368_v54 = vld [vmem:[#allocation23_spill] sm:$0xff]  ;;  %v4646_v26 = vpop.f32.mrb[104].mxu0 }
 0x2e8   : > { %v4647_v40 = vpop.f32.mrb[105].mxu0 }
 0x2e9   : > { %v4649_v19 = vpop.f32.mrb[106].mxu0 }
 0x2ee   : > { %4236 = vmatmul.mubr.msk.bf16.vlgmr.msra.gmra.mrb[128].mxu1 %vm10326_vm9, %v6616_v61  ;;  %v4432_v61 = vpop.f32.mrb[27].mxu1 }
 0x2ef   : > { %5076 = vmatpush3.bf16.msra.mxu1 %v8467_v53  ;;  %2830 = vmatprep.mubr.bf16.mxu1 %v10365_v45  ;;  %v5354_v53 = vld [vmem:[#allocation7 + $0x210] sm:$0xff]   ;;  %v8590_v45 = vadd.f32 %v4432_v61, %v4431_v15  ;;  %v4434_v24 = vpop.f32.mrb[28].mxu1  ;;  %v4650_v61 = vpop.f32.mrb[107].mxu0 }
 0x2f0   : > { %5069 = vmatprep.subr.bf16.mxu1 %v5353_v43  ;;  %v4435_v62 = vpop.f32.mrb[29].mxu1 }
 0x2f1   : > { %10367 = vst [vmem:[#allocation31_spill] sm:$0xff] %v8590_v45  ;;  %v8598_v31 = vadd.f32 %v4435_v62, %v4434_v24  ;;  %v4437_v15 = vpop.f32.mrb[30].mxu1  ;;  %v8600_v45 = vadd.f32 %v4650_v61, %v4649_v19 }
 0x2f3   : > { %5077 = vmatpush3.bf16.msra.mxu1 %v5353_v43  ;;  %v8596_v43 = vadd.f32 %v4647_v40, %v4646_v26  ;;  %10369 = vst [vmem:[#allocation30_spill] sm:$0xff] %v8598_v31  ;;  %v10371_v40 = vld [vmem:[#allocation26_spill] sm:$0xff]  ;;  %v5357_v26 = vld [vmem:[#allocation7 + $0x228] sm:$0xff]  }
 0x2f4   : > { %5070 = vmatprep.subr.bf16.mxu1 %v5354_v53 }
 0x2f6   : > { %4239 = vmatmul.mubr.msk.bf16.gmra.mrb[132].mxu1 %vm10332_vm10, %v6741_v55  ;;  %v4438_v55 = vpop.f32.mrb[31].mxu1 }
 0x2f7   : > { %2838 = vmatprep.mubr.bf16.mxu1 %v10368_v54  ;;  %5078 = vmatpush3.bf16.msra.mxu1 %v5354_v53  ;;  %v8602_v53 = vadd.f32 %v4438_v55, %v4437_v15  ;;  %v4652_v54 = vpop.f32.mrb[108].mxu0  ;;  %v4440_v24 = vpop.f32.mrb[32].mxu1 }
 0x2f8   : > { %5071 = vmatprep.subr.bf16.mxu1 %v5355_v8  ;;  %v4653_v62 = vpop.f32.mrb[109].mxu0  ;;  %v4441_v19 = vpop.f32.mrb[33].mxu1 }
 0x2f9   : > { %10370 = vst [vmem:[#allocation34_spill] sm:$0xff] %v8602_v53  ;;  %v4655_v61 = vpop.f32.mrb[110].mxu0  ;;  %v8610_v31 = vadd.f32 %v4441_v19, %v4440_v24  ;;  %v4443_v15 = vpop.f32.mrb[34].mxu1  ;;  %v5359_v24 = vld [vmem:[#allocation7 + $0x238] sm:$0xff]  }
 0x2fa   : > { %v4656_v55 = vpop.f32.mrb[111].mxu0 }
 0x2fb   : > { %5079 = vmatpush3.bf16.msra.mxu1 %v5355_v8  ;;  %v8608_v8 = vadd.f32 %v4653_v62, %v4652_v54  ;;  %10372 = vst [vmem:[#allocation33_spill] sm:$0xff] %v8610_v31  ;;  %v8612_v53 = vadd.f32 %v4656_v55, %v4655_v61  ;;  %v4658_v54 = vpop.f32.mrb[112].mxu0 }
 0x2fc   : > { %5072 = vmatprep.subr.bf16.mxu1 %v5356_v60  ;;  %v4659_v19 = vpop.f32.mrb[113].mxu0 }
 0x2fd   : > { %v4661_v55 = vpop.f32.mrb[114].mxu0 }
 0x2fe   : > { %4242 = vmatmul.mubr.msk.bf16.gmra.mrb[136].mxu1 %vm10333_vm12, %v6869_v52  ;;  %v4444_v52 = vpop.f32.mrb[35].mxu1 }
 0x2ff   : > { %2846 = vmatprep.mubr.bf16.mxu1 %v10371_v40  ;;  %5080 = vmatpush3.bf16.msra.mxu1 %v5356_v60  ;;  %v8614_v60 = vadd.f32 %v4444_v52, %v4443_v15  ;;  %v10374_v40 = vld [vmem:[#allocation29_spill] sm:$0xff]  ;;  %v4446_v62 = vpop.f32.mrb[36].mxu1  ;;  %v4662_v52 = vpop.f32.mrb[115].mxu0 }
 0x300   : > { %5073 = vmatprep.subr.bf16.mxu1 %v5357_v26  ;;  %v4447_v61 = vpop.f32.mrb[37].mxu1 }
 0x301   : > { %10373 = vst [vmem:[#allocation38_spill] sm:$0xff] %v8614_v60  ;;  %v8622_v31 = vadd.f32 %v4447_v61, %v4446_v62  ;;  %v4449_v15 = vpop.f32.mrb[38].mxu1  ;;  %v8624_v60 = vadd.f32 %v4662_v52, %v4661_v55 }
 0x303   : > { %5081 = vmatpush3.bf16.msra.mxu1 %v5357_v26  ;;  %v8620_v26 = vadd.f32 %v4659_v19, %v4658_v54  ;;  %10376 = vst [vmem:[#allocation40_spill] sm:$0xff] %v8622_v31 }
 0x304   : > { %5074 = vmatprep.subr.bf16.mxu1 %v5358_v46 }
 0x305   : > { %10375 = vst [vmem:[#allocation36_spill] sm:$0xff] %v8620_v26 }
 0x306   : > { %4245 = vmatmul.mubr.msk.bf16.gmra.mrb[140].mxu1 %vm10336_vm2, %v10334_v37  ;;  %v4450_v37 = vpop.f32.mrb[39].mxu1 }
 0x307   : > { %2854 = vmatprep.mubr.bf16.mxu1 %v10374_v40  ;;  %5082 = vmatpush3.bf16.msra.mxu1 %v5358_v46  ;;  %v8626_v56 = vadd.f32 %v4450_v37, %v4449_v15  ;;  %v10378_v46 = vld [vmem:[#allocation32_spill] sm:$0xff]  ;;  %v4664_v40 = vpop.f32.mrb[116].mxu0  ;;  %v4452_v54 = vpop.f32.mrb[40].mxu1 }
 0x308   : > { %5075 = vmatprep.subr.bf16.mxu1 %v5359_v24  ;;  %v4665_v19 = vpop.f32.mrb[117].mxu0  ;;  %v4453_v62 = vpop.f32.mrb[41].mxu1 }
 0x309   : > { %10377 = vst [vmem:[#allocation42_spill] sm:$0xff] %v8626_v56  ;;  %v8632_v26 = vadd.f32 %v4665_v19, %v4664_v40  ;;  %v4667_v61 = vpop.f32.mrb[118].mxu0  ;;  %v8634_v31 = vadd.f32 %v4453_v62, %v4452_v54 }
 0x30a   : > { %v4668_v55 = vpop.f32.mrb[119].mxu0 }
 0x30b   : > { %5083 = vmatpush3.bf16.msra.mxu1 %v5359_v24  ;;  %10379 = vst [vmem:[#allocation20_spill] sm:$0xff] %v8634_v31  ;;  %v4455_v24 = vpop.f32.mrb[42].mxu1  ;;  %v8636_v52 = vadd.f32 %v4668_v55, %v4667_v61  ;;  %v4670_v4 = vpop.f32.mrb[120].mxu0 }
 0x30c   : > { %v4456_v15 = vpop.f32.mrb[43].mxu1  ;;  %v4671_v40 = vpop.f32.mrb[121].mxu0 }
 0x30d   : > { %v8638_v37 = vadd.f32 %v4456_v15, %v4455_v24  ;;  %v8644_v19 = vadd.f32 %v4671_v40, %v4670_v4  ;;  %v4673_v62 = vpop.f32.mrb[122].mxu0 }
 0x30e   : > { %4248 = vmatmul.mubr.msk.bf16.gmra.mrb[144].mxu1 %vm10340_vm3, %v10338_v35  ;;  %v10381_v35 = vld [vmem:[#allocation35_spill] sm:$0xff]  ;;  %v4674_v55 = vpop.f32.mrb[123].mxu0 }
 0x30f   : > { %2862 = vmatprep.mubr.bf16.mxu1 %v10378_v46  ;;  %10380 = vst [vmem:[#allocation21_spill] sm:$0xff] %v8638_v37  ;;  %v4458_v46 = vpop.f32.mrb[44].mxu1  ;;  %v8648_v56 = vadd.f32 %v4674_v55, %v4673_v62 }
 0x310   : > { %v4459_v54 = vpop.f32.mrb[45].mxu1 }
 0x311   : > { %v8646_v31 = vadd.f32 %v4459_v54, %v4458_v46  ;;  %v4461_v61 = vpop.f32.mrb[46].mxu1 }
 0x312   : > { %v4462_v24 = vpop.f32.mrb[47].mxu1 }
 0x313   : > { %10382 = vst [vmem:[#allocation23_spill] sm:$0xff] %v8646_v31  ;;  %v8650_v15 = vadd.f32 %v4462_v24, %v4461_v61 }
 0x315   : > { %10383 = vst [vmem:[#allocation26_spill] sm:$0xff] %v8650_v15  ;;  %v4676_v28 = vpop.f32.mrb[124].mxu0 }
 0x316   : > { %4251 = vmatmul.mubr.msk.bf16.gmra.mrb[148].mxu1 %vm10343_vm6, %v10341_v39  ;;  %v10384_v39 = vld [vmem:[#allocation39_spill] sm:$0xff]  ;;  %v4677_v4 = vpop.f32.mrb[125].mxu0 }
 0x317   : > { %2870 = vmatprep.mubr.bf16.mxu1 %v10381_v35  ;;  %v4464_v35 = vpop.f32.mrb[48].mxu1  ;;  %v8656_v40 = vadd.f32 %v4677_v4, %v4676_v28  ;;  %v4679_v54 = vpop.f32.mrb[126].mxu0 }
 0x318   : > { %v4465_v46 = vpop.f32.mrb[49].mxu1  ;;  %v4680_v55 = vpop.f32.mrb[127].mxu0 }
 0x319   : > { %v8658_v31 = vadd.f32 %v4465_v46, %v4464_v35  ;;  %v4467_v62 = vpop.f32.mrb[50].mxu1  ;;  %v8660_v37 = vadd.f32 %v4680_v55, %v4679_v54 }
 0x31a   : > { %v4468_v61 = vpop.f32.mrb[51].mxu1 }
 0x31b   : > { %10385 = vst [vmem:[#allocation29_spill] sm:$0xff] %v8658_v31  ;;  %v8662_v24 = vadd.f32 %v4468_v61, %v4467_v62 }
 0x31d   : > { %10386 = vst [vmem:[#allocation32_spill] sm:$0xff] %v8662_v24 }
 0x31e   : > { %4254 = vmatmul.mubr.msk.bf16.gmra.mrb[152].mxu1 %vm10346_vm0, %v10344_v7  ;;  %v10387_v7 = vld [vmem:[#allocation41_spill] sm:$0xff] }
 0x31f   : > { %2878 = vmatprep.mubr.bf16.mxu1 %v10384_v39 }
 0x321   : > { %v4682_v23 = vpop.f32.mrb[128].mxu0 }
 0x322   : > { %v4470_v39 = vpop.f32.mrb[52].mxu1  ;;  %v4683_v28 = vpop.f32.mrb[129].mxu0 }
 0x323   : > { %v8668_v4 = vadd.f32 %v4683_v28, %v4682_v23  ;;  %v4471_v35 = vpop.f32.mrb[53].mxu1  ;;  %v4685_v46 = vpop.f32.mrb[130].mxu0 }
 0x324   : > { %v8670_v31 = vadd.f32 %v4471_v35, %v4470_v39  ;;  %v4473_v54 = vpop.f32.mrb[54].mxu1  ;;  %v4686_v55 = vpop.f32.mrb[131].mxu0 }
 0x325   : > { %v8672_v15 = vadd.f32 %v4686_v55, %v4685_v46  ;;  %v4474_v62 = vpop.f32.mrb[55].mxu1 }
 0x326   : > { %4257 = vmatmul.mubr.msk.bf16.gmra.mrb[156].mxu1 %vm10349_vm13, %v10347_v2  ;;  %10388 = vst [vmem:[#allocation35_spill] sm:$0xff] %v8670_v31  ;;  %v8674_v61 = vadd.f32 %v4474_v62, %v4473_v54  ;;  %v10389_v2 = vld [vmem:[#allocation43_spill] sm:$0xff] }
 0x327   : > { %2886 = vmatprep.mubr.bf16.mxu1 %v10387_v7 }
 0x32d   : > { %v4688_v33 = vpop.f32.mrb[132].mxu0 }
 0x32e   : > { %4260 = vmatmul.mubr.msk.bf16.gmra.mrb[160].mxu1 %vm10352_vm11, %v10350_v59  ;;  %v4476_v7 = vpop.f32.mrb[56].mxu1  ;;  %v4689_v23 = vpop.f32.mrb[133].mxu0  ;;  %v10392_v59 = vld [vmem:[#allocation44_spill] sm:$0xff] }
 0x32f   : > { %2894 = vmatprep.mubr.bf16.mxu1 %v10389_v2  ;;  %v8680_v28 = vadd.f32 %v4689_v23, %v4688_v33  ;;  %v4477_v39 = vpop.f32.mrb[57].mxu1  ;;  %v4691_v35 = vpop.f32.mrb[134].mxu0 }
 0x330   : > { %v8682_v31 = vadd.f32 %v4477_v39, %v4476_v7  ;;  %v4479_v46 = vpop.f32.mrb[58].mxu1  ;;  %v4692_v55 = vpop.f32.mrb[135].mxu0 }
 0x331   : > { %v8684_v24 = vadd.f32 %v4692_v55, %v4691_v35  ;;  %v4480_v54 = vpop.f32.mrb[59].mxu1 }
 0x332   : > { %10390 = vst [vmem:[#allocation39_spill] sm:$0xff] %v8682_v31  ;;  %v8686_v62 = vadd.f32 %v4480_v54, %v4479_v46 }
 0x334   : > { %10391 = vst [vmem:[#allocation41_spill] sm:$0xff] %v8686_v62 }
 0x336   : > { %4263 = vmatmul.mubr.msk.bf16.gmra.mrb[164].mxu1 %vm10354_vm4, %v7736_v48  ;;  %vm10433_vm4 = vcmask 1046528  }
 0x337   : > { %2902 = vmatprep.mubr.bf16.mxu1 %v10392_v59  ;;  %v5328_v59 = vld [vmem:[#allocation8 + $0x8] sm:$0xff]  }
 0x338   : > { %v4694_v2 = vpop.f32.mrb[136].mxu0  ;;  %5022 = vmatprep.subr.bf16.mxu0 %v5328_v59 }
 0x339   : > { %v4482_v33 = vpop.f32.mrb[60].mxu1  ;;  %v4695_v23 = vpop.f32.mrb[137].mxu0  ;;  %5023 = vmatpush3.bf16.msra.mxu0 %v5328_v59  ;;  %v2345_v59 = vadd.f32 %v8507_v30, %v8707_v25 }
 0x33a   : > { %v8692_v7 = vadd.f32 %v4695_v23, %v4694_v2  ;;  %v4483_v39 = vpop.f32.mrb[61].mxu1  ;;  %v4697_v31 = vpop.f32.mrb[138].mxu0  ;;  %v5329_v2 = vld [vmem:[#allocation8 + $0x10] sm:$0xff]  }
 0x33b   : > { %v8694_v35 = vadd.f32 %v4483_v39, %v4482_v33  ;;  %v4485_v46 = vpop.f32.mrb[62].mxu1  ;;  %v4698_v55 = vpop.f32.mrb[139].mxu0  ;;  %5024 = vmatprep.subr.bf16.mxu0 %v5329_v2 }
 0x33c   : > { %10393 = vst [vmem:[#allocation43_spill] sm:$0xff] %v8692_v7  ;;  %v8696_v54 = vadd.f32 %v4698_v55, %v4697_v31  ;;  %v4486_v21 = vpop.f32.mrb[63].mxu1  ;;  %v5330_v7 = vld [vmem:[#allocation8 + $0x18] sm:$0xff]  }
 0x33d   : > { %10394 = vst [vmem:[#allocation44_spill] sm:$0xff] %v8694_v35  ;;  %v8698_v48 = vadd.f32 %v4486_v21, %v4485_v46  ;;  %5025 = vmatpush3.bf16.msra.mxu0 %v5329_v2 }
 0x33e   : > { %10395 = vst [vmem:[#allocation58_spill] sm:$0xff] %v8696_v54  ;;  %4266 = vmatmul.mubr.msk.bf16.gmra.mrb[168].mxu1 %vm10355_vm7, %v7856_v5  ;;  %v2342_v5 = vadd.f32 %v8505_v9, %v8707_v25  ;;  %5026 = vmatprep.subr.bf16.mxu0 %v5330_v7 }
 0x33f   : > { %10396 = vst [vmem:[#allocation59_spill] sm:$0xff] %v8698_v48  ;;  %2910 = vmatprep.mubr.bf16.mxu1 %v8179_v0 }
 0x341   : > { %v4504_v31 = vpop.f32.mrb[64].mxu1  ;;  %5027 = vmatpush3.bf16.msra.mxu0 %v5330_v7 }
 0x342   : > { %v4505_v46 = vpop.f32.mrb[65].mxu1 }
 0x343   : > { %v4506_v18 = vadd.f32 %v4505_v46, %v4504_v31  ;;  %v4507_v0 = vpop.f32.mrb[66].mxu1 }
 0x344   : > { %v4700_v33 = vpop.f32.mrb[140].mxu0  ;;  %v4508_v35 = vpop.f32.mrb[67].mxu1 }
 0x345   : > { %v4701_v23 = vpop.f32.mrb[141].mxu0  ;;  %v2503_v62 = vadd.f32 %v4506_v18, %v2342_v5  ;;  %v4509_v54 = vadd.f32 %v4508_v35, %v4507_v0  ;;  %v5331_v35 = vld [vmem:[#allocation8 + $0x20] sm:$0xff]   ;;  %v5332_v0 = vld [vmem:[#allocation8 + $0x28] sm:$0xff]  }
 0x346   : > { %v8709_v39 = vadd.f32 %v4701_v23, %v4700_v33  ;;  %v4703_v55 = vpop.f32.mrb[142].mxu0  ;;  %4269 = vmatmul.mubr.msk.bf16.gmra.mrb[172].mxu1 %vm8161_vm14, %v7975_v14  ;;  %v2350_v14 = vadd.f32 %v8513_v11, %v8707_v25  ;;  %5028 = vmatprep.subr.bf16.mxu0 %v5331_v35  ;;  %v1698_v11 = vshrl.u32 %v8322_v57, 16  ;;  %vm10398_vm14 = vmmov %vm10360_vm5 }
 0x347   : > { %v4704_v21 = vpop.f32.mrb[143].mxu0  ;;  %v2506_v33 = vadd.f32 %v4509_v54, %v2345_v59  ;;  %2918 = vmatprep.mubr.bf16.mxu1 %v8297_v47  ;;  %v8722_v9 = vadd.f32 %v8521_v50, %v2503_v62  ;;  %5029 = vmatpush3.bf16.msra.mxu0 %v5331_v35 }
 0x348   : > { %v8713_v48 = vadd.f32 %v4704_v21, %v4703_v55  ;;  %5030 = vmatprep.subr.bf16.mxu0 %v5332_v0  ;;  %v1700_v35 = vor.u32 %v1698_v11, %v8376_v41 }
 0x349   : > { %v4510_v2 = vpop.f32.mrb[68].mxu1  ;;  %v8725_v30 = vadd.f32 %v8525_v36, %v2506_v33  ;;  %v2353_v36 = vadd.f32 %v8515_v10, %v8707_v25 }
 0x34a   : > { %v4511_v46 = vpop.f32.mrb[69].mxu1  ;;  %v1705_v41 = vsel %vm10398_vm14, %v1700_v35, %v8538_v16  ;;  %v2366_v16 = vadd.f32 %v8542_v13, %v8707_v25  ;;  %v10409_v35 = vld [vmem:[#allocation25_spill] sm:$0xff]  ;;  %vm10478_vm14 = vmmov %vm10433_vm4 }
 0x34b   : > { %v4512_v47 = vadd.f32 %v4511_v46, %v4510_v2  ;;  %v4513_v54 = vpop.f32.mrb[70].mxu1  ;;  %5031 = vmatpush3.bf16.msra.mxu0 %v5332_v0 }
 0x34c   : > { %v4706_v31 = vpop.f32.mrb[144].mxu0  ;;  %v4514_v62 = vpop.f32.mrb[71].mxu1  ;;  %5032 = vmatprep.subr.bf16.mxu0 %v5333_v20 }
 0x34d   : > { %v4707_v23 = vpop.f32.mrb[145].mxu0  ;;  %v2511_v7 = vadd.f32 %v4512_v47, %v2350_v14  ;;  %v4515_v18 = vadd.f32 %v4514_v62, %v4513_v54 }
 0x34e   : > { %v8727_v55 = vadd.f32 %v4707_v23, %v4706_v31  ;;  %v4709_v12 = vpop.f32.mrb[146].mxu0  ;;  %4272 = vmatmul.mubr.msk.bf16.gmra.mrb[176].mxu1 %vm10356_vm8, %v8081_v63 }
 0x34f   : > { %v4710_v50 = vpop.f32.mrb[147].mxu0  ;;  %v2514_v21 = vadd.f32 %v4515_v18, %v2353_v36  ;;  %2926 = vmatprep.mubr.bf16.mxu1 %v8390_v6  ;;  %v8741_v59 = vadd.f32 %v8536_v29, %v2511_v7  ;;  %v2358_v6 = vadd.f32 %v8523_v3, %v8707_v25  ;;  %5033 = vmatpush3.bf16.msra.mxu0 %v5333_v20  ;;  %v10404_v20 = vld [vmem:[#allocation48_spill] sm:$0xff] }
 0x350   : > { %v8731_v5 = vadd.f32 %v4710_v50, %v4709_v12  ;;  %v5334_v50 = vld [vmem:[#allocation8 + $0x38] sm:$0xff]   ;;  %vm10405_vm8 = vnez %v10404_v20  ;;  %v10415_v20 = vld [vmem:[#allocation52_spill] sm:$0xff] }
 0x351   : > { %v4516_v10 = vpop.f32.mrb[72].mxu1  ;;  %v8748_v2 = vadd.f32 %v8544_v1, %v2514_v21  ;;  %v2361_v1 = vadd.f32 %v8527_v42, %v8707_v25  ;;  %5034 = vmatprep.subr.bf16.mxu0 %v5334_v50  ;;  %v10399_v21 = vld [vmem:[#allocation45_spill] sm:$0xff]  ;;  %vm10416_vm2 = vnez %v10415_v20 }
 0x352   : > { %v4517_v63 = vpop.f32.mrb[73].mxu1  ;;  %vm10400_vm5 = vnez %v10399_v21 }
 0x353   : > { %v4518_v29 = vadd.f32 %v4517_v63, %v4516_v10  ;;  %v4519_v46 = vpop.f32.mrb[74].mxu1  ;;  %5035 = vmatpush3.bf16.msra.mxu0 %v5334_v50  ;;  %v10401_v10 = vld [vmem:[#allocation46_spill] sm:$0xff]  ;;  %v10406_v63 = vld [vmem:[#allocation47_spill] sm:$0xff] }
 0x354   : > { %v8743_v33 = vpop.f32.mrb[148].mxu0  ;;  %v4520_v14 = vpop.f32.mrb[75].mxu1  ;;  %vm10407_vm7 = vnez %v10406_v63  ;;  %v10418_v63 = vld [vmem:[#allocation53_spill] sm:$0xff] }
 0x355   : > { %v8745_v31 = vpop.f32.mrb[149].mxu0  ;;  %v2519_v47 = vadd.f32 %v4518_v29, %v2358_v6  ;;  %v4521_v54 = vadd.f32 %v4520_v14, %v4519_v46  ;;  %vm10408_vm9 = vmand %vm10405_vm8, %vm10407_vm7  ;;  %v2369_v6 = vadd.f32 %v10409_v35, %v8707_v25  ;;  %v10410_v46 = vld [vmem:[#allocation50_spill] sm:$0xff]  ;;  %vm10419_vm6 = vnez %v10418_v63 }
 0x356   : > { %v8750_v23 = vpop.f32.mrb[150].mxu0  ;;  %4275 = vmatmul.mubr.msk.bf16.gmra.mrb[180].mxu1 %vm8218_vm15, %v8199_v22  ;;  %vm10402_vm15 = vnez %v10401_v10  ;;  %v2377_v35 = vadd.f32 %v8567_v27, %v8707_v25 }
 0x357   : > { %v8755_v12 = vpop.f32.mrb[151].mxu0  ;;  %v2522_v3 = vadd.f32 %v4521_v54, %v2361_v1  ;;  %2934 = vmatprep.mubr.bf16.mxu1 %v1705_v41  ;;  %v8765_v62 = vadd.f32 %v8561_v34, %v2519_v47  ;;  %vm10403_vm1 = vmand %vm10400_vm5, %vm10402_vm15  ;;  %v10411_v1 = vld [vmem:[#allocation37_spill] sm:$0xff] }
 0x358   : > { %vm4276_vm10 = vmpackc.low %vm10408_vm9, %vm10403_vm1 }
 0x359   : > { %v4522_v42 = vpop.f32.mrb[76].mxu1  ;;  %v8772_v18 = vadd.f32 %v8565_v51, %v2522_v3  ;;  %vm10479_vm5 = vmmov %vm10433_vm4 }
 0x35a   : > { %v4523_v38 = vpop.f32.mrb[77].mxu1  ;;  %vm10480_vm15 = vmmov %vm10433_vm4 }
 0x35b   : > { %v4524_v0 = vadd.f32 %v4523_v38, %v4522_v42  ;;  %v4525_v11 = vpop.f32.mrb[78].mxu1  ;;  %vm10481_vm1 = vmmov %vm10433_vm4 }
 0x35c   : > { %v8767_v36 = vpop.f32.mrb[152].mxu0  ;;  %v4526_v51 = vpop.f32.mrb[79].mxu1  ;;  %vm10482_vm8 = vmmov %vm10481_vm1 }
 0x35d   : > { %v8769_v7 = vpop.f32.mrb[153].mxu0  ;;  %v2527_v13 = vadd.f32 %v4524_v0, %v2366_v16  ;;  %v4527_v29 = vadd.f32 %v4526_v51, %v4525_v11  ;;  %v10412_v16 = vld [vmem:[#allocation24_spill] sm:$0xff]  ;;  %v10420_v51 = vld [vmem:[#allocation54_spill] sm:$0xff]  ;;  %vm10483_vm7 = vmmov %vm10481_vm1 }
 0x35e   : > { %v8774_v22 = vpop.f32.mrb[154].mxu0  ;;  %4278 = vmatmul.mubr.msk.bf16.gmra.mrb[184].mxu1 %vm4276_vm10, %v10410_v46  ;;  %v2374_v0 = vadd.f32 %v10412_v16, %v8707_v25  ;;  %vm10421_vm0 = vnez %v10420_v51  ;;  %v10428_v51 = vld [vmem:[#allocation28_spill] sm:$0xff]  ;;  %vm10485_vm9 = vmmov %vm10481_vm1 }
 0x35f   : > { %v8778_v34 = vpop.f32.mrb[155].mxu0  ;;  %v2530_v14 = vadd.f32 %v4527_v29, %v2369_v6  ;;  %2942 = vmatprep.mubr.bf16.mxu1 %v10411_v1  ;;  %v8795_v47 = vadd.f32 %v8571_v17, %v2527_v13  ;;  %v10413_v17 = vld [vmem:[#allocation51_spill] sm:$0xff]  ;;  %vm10422_vm13 = vmand %vm10419_vm6, %vm10421_vm0  ;;  %v10423_v29 = vld [vmem:[#allocation56_spill] sm:$0xff]  ;;  %vm3658_vm6 = vsmask.f32 7440 }
 0x360   : > { %vm10414_vm12 = vnez %v10413_v17  ;;  %vm10486_vm10 = vmmov %vm10481_vm1 }
 0x361   : > { %v4528_v50 = vpop.f32.mrb[80].mxu1  ;;  %v8802_v3 = vadd.f32 %v8575_v58, %v2530_v14  ;;  %vm10417_vm3 = vmand %vm10414_vm12, %vm10416_vm2  ;;  %v10424_v14 = vld [vmem:[#allocation49_spill] sm:$0xff] }
 0x362   : > { %v4529_v42 = vpop.f32.mrb[81].mxu1  ;;  %vm4279_vm11 = vmpackc.low %vm10422_vm13, %vm10417_vm3  ;;  %vm3657_vm3 = vsmask.f32 3328 }
 0x363   : > { %v4530_v11 = vadd.f32 %v4529_v42, %v4528_v50  ;;  %v4531_v21 = vpop.f32.mrb[82].mxu1  ;;  %vm10487_vm12 = vmmov %vm10481_vm1 }
 0x364   : > { %v8797_v54 = vpop.f32.mrb[156].mxu0  ;;  %v4532_v58 = vpop.f32.mrb[83].mxu1  ;;  %vm10489_vm2 = vmmov %vm10481_vm1 }
 0x365   : > { %v8799_v41 = vpop.f32.mrb[157].mxu0  ;;  %v2535_v6 = vadd.f32 %v4530_v11, %v2374_v0  ;;  %v4533_v13 = vadd.f32 %v4532_v58, %v4531_v21  ;;  %v2382_v0 = vadd.f32 %v8573_v32, %v8707_v25  ;;  %v2385_v58 = vadd.f32 %v10428_v51, %v8707_v25  ;;  %vm9183_vm0 = vmor %vm3657_vm3, %vm3658_vm6 }
 0x366   : > { %v8804_v38 = vpop.f32.mrb[158].mxu0  ;;  %4281 = vmatmul.mubr.msk.bf16.gmra.mrb[188].mxu1 %vm4279_vm11, %v10423_v29  ;;  %vm10492_vm13 = vmmov %vm10481_vm1 }
 0x367   : > { %v8808_v10 = vpop.f32.mrb[159].mxu0  ;;  %v2538_v46 = vadd.f32 %v4533_v13, %v2377_v35  ;;  %5012 = vmatprep.mubr.bf16.mxu1 %v10424_v14  ;;  %v8825_v1 = vadd.f32 %v8584_v49, %v2535_v6  ;;  %v10429_v13 = vld [vmem:[#allocation55_spill] sm:$0xff]  ;;  %vm10493_vm11 = vmmov %vm10481_vm1 }
 0x368   : > { %vm10504_vm3 = vmmov %vm10481_vm1 }
 0x369   : > { %v4534_v42 = vpop.f32.mrb[84].mxu1  ;;  %v8832_v17 = vadd.f32 %v8588_v44, %v2538_v46  ;;  %v10430_v44 = vld [vmem:[#allocation57_spill] sm:$0xff]  ;;  %v10432_v46 = vrot.slane %v8322_v57, 1  ;;  %v10437_v57 = vld [vmem:[#allocation27_spill] sm:$0xff] }
 0x36a   : > { %v4535_v20 = vpop.f32.mrb[85].mxu1  ;;  %v10431_v29 = vrot.slane %v10430_v44, 1 }
 0x36b   : > { %v4536_v11 = vadd.f32 %v4535_v20, %v4534_v42  ;;  %v4537_v21 = vpop.f32.mrb[86].mxu1 }
 0x36c   : > { %v8827_v50 = vpop.f32.mrb[160].mxu0  ;;  %v4538_v49 = vpop.f32.mrb[87].mxu1  ;;  %v1719_v14 = vsel %vm10433_vm4, %v10432_v46, %v10431_v29  ;;  %v10440_v46 = vld [vmem:[#allocation22_spill] sm:$0xff]  ;;  %vm10494_vm4 = vmmov %vm10481_vm1 }
 0x36d   : > { %10425 = vst [vmem:[#allocation45_spill] sm:$0xff] %v8827_v50  ;;  %v8829_v16 = vpop.f32.mrb[161].mxu0  ;;  %v2543_v35 = vadd.f32 %v4536_v11, %v2382_v0  ;;  %v4539_v6 = vadd.f32 %v4538_v49, %v4537_v21  ;;  %v2390_v49 = vadd.f32 %v10437_v57, %v8707_v25 }
 0x36e   : > { %v8834_v27 = vpop.f32.mrb[162].mxu0  ;;  %5013 = vmatmul.mubr.bf16.vlgmr.msra.gmra.mrb[192].mxu1 %v10429_v13 }
 0x36f   : > { %10426 = vst [vmem:[#allocation46_spill] sm:$0xff] %v8834_v27  ;;  %v8838_v63 = vpop.f32.mrb[163].mxu0  ;;  %v2546_v27 = vadd.f32 %v4539_v6, %v2385_v58  ;;  %5016 = vmatprep.mubr.bf16.mxu1 %v1719_v14  ;;  %v8849_v32 = vadd.f32 %v8596_v43, %v2543_v35  ;;  %v10439_v35 = vld [vmem:[#allocation31_spill] sm:$0xff] }
 0x370   : > { %10427 = vst [vmem:[#allocation48_spill] sm:$0xff] %v8838_v63  ;;  %v2393_v13 = vadd.f32 %v10439_v35, %v8707_v25  ;;  %v10449_v63 = vld [vmem:[#allocation38_spill] sm:$0xff] }
 0x371   : > { %v4540_v20 = vpop.f32.mrb[88].mxu1  ;;  %v8856_v0 = vadd.f32 %v8600_v45, %v2546_v27 }
 0x372   : > { %v4541_v11 = vpop.f32.mrb[89].mxu1 }
 0x373   : > { %v4542_v51 = vadd.f32 %v4541_v11, %v4540_v20  ;;  %v4543_v58 = vpop.f32.mrb[90].mxu1 }
 0x374   : > { %v8851_v42 = vpop.f32.mrb[164].mxu0  ;;  %v4544_v43 = vpop.f32.mrb[91].mxu1 }
 0x375   : > { %10434 = vst [vmem:[#allocation47_spill] sm:$0xff] %v8851_v42  ;;  %v8853_v50 = vpop.f32.mrb[165].mxu0  ;;  %v2551_v44 = vadd.f32 %v4542_v51, %v2390_v49  ;;  %v4545_v29 = vadd.f32 %v4544_v43, %v4543_v58  ;;  %v10444_v49 = vld [vmem:[#allocation30_spill] sm:$0xff] }
 0x376   : > { %10435 = vst [vmem:[#allocation25_spill] sm:$0xff] %v8853_v50  ;;  %v8858_v21 = vpop.f32.mrb[166].mxu0  ;;  %5017 = vmatmul.mubr.bf16.gmra.mrb[196].mxu1 %v10440_v46  ;;  %v2398_v51 = vadd.f32 %v10444_v49, %v8707_v25 }
 0x377   : > { %10436 = vst [vmem:[#allocation50_spill] sm:$0xff] %v8858_v21  ;;  %v8862_v6 = vpop.f32.mrb[167].mxu0  ;;  %v2554_v45 = vadd.f32 %v4545_v29, %v2393_v13  ;;  %v8868_v27 = vadd.f32 %v8608_v8, %v2551_v44  ;;  %v10446_v13 = vld [vmem:[#allocation34_spill] sm:$0xff] }
 0x378   : > { %10438 = vst [vmem:[#allocation37_spill] sm:$0xff] %v8862_v6  ;;  %v2401_v44 = vadd.f32 %v10446_v13, %v8707_v25  ;;  %v2409_v13 = vadd.f32 %v10449_v63, %v8707_v25 }
 0x379   : > { %v4546_v21 = vpop.f32.mrb[92].mxu1  ;;  %v8875_v20 = vadd.f32 %v8612_v53, %v2554_v45 }
 0x37a   : > { %v4547_v11 = vpop.f32.mrb[93].mxu1 }
 0x37b   : > { %v4548_v58 = vadd.f32 %v4547_v11, %v4546_v21  ;;  %v4549_v43 = vpop.f32.mrb[94].mxu1  ;;  %v10448_v21 = vld [vmem:[#allocation33_spill] sm:$0xff] }
 0x37c   : > { %v8870_v14 = vpop.f32.mrb[168].mxu0  ;;  %v4550_v8 = vpop.f32.mrb[95].mxu1  ;;  %v2406_v11 = vadd.f32 %v10448_v21, %v8707_v25  ;;  %v10451_v21 = vld [vmem:[#allocation42_spill] sm:$0xff] }
 0x37d   : > { %10441 = vst [vmem:[#allocation24_spill] sm:$0xff] %v8870_v14  ;;  %v8872_v57 = vpop.f32.mrb[169].mxu0  ;;  %v2559_v29 = vadd.f32 %v4548_v58, %v2398_v51  ;;  %v4551_v46 = vadd.f32 %v4550_v8, %v4549_v43  ;;  %v2417_v63 = vadd.f32 %v10451_v21, %v8707_v25 }
 0x37e   : > { %10442 = vst [vmem:[#allocation51_spill] sm:$0xff] %v8872_v57  ;;  %v8877_v42 = vpop.f32.mrb[170].mxu0  ;;  %v10447_v57 = vld [vmem:[#allocation36_spill] sm:$0xff] }
 0x37f   : > { %10443 = vst [vmem:[#allocation52_spill] sm:$0xff] %v8877_v42  ;;  %v8881_v35 = vpop.f32.mrb[171].mxu0  ;;  %v2562_v14 = vadd.f32 %v4551_v46, %v2401_v44  ;;  %v8886_v53 = vadd.f32 %v10447_v57, %v2559_v29  ;;  %v10450_v44 = vld [vmem:[#allocation40_spill] sm:$0xff] }
 0x380   : > { %10445 = vst [vmem:[#allocation53_spill] sm:$0xff] %v8881_v35  ;;  %v2414_v29 = vadd.f32 %v10450_v44, %v8707_v25  ;;  %v10453_v44 = vld [vmem:[#allocation21_spill] sm:$0xff] }
 0x381   : > { %v4552_v45 = vpop.f32.mrb[96].mxu1  ;;  %v8889_v42 = vadd.f32 %v8624_v60, %v2562_v14  ;;  %v2425_v21 = vadd.f32 %v10453_v44, %v8707_v25 }
 0x382   : > { %v4553_v6 = vpop.f32.mrb[97].mxu1 }
 0x383   : > { %v4554_v49 = vadd.f32 %v4553_v6, %v4552_v45  ;;  %v4555_v35 = vpop.f32.mrb[98].mxu1 }
 0x384   : > { %v4556_v50 = vpop.f32.mrb[99].mxu1 }
 0x385   : > { %v2567_v51 = vadd.f32 %v4554_v49, %v2406_v11  ;;  %v4557_v58 = vadd.f32 %v4556_v50, %v4555_v35 }
 0x387   : > { %v2570_v43 = vadd.f32 %v4557_v58, %v2409_v13  ;;  %v8896_v57 = vadd.f32 %v8632_v26, %v2567_v51  ;;  %v10452_v51 = vld [vmem:[#allocation20_spill] sm:$0xff] }
 0x388   : > { %v2422_v58 = vadd.f32 %v10452_v51, %v8707_v25  ;;  %v10455_v51 = vld [vmem:[#allocation26_spill] sm:$0xff] }
 0x389   : > { %v4558_v8 = vpop.f32.mrb[100].mxu1  ;;  %v8899_v60 = vadd.f32 %v8636_v52, %v2570_v43  ;;  %v2433_v44 = vadd.f32 %v10455_v51, %v8707_v25 }
 0x38a   : > { %v4559_v14 = vpop.f32.mrb[101].mxu1 }
 0x38b   : > { %v4560_v6 = vadd.f32 %v4559_v14, %v4558_v8  ;;  %v4561_v46 = vpop.f32.mrb[102].mxu1 }
 0x38c   : > { %v4562_v45 = vpop.f32.mrb[103].mxu1 }
 0x38d   : > { %v2575_v11 = vadd.f32 %v4560_v6, %v2414_v29  ;;  %v4563_v50 = vadd.f32 %v4562_v45, %v4561_v46 }
 0x38f   : > { %v2578_v35 = vadd.f32 %v4563_v50, %v2417_v63  ;;  %v8906_v26 = vadd.f32 %v8644_v19, %v2575_v11  ;;  %v10454_v11 = vld [vmem:[#allocation23_spill] sm:$0xff] }
 0x390   : > { %v2430_v50 = vadd.f32 %v10454_v11, %v8707_v25  ;;  %v10457_v11 = vld [vmem:[#allocation32_spill] sm:$0xff] }
 0x391   : > { %v4564_v49 = vpop.f32.mrb[104].mxu1  ;;  %v8909_v52 = vadd.f32 %v8648_v56, %v2578_v35  ;;  %v2441_v51 = vadd.f32 %v10457_v11, %v8707_v25 }
 0x392   : > { %v4565_v13 = vpop.f32.mrb[105].mxu1 }
 0x393   : > { %v4566_v43 = vadd.f32 %v4565_v13, %v4564_v49  ;;  %v4567_v8 = vpop.f32.mrb[106].mxu1 }
 0x394   : > { %v4568_v14 = vpop.f32.mrb[107].mxu1 }
 0x395   : > { %v2583_v29 = vadd.f32 %v4566_v43, %v2422_v58  ;;  %v4569_v6 = vadd.f32 %v4568_v14, %v4567_v8 }
 0x397   : > { %v2586_v46 = vadd.f32 %v4569_v6, %v2425_v21  ;;  %v8916_v19 = vadd.f32 %v8656_v40, %v2583_v29  ;;  %v10456_v29 = vld [vmem:[#allocation29_spill] sm:$0xff] }
 0x398   : > { %v2438_v6 = vadd.f32 %v10456_v29, %v8707_v25  ;;  %v2449_v29 = vadd.f32 %v8674_v61, %v8707_v25 }
 0x399   : > { %v4570_v45 = vpop.f32.mrb[108].mxu1  ;;  %v8919_v56 = vadd.f32 %v8660_v37, %v2586_v46 }
 0x39a   : > { %v4571_v63 = vpop.f32.mrb[109].mxu1 }
 0x39b   : > { %v4572_v35 = vadd.f32 %v4571_v63, %v4570_v45  ;;  %v4573_v49 = vpop.f32.mrb[110].mxu1 }
 0x39c   : > { %v4574_v13 = vpop.f32.mrb[111].mxu1 }
 0x39d   : > { %v2591_v58 = vadd.f32 %v4572_v35, %v2430_v50  ;;  %v4575_v43 = vadd.f32 %v4574_v13, %v4573_v49 }
 0x39f   : > { %v2594_v8 = vadd.f32 %v4575_v43, %v2433_v44  ;;  %v8926_v40 = vadd.f32 %v8668_v4, %v2591_v58  ;;  %v10459_v58 = vld [vmem:[#allocation35_spill] sm:$0xff] }
 0x3a0   : > { %v2446_v43 = vadd.f32 %v10459_v58, %v8707_v25 }
 0x3a1   : > { %v4576_v14 = vpop.f32.mrb[112].mxu1  ;;  %v8929_v37 = vadd.f32 %v8672_v15, %v2594_v8 }
 0x3a2   : > { %v4577_v21 = vpop.f32.mrb[113].mxu1 }
 0x3a3   : > { %v4578_v46 = vadd.f32 %v4577_v21, %v4576_v14  ;;  %v4579_v45 = vpop.f32.mrb[114].mxu1 }
 0x3a4   : > { %v4580_v63 = vpop.f32.mrb[115].mxu1 }
 0x3a5   : > { %v2599_v50 = vadd.f32 %v4578_v46, %v2438_v6  ;;  %v4581_v35 = vadd.f32 %v4580_v63, %v4579_v45  ;;  %v10460_v63 = vld [vmem:[#allocation43_spill] sm:$0xff] }
 0x3a7   : > { %v2602_v49 = vadd.f32 %v4581_v35, %v2441_v51  ;;  %v8936_v4 = vadd.f32 %v8680_v28, %v2599_v50  ;;  %v10461_v51 = vld [vmem:[#allocation58_spill] sm:$0xff]  ;;  %v10462_v35 = vld [vmem:[#allocation39_spill] sm:$0xff] }
 0x3a9   : > { %v4582_v13 = vpop.f32.mrb[116].mxu1  ;;  %v8939_v15 = vadd.f32 %v8684_v24, %v2602_v49  ;;  %v2454_v49 = vadd.f32 %v10462_v35, %v8707_v25  ;;  %v10465_v35 = vld [vmem:[#allocation59_spill] sm:$0xff] }
 0x3aa   : > { %v4583_v44 = vpop.f32.mrb[117].mxu1 }
 0x3ab   : > { %10458 = vst [vmem:[#allocation54_spill] sm:$0xff] %v8939_v15  ;;  %v4584_v8 = vadd.f32 %v4583_v44, %v4582_v13  ;;  %v4585_v14 = vpop.f32.mrb[118].mxu1  ;;  %v10463_v15 = vld [vmem:[#allocation41_spill] sm:$0xff] }
 0x3ac   : > { %v4586_v21 = vpop.f32.mrb[119].mxu1  ;;  %v2457_v61 = vadd.f32 %v10463_v15, %v8707_v25  ;;  %v2465_v15 = vadd.f32 %v10465_v35, %v8707_v25 }
 0x3ad   : > { %v2607_v6 = vadd.f32 %v4584_v8, %v2446_v43  ;;  %v4587_v46 = vadd.f32 %v4586_v21, %v4585_v14 }
 0x3af   : > { %v2610_v45 = vadd.f32 %v4587_v46, %v2449_v29  ;;  %v8946_v28 = vadd.f32 %v10460_v63, %v2607_v6 }
 0x3b1   : > { %v4588_v11 = vpop.f32.mrb[120].mxu1  ;;  %v8949_v24 = vadd.f32 %v10461_v51, %v2610_v45  ;;  %v10464_v45 = vld [vmem:[#allocation44_spill] sm:$0xff] }
 0x3b2   : > { %v4589_v50 = vpop.f32.mrb[121].mxu1  ;;  %v2462_v63 = vadd.f32 %v10464_v45, %v8707_v25 }
 0x3b3   : > { %v4590_v13 = vadd.f32 %v4589_v50, %v4588_v11  ;;  %v4591_v44 = vpop.f32.mrb[122].mxu1 }
 0x3b4   : > { %v4592_v58 = vpop.f32.mrb[123].mxu1 }
 0x3b5   : > { %v2615_v43 = vadd.f32 %v4590_v13, %v2454_v49  ;;  %v4593_v8 = vadd.f32 %v4592_v58, %v4591_v44 }
 0x3b7   : > { %v2618_v14 = vadd.f32 %v4593_v8, %v2457_v61  ;;  %v8956_v21 = vadd.f32 %v8709_v39, %v2615_v43 }
 0x3b9   : > { %v4594_v29 = vpop.f32.mrb[124].mxu1  ;;  %v8959_v6 = vadd.f32 %v8713_v48, %v2618_v14 }
 0x3ba   : > { %v4595_v46 = vpop.f32.mrb[125].mxu1 }
 0x3bb   : > { %v4596_v11 = vadd.f32 %v4595_v46, %v4594_v29  ;;  %v4597_v51 = vpop.f32.mrb[126].mxu1 }
 0x3bc   : > { %v4598_v50 = vpop.f32.mrb[127].mxu1 }
 0x3bd   : > { %v2623_v49 = vadd.f32 %v4596_v11, %v2462_v63  ;;  %v4599_v13 = vadd.f32 %v4598_v50, %v4597_v51 }
 0x3bf   : > { %v2626_v44 = vadd.f32 %v4599_v13, %v2465_v15  ;;  %v8966_v39 = vadd.f32 %v8727_v55, %v2623_v49 }
 0x3c1   : > { %v4728_v58 = vpop.f32.mrb[128].mxu1  ;;  %v8969_v48 = vadd.f32 %v8731_v5, %v2626_v44 }
 0x3c2   : > { %v4729_v61 = vpop.f32.mrb[129].mxu1 }
 0x3c3   : > { %v4730_v43 = vadd.f32 %v4729_v61, %v4728_v58  ;;  %v4731_v8 = vpop.f32.mrb[130].mxu1 }
 0x3c4   : > { %v4732_v14 = vpop.f32.mrb[131].mxu1 }
 0x3c5   : > { %v2825_v29 = vadd.f32 %v4730_v43, %v8722_v9  ;;  %v4733_v46 = vadd.f32 %v4732_v14, %v4731_v8 }
 0x3c7   : > { %v2986_v45 = vadd.f32 %v8745_v31, %v2825_v29  ;;  %v2828_v25 = vadd.f32 %v4733_v46, %v8725_v30 }
 0x3c9   : > { %v2989_v63 = vadd.f32 %v8755_v12, %v2828_v25  ;;  %v4734_v11 = vpop.f32.mrb[132].mxu1  ;;  %v3112_v51 = vmax.f32 %v2986_v45, 0.0 }
 0x3ca   : > { %v4735_v55 = vpop.f32.mrb[133].mxu1 }
 0x3cb   : > { %v3113_v50 = vmax.f32 %v2989_v63, 0.0  ;;  %v4736_v35 = vadd.f32 %v4735_v55, %v4734_v11  ;;  %v4737_v5 = vpop.f32.mrb[134].mxu1 }
 0x3cc   : > { %v4738_v15 = vpop.f32.mrb[135].mxu1 }
 0x3cd   : > { %v2833_v49 = vadd.f32 %v4736_v35, %v8741_v59  ;;  %v4739_v13 = vadd.f32 %v4738_v15, %v4737_v5  ;;  %v3144_v44 = vpack.c.bf16 %v3113_v50, %v3112_v51 }
 0x3cf   : > { %v2994_v9 = vadd.f32 %v8743_v33, %v2833_v49  ;;  %v2836_v58 = vadd.f32 %v4739_v13, %v8748_v2  ;;  %5036 = vmatprep.mubr.bf16.mxu0 %v3144_v44 }
 0x3d1   : > { %v2997_v30 = vadd.f32 %v8750_v23, %v2836_v58  ;;  %v4740_v31 = vpop.f32.mrb[136].mxu1  ;;  %v3114_v61 = vmax.f32 %v2994_v9, 0.0 }
 0x3d2   : > { %v4741_v12 = vpop.f32.mrb[137].mxu1 }
 0x3d3   : > { %v3115_v43 = vmax.f32 %v2997_v30, 0.0  ;;  %v4742_v8 = vadd.f32 %v4741_v12, %v4740_v31  ;;  %v4743_v14 = vpop.f32.mrb[138].mxu1 }
 0x3d4   : > { %v4744_v29 = vpop.f32.mrb[139].mxu1 }
 0x3d5   : > { %v3145_v46 = vpack.c.bf16 %v3115_v43, %v3114_v61  ;;  %v2841_v45 = vadd.f32 %v4742_v8, %v8765_v62  ;;  %v4745_v59 = vadd.f32 %v4744_v29, %v4743_v14 }
 0x3d7   : > { %v3002_v25 = vadd.f32 %v8769_v7, %v2841_v45  ;;  %v2844_v33 = vadd.f32 %v4745_v59, %v8772_v18  ;;  %5037 = vmatmul.mubr.bf16.vlgmr.msra.gmra.mrb[172].mxu0 %v3145_v46 }
 0x3d9   : > { %v3005_v2 = vadd.f32 %v8778_v34, %v2844_v33  ;;  %v4746_v63 = vpop.f32.mrb[140].mxu1  ;;  %v3116_v11 = vmax.f32 %v3002_v25, 0.0 }
 0x3da   : > { %v4747_v23 = vpop.f32.mrb[141].mxu1 }
 0x3db   : > { %v3117_v55 = vmax.f32 %v3005_v2, 0.0  ;;  %v4748_v51 = vadd.f32 %v4747_v23, %v4746_v63  ;;  %v4749_v50 = vpop.f32.mrb[142].mxu1 }
 0x3dc   : > { %v4750_v35 = vpop.f32.mrb[143].mxu1 }
 0x3dd   : > { %v2849_v5 = vadd.f32 %v4748_v51, %v8795_v47  ;;  %v4751_v15 = vadd.f32 %v4750_v35, %v4749_v50  ;;  %v3146_v49 = vpack.c.bf16 %v3117_v55, %v3116_v11 }
 0x3df   : > { %v3010_v62 = vadd.f32 %v8767_v36, %v2849_v5  ;;  %v2852_v7 = vadd.f32 %v4751_v15, %v8802_v3  ;;  %5040 = vmatprep.mubr.bf16.mxu0 %v3146_v49 }
 0x3e1   : > { %v3013_v18 = vadd.f32 %v8774_v22, %v2852_v7  ;;  %v4752_v13 = vpop.f32.mrb[144].mxu1  ;;  %v3118_v44 = vmax.f32 %v3010_v62, 0.0 }
 0x3e2   : > { %v4753_v34 = vpop.f32.mrb[145].mxu1 }
 0x3e3   : > { %v3119_v9 = vmax.f32 %v3013_v18, 0.0  ;;  %v4754_v58 = vadd.f32 %v4753_v34, %v4752_v13  ;;  %v4755_v30 = vpop.f32.mrb[146].mxu1 }
 0x3e4   : > { %v4756_v31 = vpop.f32.mrb[147].mxu1 }
 0x3e5   : > { %v2857_v12 = vadd.f32 %v4754_v58, %v8825_v1  ;;  %v4757_v61 = vadd.f32 %v4756_v31, %v4755_v30  ;;  %v3147_v47 = vpack.c.bf16 %v3119_v9, %v3118_v44  ;;  %v10467_v30 = vld [vmem:[#allocation45_spill] sm:$0xff] }
 0x3e7   : > { %v3018_v43 = vadd.f32 %v8799_v41, %v2857_v12  ;;  %v2860_v36 = vadd.f32 %v4757_v61, %v8832_v17  ;;  %5041 = vmatmul.mubr.bf16.gmra.mrb[176].mxu0 %v3147_v47 }
 0x3e9   : > { %v3021_v3 = vadd.f32 %v8808_v10, %v2860_v36  ;;  %v4758_v8 = vpop.f32.mrb[148].mxu1  ;;  %v3120_v14 = vmax.f32 %v3018_v43, 0.0 }
 0x3ea   : > { %v4759_v22 = vpop.f32.mrb[149].mxu1 }
 0x3eb   : > { %v3121_v29 = vmax.f32 %v3021_v3, 0.0  ;;  %v4760_v46 = vadd.f32 %v4759_v22, %v4758_v8  ;;  %v4761_v45 = vpop.f32.mrb[150].mxu1 }
 0x3ec   : > { %v4762_v59 = vpop.f32.mrb[151].mxu1 }
 0x3ed   : > { %v2865_v25 = vadd.f32 %v4760_v46, %v8849_v32  ;;  %v4763_v33 = vadd.f32 %v4762_v59, %v4761_v45  ;;  %v3148_v1 = vpack.c.bf16 %v3121_v29, %v3120_v14  ;;  %v10469_v46 = vld [vmem:[#allocation25_spill] sm:$0xff] }
 0x3ef   : > { %v3026_v2 = vadd.f32 %v8797_v54, %v2865_v25  ;;  %v2868_v41 = vadd.f32 %v4763_v33, %v8856_v0  ;;  %5044 = vmatprep.mubr.bf16.mxu0 %v3148_v1  ;;  %v10466_v0 = vld [vmem:[#allocation48_spill] sm:$0xff] }
 0x3f1   : > { %v3029_v17 = vadd.f32 %v8804_v38, %v2868_v41  ;;  %v4764_v63 = vpop.f32.mrb[152].mxu1  ;;  %v3122_v23 = vmax.f32 %v3026_v2, 0.0 }
 0x3f2   : > { %v4765_v10 = vpop.f32.mrb[153].mxu1 }
 0x3f3   : > { %v3123_v11 = vmax.f32 %v3029_v17, 0.0  ;;  %v4766_v55 = vadd.f32 %v4765_v10, %v4764_v63  ;;  %v4767_v51 = vpop.f32.mrb[154].mxu1 }
 0x3f4   : > { %v4768_v50 = vpop.f32.mrb[155].mxu1 }
 0x3f5   : > { %v2873_v35 = vadd.f32 %v4766_v55, %v8868_v27  ;;  %v4769_v5 = vadd.f32 %v4768_v50, %v4767_v51  ;;  %v3149_v32 = vpack.c.bf16 %v3123_v11, %v3122_v23  ;;  %v10471_v55 = vld [vmem:[#allocation47_spill] sm:$0xff] }
 0x3f7   : > { %v3034_v15 = vadd.f32 %v8829_v16, %v2873_v35  ;;  %v2876_v54 = vadd.f32 %v4769_v5, %v8875_v20  ;;  %5045 = vmatmul.mubr.bf16.gmra.mrb[180].mxu0 %v3149_v32  ;;  %v10468_v20 = vld [vmem:[#allocation46_spill] sm:$0xff] }
 0x3f9   : > { %v3037_v49 = vadd.f32 %v10466_v0, %v2876_v54  ;;  %v4770_v62 = vpop.f32.mrb[156].mxu1  ;;  %v3124_v7 = vmax.f32 %v3034_v15, 0.0 }
 0x3fa   : > { %v4771_v38 = vpop.f32.mrb[157].mxu1 }
 0x3fb   : > { %v3125_v18 = vmax.f32 %v3037_v49, 0.0  ;;  %v4772_v13 = vadd.f32 %v4771_v38, %v4770_v62  ;;  %v4773_v34 = vpop.f32.mrb[158].mxu1 }
 0x3fc   : > { %v4774_v44 = vpop.f32.mrb[159].mxu1 }
 0x3fd   : > { %v2881_v9 = vadd.f32 %v4772_v13, %v8886_v53  ;;  %v4775_v58 = vadd.f32 %v4774_v44, %v4773_v34  ;;  %v3150_v27 = vpack.c.bf16 %v3125_v18, %v3124_v7  ;;  %v10473_v18 = vld [vmem:[#allocation51_spill] sm:$0xff] }
 0x3ff   : > { %v3042_v31 = vadd.f32 %v10467_v30, %v2881_v9  ;;  %v2884_v16 = vadd.f32 %v4775_v58, %v8889_v42  ;;  %5048 = vmatprep.mubr.bf16.mxu0 %v3150_v27  ;;  %v10470_v42 = vld [vmem:[#allocation37_spill] sm:$0xff] }
 0x401   : > { %v3045_v12 = vadd.f32 %v10468_v20, %v2884_v16  ;;  %v4776_v61 = vpop.f32.mrb[160].mxu1  ;;  %v3126_v43 = vmax.f32 %v3042_v31, 0.0 }
 0x402   : > { %v4777_v47 = vpop.f32.mrb[161].mxu1 }
 0x403   : > { %v3127_v36 = vmax.f32 %v3045_v12, 0.0  ;;  %v4778_v3 = vadd.f32 %v4777_v47, %v4776_v61  ;;  %v4779_v8 = vpop.f32.mrb[162].mxu1  ;;  %v10475_v47 = vld [vmem:[#allocation24_spill] sm:$0xff] }
 0x404   : > { %v4780_v22 = vpop.f32.mrb[163].mxu1 }
 0x405   : > { %v2889_v14 = vadd.f32 %v4778_v3, %v8896_v57  ;;  %v4781_v29 = vadd.f32 %v4780_v22, %v4779_v8  ;;  %v3151_v53 = vpack.c.bf16 %v3127_v36, %v3126_v43 }
 0x407   : > { %v3050_v45 = vadd.f32 %v10469_v46, %v2889_v14  ;;  %v2892_v59 = vadd.f32 %v4781_v29, %v8899_v60  ;;  %5049 = vmatmul.mubr.bf16.gmra.mrb[184].mxu0 %v3151_v53  ;;  %v10472_v60 = vld [vmem:[#allocation50_spill] sm:$0xff] }
 0x409   : > { %v3053_v25 = vadd.f32 %v10470_v42, %v2892_v59  ;;  %v4782_v33 = vpop.f32.mrb[164].mxu1  ;;  %v3128_v2 = vmax.f32 %v3050_v45, 0.0 }
 0x40a   : > { %v4783_v1 = vpop.f32.mrb[165].mxu1 }
 0x40b   : > { %v3129_v41 = vmax.f32 %v3053_v25, 0.0  ;;  %v4784_v17 = vadd.f32 %v4783_v1, %v4782_v33  ;;  %v4785_v63 = vpop.f32.mrb[166].mxu1  ;;  %v10477_v25 = vld [vmem:[#allocation54_spill] sm:$0xff] }
 0x40c   : > { %v4786_v10 = vpop.f32.mrb[167].mxu1 }
 0x40d   : > { %v2897_v23 = vadd.f32 %v4784_v17, %v8906_v26  ;;  %v4787_v11 = vadd.f32 %v4786_v10, %v4785_v63  ;;  %v3152_v57 = vpack.c.bf16 %v3129_v41, %v3128_v2  ;;  %v9022_v63 = vld [vmem:[%s5951_s14 + $0x10] sm:$0xff]  }
 0x40e   : > { %v3385_v10 = vunpack.c.h.bf16 %v9022_v63 }
 0x40f   : > { %v3058_v51 = vadd.f32 %v10471_v55, %v2897_v23  ;;  %v2900_v50 = vadd.f32 %v4787_v11, %v8909_v52  ;;  %5052 = vmatprep.mubr.bf16.mxu0 %v3152_v57  ;;  %v10474_v52 = vld [vmem:[#allocation53_spill] sm:$0xff] }
 0x410   : > { %v9026_v23 = vld [vmem:[%s5951_s14 + $0x18] sm:$0xff]  }
 0x411   : > { %v3061_v35 = vadd.f32 %v10472_v60, %v2900_v50  ;;  %v4788_v5 = vpop.f32.mrb[168].mxu1  ;;  %v3130_v15 = vmax.f32 %v3058_v51, 0.0  ;;  %v3386_v11 = vunpack.c.l.bf16 %v9026_v23  ;;  %v9031_v51 = vrot.slane %v3385_v10, 1 }
 0x412   : > { %v4789_v32 = vpop.f32.mrb[169].mxu1 }
 0x413   : > { %v3131_v54 = vmax.f32 %v3061_v35, 0.0  ;;  %v4790_v0 = vadd.f32 %v4789_v32, %v4788_v5  ;;  %v4791_v49 = vpop.f32.mrb[170].mxu1  ;;  %v9033_v50 = vrot.slane %v3386_v11, 1 }
 0x414   : > { %v4792_v62 = vpop.f32.mrb[171].mxu1 }
 0x415   : > { %v2905_v38 = vadd.f32 %v4790_v0, %v8916_v19  ;;  %v4793_v7 = vadd.f32 %v4792_v62, %v4791_v49  ;;  %v3153_v26 = vpack.c.bf16 %v3131_v54, %v3130_v15  ;;  %v9038_v15 = vsel %vm10478_vm14, %v9031_v51, %v9033_v50  ;;  %vm10495_vm14 = vmmov %vm10481_vm1 }
 0x417   : > { %v3066_v13 = vadd.f32 %v10473_v18, %v2905_v38  ;;  %v2908_v34 = vadd.f32 %v4793_v7, %v8919_v56  ;;  %5053 = vmatmul.mubr.bf16.gmra.mrb[188].mxu0 %v3153_v26  ;;  %v10476_v56 = vld [vmem:[#allocation52_spill] sm:$0xff]  ;;  %v9043_v18 = vld [vmem:[%s5951_s14 + $0x20] sm:$0xff]  }
 0x419   : > { %v3069_v44 = vadd.f32 %v10474_v52, %v2908_v34  ;;  %v4794_v9 = vpop.f32.mrb[172].mxu1  ;;  %v3132_v27 = vmax.f32 %v3066_v13, 0.0  ;;  %v3389_v13 = vunpack.c.h.bf16 %v9043_v18  ;;  %v9047_v34 = vld [vmem:[%s5951_s14 + $0x28] sm:$0xff]  }
 0x41a   : > { %v4795_v58 = vpop.f32.mrb[173].mxu1  ;;  %v3390_v52 = vunpack.c.l.bf16 %v9047_v34 }
 0x41b   : > { %v3133_v30 = vmax.f32 %v3069_v44, 0.0  ;;  %v4796_v31 = vadd.f32 %v4795_v58, %v4794_v9  ;;  %v4797_v16 = vpop.f32.mrb[174].mxu1  ;;  %v9052_v58 = vrot.slane %v3389_v13, 1  ;;  %v9113_v13 = vld [vmem:[%s5951_s14 + $0x60] sm:$0xff]  }
 0x41c   : > { %v4798_v20 = vpop.f32.mrb[175].mxu1 }
 0x41d   : > { %v2913_v12 = vadd.f32 %v4796_v31, %v8926_v40  ;;  %v4799_v61 = vadd.f32 %v4798_v20, %v4797_v16  ;;  %v3154_v19 = vpack.c.bf16 %v3133_v30, %v3132_v27 }
 0x41f   : > { %v3074_v43 = vadd.f32 %v10475_v47, %v2913_v12  ;;  %v2916_v36 = vadd.f32 %v4799_v61, %v8929_v37  ;;  %5056 = vmatprep.mubr.bf16.mxu0 %v3154_v19 }
 0x421   : > { %v3077_v3 = vadd.f32 %v10476_v56, %v2916_v36  ;;  %v4800_v8 = vpop.f32.mrb[176].mxu1  ;;  %v3134_v14 = vmax.f32 %v3074_v43, 0.0 }
 0x422   : > { %v4801_v22 = vpop.f32.mrb[177].mxu1 }
 0x423   : > { %v3135_v29 = vmax.f32 %v3077_v3, 0.0  ;;  %v4802_v53 = vadd.f32 %v4801_v22, %v4800_v8  ;;  %v4803_v46 = vpop.f32.mrb[178].mxu1 }
 0x424   : > { %v4804_v45 = vpop.f32.mrb[179].mxu1 }
 0x425   : > { %v4805_v59 = vadd.f32 %v4804_v45, %v4803_v46  ;;  %v3155_v40 = vpack.c.bf16 %v3135_v29, %v3134_v14  ;;  %v2921_v42 = vadd.f32 %v4802_v53, %v8936_v4 }
 0x427   : > { %5057 = vmatmul.mubr.bf16.gmra.mrb[192].mxu0 %v3155_v40  ;;  %v2924_v33 = vadd.f32 %v4805_v59, %v10477_v25  ;;  %v9062_v59 = vld [vmem:[%s5951_s14 + $0x30] sm:$0xff]  }
 0x428   : > { %v3393_v40 = vunpack.c.h.bf16 %v9062_v59 }
 0x429   : > { %v4806_v37 = vpop.f32.mrb[180].mxu1 }
 0x42a   : > { %v4807_v1 = vpop.f32.mrb[181].mxu1  ;;  %v9069_v10 = vrot.slane %v3393_v40, 1 }
 0x42b   : > { %v4808_v2 = vadd.f32 %v4807_v1, %v4806_v37  ;;  %v4809_v41 = vpop.f32.mrb[182].mxu1 }
 0x42c   : > { %v4810_v17 = vpop.f32.mrb[183].mxu1 }
 0x42d   : > { %v4811_v57 = vadd.f32 %v4810_v17, %v4809_v41  ;;  %v2929_v55 = vadd.f32 %v4808_v2, %v8946_v28 }
 0x42f   : > { %v2932_v4 = vadd.f32 %v4811_v57, %v8949_v24 }
 0x431   : > { %v4812_v60 = vpop.f32.mrb[184].mxu1 }
 0x432   : > { %v4813_v35 = vpop.f32.mrb[185].mxu1 }
 0x433   : > { %v4814_v5 = vadd.f32 %v4813_v35, %v4812_v60  ;;  %v4815_v32 = vpop.f32.mrb[186].mxu1  ;;  %v9083_v35 = vld [vmem:[%s5951_s14 + $0x48] sm:$0xff]  }
 0x434   : > { %v4816_v54 = vpop.f32.mrb[187].mxu1 }
 0x435   : > { %v4817_v0 = vadd.f32 %v4816_v54, %v4815_v32  ;;  %v2937_v28 = vadd.f32 %v4814_v5, %v8956_v21  ;;  %v3398_v5 = vunpack.c.l.bf16 %v9083_v35 }
 0x437   : > { %v2940_v24 = vadd.f32 %v4817_v0, %v8959_v6  ;;  %v9054_v6 = vrot.slane %v3390_v52, 1  ;;  %v9088_v54 = vrot.slane %v3398_v5, 1  ;;  %v3405_v52 = vunpack.c.h.bf16 %v9113_v13 }
 0x438   : > { %v3391_v5 = vunpack.c.h.bf16 %v9047_v34 }
 0x439   : > { %v4818_v49 = vpop.f32.mrb[188].mxu1  ;;  %v9059_v12 = vsel %vm10479_vm5, %v9052_v58, %v9054_v6  ;;  %vm10496_vm5 = vmmov %vm10481_vm1 }
 0x43a   : > { %v4819_v62 = vpop.f32.mrb[189].mxu1 }
 0x43b   : > { %v4820_v38 = vadd.f32 %v4819_v62, %v4818_v49  ;;  %v4821_v7 = vpop.f32.mrb[190].mxu1  ;;  %v9100_v49 = vld [vmem:[%s5951_s14 + $0x58] sm:$0xff]  }
 0x43c   : > { %v4822_v26 = vpop.f32.mrb[191].mxu1  ;;  %v3402_v62 = vunpack.c.l.bf16 %v9100_v49 }
 0x43d   : > { %v4823_v44 = vadd.f32 %v4822_v26, %v4821_v7  ;;  %v2945_v9 = vadd.f32 %v4820_v38, %v8966_v39 }
 0x43e   : > { %v9105_v7 = vrot.slane %v3402_v62, 1 }
 0x43f   : > { %v2948_v21 = vadd.f32 %v4823_v44, %v8969_v48  ;;  %v9117_v44 = vld [vmem:[%s5951_s14 + $0x68] sm:$0xff]  }
 0x441   : > { %v5014_v27 = vpop.f32.mrb[192].mxu1 }
 0x442   : > { %v3090_v30 = vadd.f32 %v5014_v27, %v2929_v55  ;;  %v3081_v31 = vpop.f32.mrb[193].mxu1 }
 0x443   : > { %v3082_v16 = vadd.f32 %v3081_v31, %v2921_v42  ;;  %v5015_v20 = vpop.f32.mrb[194].mxu1  ;;  %v9066_v42 = vld [vmem:[%s5951_s14 + $0x38] sm:$0xff]   ;;  %v3387_v31 = vunpack.c.h.bf16 %v9026_v23  ;;  %v9146_v23 = vld [vmem:[%s10484_s13] ss:$0 sm:$0xff]  ;;  %s5630_s13 = smov [#allocation10]  }
 0x444   : > { %v3093_v61 = vadd.f32 %v5015_v20, %v2932_v4  ;;  %v3084_v19 = vpop.f32.mrb[195].mxu1  ;;  %v3138_v39 = vmax.f32 %v3090_v30, 0.0  ;;  %v3394_v25 = vunpack.c.l.bf16 %v9066_v42  ;;  %v9079_v4 = vld [vmem:[%s5951_s14 + $0x40] sm:$0xff]   ;;  %s5494_s3 = sshll.u32 %s5630_s13, 4  ;;  %s5495_s3 = int_to_ptr.vmem [resolvable:$false] %s5494_s3 }
 0x445   : > { %v3085_v47 = vadd.f32 %v3084_v19, %v2924_v33  ;;  %v3136_v43 = vmax.f32 %v3082_v16, 0.0  ;;  %v3397_v60 = vunpack.c.h.bf16 %v9079_v4  ;;  %v9131_v16 = vld [vmem:[%s5951_s14 + $0x70] sm:$0xff]   ;;  %s5496_s19 = scalar_lea.vmem %s5495_s3, 2048  ;;  %p5497_p13 = scmp.lt.s32.totalorder %s9309_s8, %s5495_s3 }
 0x446   : > { %v3139_v48 = vmax.f32 %v3093_v61, 0.0  ;;  %v9071_v11 = vrot.slane %v3394_v25, 1  ;;  %v3409_v20 = vunpack.c.h.bf16 %v9131_v16  ;;  %v9135_v61 = vld [vmem:[%s5951_s14 + $0x78] sm:$0xff]   ;;  %p5498_p6 = scmp.lt.s32.totalorder %s5496_s19, %s5490_s18 }
 0x447   : > { %v3137_v36 = vmax.f32 %v3085_v47, 0.0  ;;  %v9086_v32 = vrot.slane %v3397_v60, 1  ;;  %v3410_v19 = vunpack.c.l.bf16 %v9135_v61  ;;  %v3384_v47 = vunpack.c.l.bf16 %v9022_v63 }
 0x448   : > { %v3157_v56 = vpack.c.bf16 %v3139_v48, %v3138_v39  ;;  %v9076_v55 = vsel %vm10480_vm15, %v9069_v10, %v9071_v11  ;;  %v3454_v39 = vrot.slane %v3387_v31, 1  ;;  %v9139_v48 = vrot.slane %v3409_v20, 1  ;;  %vm10497_vm15 = vmmov %vm10481_vm1  ;;  %p5499_p8 = por %p5498_p6, %p5497_p13 }
 0x449   : > { %v3156_v3 = vpack.c.bf16 %v3137_v36, %v3136_v43  ;;  %v5018_v8 = vpop.f32.mrb[196].mxu1  ;;  %v9093_v0 = vsel %vm10481_vm1, %v9086_v32, %v9088_v54  ;;  %v9141_v43 = vrot.slane %v3410_v19, 1  ;;  %v3449_v36 = vrot.slane %v3384_v47, 1 }
 0x44a   : > { %v3106_v22 = vadd.f32 %v5018_v8, %v2945_v9  ;;  %v3097_v14 = vpop.f32.mrb[197].mxu1  ;;  %v3406_v9 = vunpack.c.l.bf16 %v9117_v44  ;;  %v9158_v8 = vld [vmem:[%s5951_s14 + $0x88] sm:$0xff]   ;;  %v3461_v47 = vrot.slane %v3391_v5, 1 }
 0x44b   : > { %v3098_v29 = vadd.f32 %v3097_v14, %v2937_v28  ;;  %v5019_v53 = vpop.f32.mrb[198].mxu1  ;;  %5060 = vmatprep.mubr.bf16.mxu0 %v3156_v3  ;;  %v9096_v28 = vld [vmem:[%s5951_s14 + $0x50] sm:$0xff]   ;;  %v9154_v3 = vld [vmem:[%s5951_s14 + $0x80] sm:$0xff]   ;;  %s4346_s14 = sshll.u32 %s5604_s30, 4  ;;  %s10506_s30 = sld [smem:[#allocation18_spill]] }
 0x44c   : > { %v3109_v46 = vadd.f32 %v5019_v53, %v2948_v21  ;;  %v3100_v45 = vpop.f32.mrb[199].mxu1  ;;  %5061 = vmatmul.mubr.bf16.gmra.mrb[196].mxu0 %v3157_v56  ;;  %v3142_v37 = vmax.f32 %v3106_v22, 0.0  ;;  %v9120_v21 = vrot.slane %v3405_v52, 1  ;;  %v9122_v27 = vrot.slane %v3406_v9, 1  ;;  %s3898_s6 = sadd.s32 %s4346_s14, %s4318_s15 }
 0x44d   : > { %v3101_v33 = vadd.f32 %v3100_v45, %v2940_v24  ;;  %v3140_v2 = vmax.f32 %v3098_v29, 0.0  ;;  %v3401_v24 = vunpack.c.h.bf16 %v9096_v28  ;;  %v9151_v56 = vsel %vm10485_vm9, %v9139_v48, %v9141_v43  ;;  %vm10500_vm9 = vmmov %vm10481_vm1  ;;  %s4319_s25 = sshll.u32 %s3898_s6, 6 }
 0x44e   : > { %v3143_v1 = vmax.f32 %v3109_v46, 0.0  ;;  %v9127_v30 = vsel %vm10483_vm7, %v9120_v21, %v9122_v27  ;;  %v3413_v63 = vunpack.c.h.bf16 %v9154_v3  ;;  %v3414_v22 = vunpack.c.l.bf16 %v9158_v8  ;;  %vm10499_vm7 = vmmov %vm10481_vm1  ;;  %s9307_s24 = scalar_lea.hbm %s10507_s4, %s4319_s25 }
 0x44f   : > { %v3141_v41 = vmax.f32 %v3101_v33, 0.0  ;;  %v9103_v38 = vrot.slane %v3401_v24, 1  ;;  %v3455_v29 = vsel %vm10486_vm10, %v9033_v50, %v3454_v39  ;;  %v3451_v45 = vsel %vm10487_vm12, %v3449_v36, %v9031_v51  ;;  %vm10501_vm10 = vmmov %vm10481_vm1 }
 0x450   : > { %v3159_v17 = vpack.c.bf16 %v3143_v1, %v3142_v37  ;;  %v9167_v1 = vrot.slane %v3413_v63, 1  ;;  %v3388_v52 = vunpack.c.l.bf16 %v9043_v18  ;;  %vm10502_vm12 = vmmov %vm10481_vm1 }
 0x451   : > { %v3158_v57 = vpack.c.bf16 %v3141_v41, %v3140_v2  ;;  %v9110_v26 = vsel %vm10482_vm8, %v9103_v38, %v9105_v7  ;;  %v9169_v2 = vrot.slane %v3414_v22, 1  ;;  %vm10498_vm8 = vmmov %vm10481_vm1  ;;  %p10508_p2 = scmp.ne.s32.totalorder %s10506_s30, 0 }
 0x452   : > { %v3456_v22 = vrot.slane %v3388_v52, 1 }
 0x453   : > { %5064 = vmatprep.mubr.bf16.mxu0 %v3158_v57  ;;  %v9176_v51 = vsel %vm10489_vm2, %v9167_v1, %v9169_v2  ;;  %vm10503_vm2 = vmmov %vm10481_vm1  ;;  %p5492_p9 = pnand %p5491_p10, %p10508_p2 }
 0x454   : > { %5065 = vmatmul.mubr.bf16.gmra.mrb[200].mxu0 %v3159_v17 }
 0x455   : > { %p5493_p5 = pneg %p5492_p9 }
 0x457   : > { %p5500_p12 = pnand %p5499_p8, %p5493_p5 }
 0x4aa   : > { %v5038_v14 = vpop.f32.mrb[172].mxu0 }
 0x4ab   : > { %v3274_v53 = vadd.f32 %v5038_v14, %v9146_v23  ;;  %v3265_v46 = vpop.f32.mrb[173].mxu0 }
 0x4ac   : > { %v3266_v40 = vadd.f32 %v9146_v23, %v3265_v46  ;;  %v5039_v25 = vpop.f32.mrb[174].mxu0 }
 0x4ad   : > { %v3531_v33 = vadd.f32 %v3455_v29, %v3274_v53  ;;  %v3268_v37 = vpop.f32.mrb[175].mxu0  ;;  %v3462_v25 = vsel %vm10492_vm13, %v9054_v6, %v3461_v47 }
 0x4ae   : > { %v3529_v41 = vadd.f32 %v3451_v45, %v3266_v40  ;;  %v3269_v17 = vadd.f32 %v9146_v23, %v3268_v37 }
 0x4af   : > { %v3555_v50 = vmax.f32 %v3531_v33, 0.0 }
 0x4b0   : > { %v3553_v57 = vmax.f32 %v3529_v41, 0.0  ;;  %v3530_v60 = vadd.f32 %v9038_v15, %v3269_v17  ;;  %v3458_v41 = vsel %vm10493_vm11, %v3456_v22, %v9052_v58 }
 0x4b1   : > { %v4324_v9 = vpack.c.bf16 %v3555_v50, %v3555_v50 }
 0x4b2   : > { %v4322_v24 = vpack.c.bf16 %v3553_v57, %v3553_v57  ;;  %v3554_v62 = vmax.f32 %v3530_v60, 0.0 }
 0x4b3   : > { %v3680_v34 = vshll.u32 %v4324_v9, 16 }
 0x4b4   : > { %v3661_v31 = vshrl.u32 %v4322_v24, 16  ;;  %v3664_v20 = vshll.u32 %v4322_v24, 16  ;;  %v4323_v19 = vpack.c.bf16 %v3554_v62, %v3554_v62 }
 0x4b5   : > { %v3682_v17 = vrot.slane %v3680_v34, 5 }
 0x4b6   : > { %v3663_v15 = vrot.slane %v3661_v31, 4  ;;  %v3666_v39 = vrot.slane %v3664_v20, 5  ;;  %v3670_v36 = vshll.u32 %v4323_v19, 16  ;;  %v3674_v63 = vshrl.u32 %v4323_v19, 16 }
 0x4b7   : > { %v3395_v19 = vunpack.c.h.bf16 %v9066_v42 }
 0x4b8   : > { %v3667_v14 = vor.u32 %v3666_v39, %v3663_v15  ;;  %v3672_v29 = vrot.slane %v3670_v36, 5  ;;  %v3676_v53 = vrot.slane %v3674_v63, 4  ;;  %v3392_v39 = vunpack.c.l.bf16 %v9062_v59 }
 0x4ba   : > { %v3668_v46 = vrot.slane %v3667_v14, 4  ;;  %v3677_v45 = vor.u32 %v3676_v53, %v3672_v29  ;;  %v5042_v40 = vpop.f32.mrb[176].mxu0  ;;  %v3468_v14 = vrot.slane %v3395_v19, 1 }
 0x4bb   : > { %v3289_v33 = vadd.f32 %v5042_v40, %v9146_v23  ;;  %v3280_v37 = vpop.f32.mrb[177].mxu0  ;;  %v3463_v40 = vrot.slane %v3392_v39, 1 }
 0x4bc   : > { %v3673_v50 = vsel %vm9183_vm0, %v3668_v46, %v3672_v29  ;;  %v3678_v57 = vrot.slane %v3677_v45, 4  ;;  %v3281_v60 = vadd.f32 %v9146_v23, %v3280_v37  ;;  %v5043_v5 = vpop.f32.mrb[178].mxu0  ;;  %v3469_v59 = vsel %vm10494_vm4, %v9071_v11, %v3468_v14 }
 0x4bd   : > { %3868 = vst [vmem:[%s9195_s16] sm:$0xf] %v3673_v50  ;;  %v3534_v6 = vadd.f32 %v3462_v25, %v3289_v33  ;;  %v3283_v24 = vpop.f32.mrb[179].mxu0 }
 0x4be   : > { %v3683_v62 = vsel %vm9183_vm0, %v3678_v57, %v3682_v17  ;;  %v3532_v52 = vadd.f32 %v3458_v41, %v3281_v60  ;;  %v3284_v58 = vadd.f32 %v9146_v23, %v3283_v24  ;;  %v3465_v60 = vsel %vm10495_vm14, %v3463_v40, %v9069_v10 }
 0x4bf   : > { %3869 = vst [vmem:[%s9195_s16 + $0x4] sm:$0xf] %v3683_v62  ;;  %v3558_v9 = vmax.f32 %v3534_v6, 0.0 }
 0x4c0   : > { %v3556_v31 = vmax.f32 %v3532_v52, 0.0  ;;  %v3533_v20 = vadd.f32 %v9059_v12, %v3284_v58 }
 0x4c1   : > { %v4327_v36 = vpack.c.bf16 %v3558_v9, %v3558_v9 }
 0x4c2   : > { %v4325_v47 = vpack.c.bf16 %v3556_v31, %v3556_v31  ;;  %v3557_v15 = vmax.f32 %v3533_v20, 0.0 }
 0x4c3   : > { %v3704_v25 = vshll.u32 %v4327_v36, 16 }
 0x4c4   : > { %v3685_v63 = vshrl.u32 %v4325_v47, 16  ;;  %v3688_v22 = vshll.u32 %v4325_v47, 16  ;;  %v4326_v34 = vpack.c.bf16 %v3557_v15, %v3557_v15  ;;  %v3399_v15 = vunpack.c.h.bf16 %v9083_v35 }
 0x4c5   : > { %v3706_v5 = vrot.slane %v3704_v25, 5 }
 0x4c6   : > { %v3687_v29 = vrot.slane %v3685_v63, 4  ;;  %v3690_v53 = vrot.slane %v3688_v22, 5  ;;  %v3694_v46 = vshll.u32 %v4326_v34, 16  ;;  %v3698_v45 = vshrl.u32 %v4326_v34, 16 }
 0x4c7   : > { %v3396_v63 = vunpack.c.l.bf16 %v9079_v4 }
 0x4c8   : > { %v3691_v33 = vor.u32 %v3690_v53, %v3687_v29  ;;  %v3696_v12 = vrot.slane %v3694_v46, 5  ;;  %v3700_v37 = vrot.slane %v3698_v45, 4  ;;  %v3475_v53 = vrot.slane %v3399_v15, 1 }
 0x4c9   : > { %v3400_v15 = vunpack.c.l.bf16 %v9096_v28 }
 0x4ca   : > { %v3692_v42 = vrot.slane %v3691_v33, 4  ;;  %v3701_v41 = vor.u32 %v3700_v37, %v3696_v12  ;;  %v5046_v17 = vpop.f32.mrb[180].mxu0  ;;  %v3470_v33 = vrot.slane %v3396_v63, 1  ;;  %v3476_v4 = vsel %vm10496_vm5, %v9088_v54, %v3475_v53 }
 0x4cb   : > { %v3304_v50 = vadd.f32 %v5046_v17, %v9146_v23  ;;  %v3295_v57 = vpop.f32.mrb[181].mxu0 }
 0x4cc   : > { %v3697_v6 = vsel %vm9183_vm0, %v3692_v42, %v3696_v12  ;;  %v3702_v24 = vrot.slane %v3701_v41, 4  ;;  %v3296_v62 = vadd.f32 %v9146_v23, %v3295_v57  ;;  %v5047_v52 = vpop.f32.mrb[182].mxu0  ;;  %v3472_v57 = vsel %vm10497_vm15, %v3470_v33, %v9086_v32 }
 0x4cd   : > { %3870 = vst [vmem:[%s9195_s16 + $0x8] sm:$0xf] %v3697_v6  ;;  %v3537_v58 = vadd.f32 %v3469_v59, %v3304_v50  ;;  %v3298_v9 = vpop.f32.mrb[183].mxu0 }
 0x4ce   : > { %v3707_v11 = vsel %vm9183_vm0, %v3702_v24, %v3706_v5  ;;  %v3535_v31 = vadd.f32 %v3465_v60, %v3296_v62  ;;  %v3299_v20 = vadd.f32 %v9146_v23, %v3298_v9 }
 0x4cf   : > { %3871 = vst [vmem:[%s9195_s16 + $0xc] sm:$0xf] %v3707_v11  ;;  %v3561_v19 = vmax.f32 %v3537_v58, 0.0 }
 0x4d0   : > { %v3559_v10 = vmax.f32 %v3535_v31, 0.0  ;;  %v3536_v47 = vadd.f32 %v9076_v55, %v3299_v20 }
 0x4d1   : > { %v4330_v22 = vpack.c.bf16 %v3561_v19, %v3561_v19  ;;  %v3403_v19 = vunpack.c.h.bf16 %v9100_v49 }
 0x4d2   : > { %v4328_v39 = vpack.c.bf16 %v3559_v10, %v3559_v10  ;;  %v3560_v36 = vmax.f32 %v3536_v47, 0.0 }
 0x4d3   : > { %v3728_v12 = vshll.u32 %v4330_v22, 16 }
 0x4d4   : > { %v3709_v34 = vshrl.u32 %v4328_v39, 16  ;;  %v3712_v14 = vshll.u32 %v4328_v39, 16  ;;  %v4329_v29 = vpack.c.bf16 %v3560_v36, %v3560_v36 }
 0x4d5   : > { %v3730_v60 = vrot.slane %v3728_v12, 5 }
 0x4d6   : > { %v3711_v46 = vrot.slane %v3709_v34, 4  ;;  %v3714_v45 = vrot.slane %v3712_v14, 5  ;;  %v3718_v40 = vshll.u32 %v4329_v29, 16  ;;  %v3722_v25 = vshrl.u32 %v4329_v29, 16 }
 0x4d7   : > { %v3482_v34 = vrot.slane %v3403_v19, 1 }
 0x4d8   : > { %v3715_v37 = vor.u32 %v3714_v45, %v3711_v46  ;;  %v3720_v55 = vrot.slane %v3718_v40, 5  ;;  %v3724_v42 = vrot.slane %v3722_v25, 4  ;;  %v3477_v45 = vrot.slane %v3400_v15, 1 }
 0x4d9   : > { %v3483_v28 = vsel %vm10481_vm1, %v9105_v7, %v3482_v34 }
 0x4da   : > { %v3716_v35 = vrot.slane %v3715_v37, 4  ;;  %v3725_v41 = vor.u32 %v3724_v42, %v3720_v55  ;;  %v5050_v17 = vpop.f32.mrb[184].mxu0 }
 0x4db   : > { %v3319_v59 = vadd.f32 %v5050_v17, %v9146_v23  ;;  %v3310_v50 = vpop.f32.mrb[185].mxu0 }
 0x4dc   : > { %v3721_v5 = vsel %vm9183_vm0, %v3716_v35, %v3720_v55  ;;  %v3726_v6 = vrot.slane %v3725_v41, 4  ;;  %v3311_v24 = vadd.f32 %v9146_v23, %v3310_v50  ;;  %v5051_v62 = vpop.f32.mrb[186].mxu0  ;;  %v3479_v35 = vsel %vm10498_vm8, %v3477_v45, %v9103_v38 }
 0x4dd   : > { %3872 = vst [vmem:[%s9195_s16 + $0x10] sm:$0xf] %v3721_v5  ;;  %v3540_v52 = vadd.f32 %v3476_v4, %v3319_v59  ;;  %v3313_v58 = vpop.f32.mrb[187].mxu0 }
 0x4de   : > { %v3731_v54 = vsel %vm9183_vm0, %v3726_v6, %v3730_v60  ;;  %v3538_v9 = vadd.f32 %v3472_v57, %v3311_v24  ;;  %v3314_v11 = vadd.f32 %v9146_v23, %v3313_v58 }
 0x4df   : > { %3873 = vst [vmem:[%s9195_s16 + $0x14] sm:$0xf] %v3731_v54  ;;  %v3564_v31 = vmax.f32 %v3540_v52, 0.0  ;;  %v3407_v52 = vunpack.c.h.bf16 %v9117_v44 }
 0x4e0   : > { %v3562_v32 = vmax.f32 %v3538_v9, 0.0  ;;  %v3539_v20 = vadd.f32 %v9093_v0, %v3314_v11  ;;  %v3404_v9 = vunpack.c.l.bf16 %v9113_v13 }
 0x4e1   : > { %v4333_v39 = vpack.c.bf16 %v3564_v31, %v3564_v31  ;;  %v3489_v19 = vrot.slane %v3407_v52, 1 }
 0x4e2   : > { %v4331_v10 = vpack.c.bf16 %v3562_v32, %v3562_v32  ;;  %v3563_v47 = vmax.f32 %v3539_v20, 0.0 }
 0x4e3   : > { %v3752_v40 = vshll.u32 %v4333_v39, 16  ;;  %v3490_v13 = vsel %vm10499_vm7, %v9122_v27, %v3489_v19 }
 0x4e4   : > { %v3733_v36 = vshrl.u32 %v4331_v10, 16  ;;  %v3736_v63 = vshll.u32 %v4331_v10, 16  ;;  %v4332_v22 = vpack.c.bf16 %v3563_v47, %v3563_v47 }
 0x4e5   : > { %v3754_v41 = vrot.slane %v3752_v40, 5 }
 0x4e6   : > { %v3735_v14 = vrot.slane %v3733_v36, 4  ;;  %v3738_v29 = vrot.slane %v3736_v63, 5  ;;  %v3742_v53 = vshll.u32 %v4332_v22, 16  ;;  %v3746_v46 = vshrl.u32 %v4332_v22, 16 }
 0x4e7   : > { %v3484_v36 = vrot.slane %v3404_v9, 1 }
 0x4e8   : > { %v3739_v25 = vor.u32 %v3738_v29, %v3735_v14  ;;  %v3744_v0 = vrot.slane %v3742_v53, 5  ;;  %v3748_v33 = vrot.slane %v3746_v46, 4 }
 0x4e9   : > { %v3486_v45 = vsel %vm10500_vm9, %v3484_v36, %v9120_v21  ;;  %v3412_v36 = vunpack.c.l.bf16 %v9154_v3 }
 0x4ea   : > { %v3740_v49 = vrot.slane %v3739_v25, 4  ;;  %v3749_v12 = vor.u32 %v3748_v33, %v3744_v0  ;;  %v5054_v37 = vpop.f32.mrb[188].mxu0 }
 0x4eb   : > { %v3334_v55 = vadd.f32 %v5054_v37, %v9146_v23  ;;  %v3325_v42 = vpop.f32.mrb[189].mxu0 }
 0x4ec   : > { %v3745_v17 = vsel %vm9183_vm0, %v3740_v49, %v3744_v0  ;;  %v3750_v4 = vrot.slane %v3749_v12, 4  ;;  %v3326_v59 = vadd.f32 %v9146_v23, %v3325_v42  ;;  %v5055_v50 = vpop.f32.mrb[190].mxu0 }
 0x4ed   : > { %3874 = vst [vmem:[%s9195_s16 + $0x18] sm:$0xf] %v3745_v17  ;;  %v3543_v57 = vadd.f32 %v3483_v28, %v3334_v55  ;;  %v3328_v60 = vpop.f32.mrb[191].mxu0 }
 0x4ee   : > { %v3755_v7 = vsel %vm9183_vm0, %v3750_v4, %v3754_v41  ;;  %v3541_v5 = vadd.f32 %v3479_v35, %v3326_v59  ;;  %v3329_v6 = vadd.f32 %v9146_v23, %v3328_v60 }
 0x4ef   : > { %3875 = vst [vmem:[%s9195_s16 + $0x1c] sm:$0xf] %v3755_v7  ;;  %v3567_v24 = vmax.f32 %v3543_v57, 0.0 }
 0x4f0   : > { %v3565_v38 = vmax.f32 %v3541_v5, 0.0  ;;  %v3542_v62 = vadd.f32 %v9110_v26, %v3329_v6 }
 0x4f1   : > { %v4336_v11 = vpack.c.bf16 %v3567_v24, %v3567_v24 }
 0x4f2   : > { %v4334_v58 = vpack.c.bf16 %v3565_v38, %v3565_v38  ;;  %v3566_v54 = vmax.f32 %v3542_v62, 0.0 }
 0x4f3   : > { %v3776_v63 = vshll.u32 %v4336_v11, 16 }
 0x4f4   : > { %v3757_v31 = vshrl.u32 %v4334_v58, 16  ;;  %v3760_v32 = vshll.u32 %v4334_v58, 16  ;;  %v4335_v20 = vpack.c.bf16 %v3566_v54, %v3566_v54 }
 0x4f5   : > { %v3778_v40 = vrot.slane %v3776_v63, 5 }
 0x4f6   : > { %v3759_v10 = vrot.slane %v3757_v31, 4  ;;  %v3762_v47 = vrot.slane %v3760_v32, 5  ;;  %v3766_v15 = vshll.u32 %v4335_v20, 16  ;;  %v3770_v39 = vshrl.u32 %v4335_v20, 16 }
 0x4f7   : > { %v3411_v32 = vunpack.c.h.bf16 %v9135_v61  ;;  %v3408_v20 = vunpack.c.l.bf16 %v9131_v16 }
 0x4f8   : > { %v3763_v22 = vor.u32 %v3762_v47, %v3759_v10  ;;  %v3768_v26 = vrot.slane %v3766_v15, 5  ;;  %v3772_v34 = vrot.slane %v3770_v39, 4  ;;  %v3415_v47 = vunpack.c.h.bf16 %v9158_v8 }
 0x4f9   : > { %v3496_v19 = vrot.slane %v3411_v32, 1  ;;  %v3491_v10 = vrot.slane %v3408_v20, 1 }
 0x4fa   : > { %v3764_v44 = vrot.slane %v3763_v22, 4  ;;  %v3773_v14 = vor.u32 %v3772_v34, %v3768_v26  ;;  %v5058_v29 = vpop.f32.mrb[192].mxu0 }
 0x4fb   : > { %v3349_v53 = vadd.f32 %v5058_v29, %v9146_v23  ;;  %v3340_v46 = vpop.f32.mrb[193].mxu0  ;;  %v3497_v39 = vsel %vm10501_vm10, %v9141_v43, %v3496_v19 }
 0x4fc   : > { %v3769_v25 = vsel %vm9183_vm0, %v3764_v44, %v3768_v26  ;;  %v3774_v0 = vrot.slane %v3773_v14, 4  ;;  %v3341_v33 = vadd.f32 %v9146_v23, %v3340_v46  ;;  %v5059_v49 = vpop.f32.mrb[194].mxu0  ;;  %v3493_v26 = vsel %vm10502_vm12, %v3491_v10, %v9139_v48 }
 0x4fd   : > { %3876 = vst [vmem:[%s9195_s16 + $0x20] sm:$0xf] %v3769_v25  ;;  %v3546_v12 = vadd.f32 %v3490_v13, %v3349_v53  ;;  %v3343_v37 = vpop.f32.mrb[195].mxu0  ;;  %v3503_v14 = vrot.slane %v3415_v47, 1  ;;  %v3498_v13 = vrot.slane %v3412_v36, 1 }
 0x4fe   : > { %v3779_v27 = vsel %vm9183_vm0, %v3774_v0, %v3778_v40  ;;  %v3544_v28 = vadd.f32 %v3486_v45, %v3341_v33  ;;  %v3344_v55 = vadd.f32 %v9146_v23, %v3343_v37 }
 0x4ff   : > { %3877 = vst [vmem:[%s9195_s16 + $0x24] sm:$0xf] %v3779_v27  ;;  %v3570_v42 = vmax.f32 %v3546_v12, 0.0  ;;  %v3504_v48 = vsel %vm10503_vm2, %v9169_v2, %v3503_v14  ;;  %v3500_v49 = vsel %vm10504_vm3, %v3498_v13, %v9167_v1 }
 0x500   : > { %v3568_v21 = vmax.f32 %v3544_v28, 0.0  ;;  %v3545_v35 = vadd.f32 %v9127_v30, %v3344_v55 }
 0x501   : > { %v4339_v4 = vpack.c.bf16 %v3570_v42, %v3570_v42 }
 0x502   : > { %v4337_v41 = vpack.c.bf16 %v3568_v21, %v3568_v21  ;;  %v3569_v17 = vmax.f32 %v3545_v35, 0.0 }
 0x503   : > { %v3800_v24 = vshll.u32 %v4339_v4, 16 }
 0x504   : > { %v3781_v59 = vshrl.u32 %v4337_v41, 16  ;;  %v3784_v50 = vshll.u32 %v4337_v41, 16  ;;  %v4338_v57 = vpack.c.bf16 %v3569_v17, %v3569_v17 }
 0x505   : > { %v3802_v9 = vrot.slane %v3800_v24, 5 }
 0x506   : > { %v3783_v60 = vrot.slane %v3781_v59, 4  ;;  %v3786_v7 = vrot.slane %v3784_v50, 5  ;;  %v3790_v5 = vshll.u32 %v4338_v57, 16  ;;  %v3794_v6 = vshrl.u32 %v4338_v57, 16 }
 0x508   : > { %v3787_v38 = vor.u32 %v3786_v7, %v3783_v60  ;;  %v3792_v62 = vrot.slane %v3790_v5, 5  ;;  %v3796_v52 = vrot.slane %v3794_v6, 4 }
 0x50a   : > { %v3788_v58 = vrot.slane %v3787_v38, 4  ;;  %v3797_v54 = vor.u32 %v3796_v52, %v3792_v62 }
 0x50c   : > { %v3793_v30 = vsel %vm9183_vm0, %v3788_v58, %v3792_v62  ;;  %v3798_v11 = vrot.slane %v3797_v54, 4 }
 0x50d   : > { %3878 = vst [vmem:[%s9195_s16 + $0x28] sm:$0xf] %v3793_v30 }
 0x50e   : > { %v3803_v31 = vsel %vm9183_vm0, %v3798_v11, %v3802_v9 }
 0x50f   : > { %3879 = vst [vmem:[%s9195_s16 + $0x2c] sm:$0xf] %v3803_v31 }
 0x51f   : > { %v5062_v15 = vpop.f32.mrb[196].mxu0 }
 0x520   : > { %v3364_v63 = vadd.f32 %v5062_v15, %v9146_v23  ;;  %v3355_v22 = vpop.f32.mrb[197].mxu0 }
 0x521   : > { %v3356_v61 = vadd.f32 %v9146_v23, %v3355_v22  ;;  %v5063_v34 = vpop.f32.mrb[198].mxu0 }
 0x522   : > { %v3549_v16 = vadd.f32 %v3497_v39, %v3364_v63  ;;  %v3358_v44 = vpop.f32.mrb[199].mxu0 }
 0x523   : > { %v3547_v29 = vadd.f32 %v3493_v26, %v3356_v61  ;;  %v3359_v8 = vadd.f32 %v9146_v23, %v3358_v44 }
 0x524   : > { %v3573_v53 = vmax.f32 %v3549_v16, 0.0 }
 0x525   : > { %v3571_v43 = vmax.f32 %v3547_v29, 0.0  ;;  %v3548_v3 = vadd.f32 %v9151_v56, %v3359_v8 }
 0x526   : > { %v4342_v25 = vpack.c.bf16 %v3573_v53, %v3573_v53 }
 0x527   : > { %v4340_v46 = vpack.c.bf16 %v3571_v43, %v3571_v43  ;;  %v3572_v45 = vmax.f32 %v3548_v3, 0.0  ;;  %v5066_v40 = vpop.f32.mrb[200].mxu0 }
 0x528   : > { %v3379_v0 = vadd.f32 %v5066_v40, %v9146_v23  ;;  %v3370_v33 = vpop.f32.mrb[201].mxu0  ;;  %v3824_v59 = vshll.u32 %v4342_v25, 16 }
 0x529   : > { %v3805_v12 = vshrl.u32 %v4340_v46, 16  ;;  %v3808_v37 = vshll.u32 %v4340_v46, 16  ;;  %v4341_v27 = vpack.c.bf16 %v3572_v45, %v3572_v45  ;;  %v3371_v28 = vadd.f32 %v9146_v23, %v3370_v33  ;;  %v5067_v55 = vpop.f32.mrb[202].mxu0 }
 0x52a   : > { %v3552_v56 = vadd.f32 %v3504_v48, %v3379_v0  ;;  %v3373_v42 = vpop.f32.mrb[203].mxu0  ;;  %v3826_v52 = vrot.slane %v3824_v59, 5 }
 0x52b   : > { %v3807_v21 = vrot.slane %v3805_v12, 4  ;;  %v3810_v35 = vrot.slane %v3808_v37, 5  ;;  %v3814_v41 = vshll.u32 %v4341_v27, 16  ;;  %v3818_v17 = vshrl.u32 %v4341_v27, 16 }
 0x52c   : > { %v3550_v2 = vadd.f32 %v3500_v49, %v3371_v28  ;;  %v3374_v4 = vadd.f32 %v9146_v23, %v3373_v42  ;;  %v3576_v60 = vmax.f32 %v3552_v56, 0.0 }
 0x52d   : > { %v3811_v1 = vor.u32 %v3810_v35, %v3807_v21  ;;  %v3816_v50 = vrot.slane %v3814_v41, 5  ;;  %v3820_v57 = vrot.slane %v3818_v17, 4 }
 0x52e   : > { %v3574_v7 = vmax.f32 %v3550_v2, 0.0  ;;  %v3551_v5 = vadd.f32 %v9176_v51, %v3374_v4  ;;  %v4345_v54 = vpack.c.bf16 %v3576_v60, %v3576_v60 }
 0x52f   : > { %v3812_v6 = vrot.slane %v3811_v1, 4  ;;  %v3821_v24 = vor.u32 %v3820_v57, %v3816_v50 }
 0x530   : > { %v4343_v38 = vpack.c.bf16 %v3574_v7, %v3574_v7  ;;  %v3575_v62 = vmax.f32 %v3551_v5, 0.0  ;;  %v3848_v10 = vshll.u32 %v4345_v54, 16 }
 0x531   : > { %v3817_v58 = vsel %vm9183_vm0, %v3812_v6, %v3816_v50  ;;  %v3822_v23 = vrot.slane %v3821_v24, 4 }
 0x532   : > { %3880 = vst [vmem:[%s9195_s16 + $0x30] sm:$0xf] %v3817_v58  ;;  %v3829_v9 = vshrl.u32 %v4343_v38, 16  ;;  %v3832_v30 = vshll.u32 %v4343_v38, 16  ;;  %v4344_v11 = vpack.c.bf16 %v3575_v62, %v3575_v62  ;;  %v3850_v22 = vrot.slane %v3848_v10, 5 }
 0x533   : > { %v3827_v51 = vsel %vm9183_vm0, %v3822_v23, %v3826_v52 }
 0x534   : > { %3881 = vst [vmem:[%s9195_s16 + $0x34] sm:$0xf] %v3827_v51  ;;  %v3831_v31 = vrot.slane %v3829_v9, 4  ;;  %v3834_v32 = vrot.slane %v3832_v30, 5  ;;  %v3838_v20 = vshll.u32 %v4344_v11, 16  ;;  %v3842_v19 = vshrl.u32 %v4344_v11, 16 }
 0x536   : > { %v3835_v47 = vor.u32 %v3834_v32, %v3831_v31  ;;  %v3840_v15 = vrot.slane %v3838_v20, 5  ;;  %v3844_v39 = vrot.slane %v3842_v19, 4 }
 0x538   : > { %v3836_v36 = vrot.slane %v3835_v47, 4  ;;  %v3845_v63 = vor.u32 %v3844_v39, %v3840_v15 }
 0x53a   : > { %v3841_v26 = vsel %vm9183_vm0, %v3836_v36, %v3840_v15  ;;  %v3846_v61 = vrot.slane %v3845_v63, 4 }
 0x53b   : > { %3882 = vst [vmem:[%s9195_s16 + $0x38] sm:$0xf] %v3841_v26 }
 0x53c   : > { %v3851_v34 = vsel %vm9183_vm0, %v3846_v61, %v3850_v22 }
 0x53d   : > { %3883 = vst [vmem:[%s9195_s16 + $0x3c] sm:$0xf] %v3851_v34 }
 0x53e   : > { %5503 = shalt.err (!%p5500_p12)
}
 0x53f   : > { %s5504_s20 = scalar_lea.hbm %s9307_s24, 1024  ;;  %s5508_s14 = scalar_lea.hbm %s10507_s4, 4096 }
 0x540   : > { %p5505_p4 = scmp.ne.s32.totalorder %s9307_s24, %s5504_s20  ;;  %p5509_p0 = scmp.lt.u32.totalorder %s9307_s24, %s10507_s4 }
 0x541   : > { %p5510_p1 = scmp.lt.u32.totalorder %s5508_s14, %s5504_s20  ;;  %p5512_p10 = scmp.lt.u32.totalorder %s5504_s20, %s9307_s24 }
 0x542   : > { %p5506_p7 = pnand %p5505_p4, %p10508_p2 }
 0x543   : > { %p5511_p11 = por %p5510_p1, %p5509_p0 }
 0x544   : > { %p5507_p3 = pneg %p5506_p7 }
 0x545   : > { %p5513_p9 = por %p5512_p10, %p5511_p11 }
 0x547   : > { %p5514_p5 = pnand %p5513_p9, %p5507_p3 }
 0x549   : > { %5517 = shalt.err (!%p5514_p5)
}
 0x54a   : > { %s5631_s25 = smov 64   ;;  %s5632_s12 = smov 4  }
 0x54b   : > { %5101 = dma.vmem_to_hbm [thread:$0]  (%p10508_p2), %s9309_s8, 1024, %s9307_s24, %s9317_s1, %s5631_s25, %s5631_s25, %s5632_s12  }
 0x54c PF: > { %s10509_s21 = sld [smem:[#allocation15_spill]]  ;;  %s10510_s18 = sld [smem:[#allocation19_spill]] }
 0x54d   : > { %p5128_p13 = scmp.ge.s32.totalorder %s5620_s11, 2 }
 0x552   : > { %s3916_s13 = sand.u32 1, %s10509_s21   ;;  %p10511_p6 = scmp.ne.s32.totalorder %s10510_s18, 0 }
 0x553   : > { %s3917_s3 = scalar_lea.sflag [#allocation4], %s3916_s13 }
 0x554   : > { %p5118_p8 = pnand %p5128_p13, %p10511_p6 }
 0x556   : > { %5575 = dma.done.wait (!%p5118_p8), %s3917_s3, 1024  }
 0x557   : > { %5577 = vsyncadd (!%p5118_p8), %s3917_s3, 4294966272  ;;  %s25_s11 = sadd.s32 1, %s5620_s11   ;;  %s10512_s24 = sld [smem:[#allocation16_spill]] }
 0x558   : > { %p22_p12 = scmp.ge.s32.totalorder %s25_s11, 6   ;;  %s10513_s25 = smov %s5588_s26 }
 0x559   : > { %s10514_s26 = smov %s5880_s27  ;;  %s10515_s27 = smov %s5596_s28 }
 0x55a   : > { %s10516_s28 = smov %s5600_s29  ;;  %s10517_s29 = smov %s5875_s7 }
 0x55b   : > { %s10518_s30 = smov %s5612_s9  ;;  %s10519_s8 = smov %s5616_s10 }
 0x55c   : > { %s10520_s9 = smov %s10523_s17  ;;  %s10521_s10 = smov %s10527_s22 }
 0x55d   :  { %24 = sbr.rel (!%p22_p12) target bundleno = 17 (0x11), region = 106 }
 0x564   :  { %3922 = vsyncpa [#allocation3], 1 }
 0x565   :  { %3924 = vsyncpa [#allocation3 + $0x1], 1 }
 0x566   :  { %3925 = vsyncpa [#allocation6], 1 }
 0x567   :  { %3926 = vsyncpa [#allocation9], 1 }
 0x568   :  { %3927 = vsyncpa [#allocation4], 1 }
 0x569   :  { %3929 = vsyncpa [#allocation4 + $0x1], 1 }

</bundles_post_ra>
